<compile_context>
chip_gen: v7x
topology: tpu7x:2x2x1
jax: 0.10.0
libtpu: 0.0.40
codegen_flags: <defaults>
</compile_context>

<pallas_src>
import numpy as np
import jax
import jax.numpy as jnp
from jax.experimental import pallas as pl
from jax.experimental.pallas import tpu as pltpu

H = W = 14
NPIX = H * W                 # 196 valid pixels, row-major flat
NLANE = 256                  # lane-padded flat grid (2 full vregs)
CIN = 128
COUT = 32

C_X140 = 256
N_SMALL = 13                                     # x147 ... x231
CONV_OFF = C_X140 + N_SMALL * COUT               # 672  (x238 slot)
X245_OFF = CONV_OFF + COUT                       # 704
C_TOTAL = X245_OFF + COUT                        # 736


def fused_kernel(*refs):
    # refs: masks(9,1,256), w(9,32,128), xp(128,256), x140(256,196),
    #       13 x small(32,196), x245(32,196), out(736,196)
    mask_ref, w_ref, xp_ref, x140_ref = refs[0], refs[1], refs[2], refs[3]
    small_refs = refs[4:4 + N_SMALL]
    x245_ref = refs[4 + N_SMALL]
    o_ref = refs[5 + N_SMALL]

    # ---- channel concat: sublane-aligned, full-lane-width copies ----
    o_ref[0:C_X140, :] = x140_ref[...]
    for i in range(N_SMALL):
        c0 = C_X140 + i * COUT
        o_ref[c0:c0 + COUT, :] = small_refs[i][...]
    o_ref[X245_OFF:X245_OFF + COUT, :] = x245_ref[...]

    # ---- 3x3 'same' conv (CHW) on the flat 196-lane grid ----
    x = xp_ref[...]                               # (128, 256); lanes >=196 are 0
    acc = jnp.zeros((COUT, NLANE), jnp.float32)
    for t in range(9):                            # statically unrolled taps
        dy, dx = t // 3 - 1, t % 3 - 1
        off = dy * W + dx                         # flat neighbor shift
        rolled = x if off == 0 else pltpu.roll(x, shift=(NLANE - off) % NLANE, axis=1)
        xs = rolled * mask_ref[t]                 # zero out-of-grid neighbors
        acc = acc + jnp.dot(w_ref[t], xs, preferred_element_type=jnp.float32)
    o_ref[CONV_OFF:CONV_OFF + COUT, :] = acc[:, :NPIX]


def prepare_conv_weights(w_oihw):
    """(O, I, Kh, Kw) -> (Kh*Kw, O, I). Done once at parameter-prep time."""
    return jnp.transpose(w_oihw, (2, 3, 0, 1)).reshape(9, COUT, CIN)


def prepare_tap_masks():
    """(9, 1, 256) f32 0/1 masks: tap neighbor in-bounds for output lane q."""
    q = np.arange(NLANE)
    y, x = q // W, q % W
    valid = q < NPIX
    rows = []
    for t in range(9):
        dy, dx = t // 3 - 1, t % 3 - 1
        ok = valid & (y + dy >= 0) & (y + dy < H) & (x + dx >= 0) & (x + dx < W)
        rows.append(ok.astype(np.float32))
    return jnp.asarray(np.stack(rows)[:, None, :])


def forward(params, x237, x140, x147, x154, x161, x168, x175, x182,
            x189, x196, x203, x210, x217, x224, x231, x245):
    smalls = (x147, x154, x161, x168, x175, x182, x189,
              x196, x203, x210, x217, x224, x231)

    # free reshapes (batch == 1, contiguous); only real copy is the lane pad
    xp = jnp.pad(x237.reshape(CIN, NPIX), ((0, 0), (0, NLANE - NPIX)))
    x140_f = x140.reshape(C_X140, NPIX)
    smalls_f = [s.reshape(COUT, NPIX) for s in smalls]
    x245_f = x245.reshape(COUT, NPIX)

    in_specs = (
        [pl.BlockSpec((9, 1, NLANE), lambda i: (0, 0, 0)),
         pl.BlockSpec((9, COUT, CIN), lambda i: (0, 0, 0)),
         pl.BlockSpec((CIN, NLANE), lambda i: (0, 0)),
         pl.BlockSpec((C_X140, NPIX), lambda i: (0, 0))]
        + [pl.BlockSpec((COUT, NPIX), lambda i: (0, 0)) for _ in range(N_SMALL)]
        + [pl.BlockSpec((COUT, NPIX), lambda i: (0, 0))]
    )

    out = pl.pallas_call(
        fused_kernel,
        grid=(1,),
        in_specs=in_specs,
        out_specs=pl.BlockSpec((C_TOTAL, NPIX), lambda i: (0, 0)),
        out_shape=jax.ShapeDtypeStruct((C_TOTAL, NPIX), jnp.float32),
        compiler_params=pltpu.CompilerParams(
            dimension_semantics=("arbitrary",)),
    )(params["masks"], params["w_taps"], xp, x140_f, *smalls_f, x245_f)

    return out.reshape(1, C_TOTAL, H, W)          # free reshape (contiguous)


if __name__ == "__main__":
    key = jax.random.PRNGKey(0)
    keys = jax.random.split(key, 17)

    # deterministic parameter init (Conv2d(128, 32, 3x3), no bias)
    fan_in = CIN * 3 * 3
    w_oihw = jax.random.normal(keys[0], (COUT, CIN, 3, 3), jnp.float32) * (1.0 / fan_in) ** 0.5
    params = {
        "conv2d66_w_oihw": w_oihw,
        "w_taps": prepare_conv_weights(w_oihw),   # prepped once
        "masks": prepare_tap_masks(),             # prepped once
    }

    # inputs, shapes taken straight from the module
    x237 = jax.random.normal(keys[1], (1, CIN, H, W), jnp.float32)
    x140 = jax.random.normal(keys[2], (1, 256, H, W), jnp.float32)
    small = [jax.random.normal(keys[3 + i], (1, 32, H, W), jnp.float32)
             for i in range(14)]
    (x147, x154, x161, x168, x175, x182, x189,
     x196, x203, x210, x217, x224, x231, x245) = small

    fwd = jax.jit(forward)
    out = fwd(params, x237, x140, x147, x154, x161, x168, x175, x182,
              x189, x196, x203, x210, x217, x224, x231, x245)
    out = jax.block_until_ready(out)

    assert out.shape == (1, C_TOTAL, H, W), out.shape  # (1, 736, 14, 14)

    # reference: lax conv + plain concat
    ref_conv = jax.lax.conv_general_dilated(
        x237, w_oihw, window_strides=(1, 1), padding="SAME",
        dimension_numbers=("NCHW", "OIHW", "NCHW"))
    ref = jnp.concatenate(
        [x140, x147, x154, x161, x168, x175, x182, x189,
         x196, x203, x210, x217, x224, x231, ref_conv, x245], axis=1)
    assert jnp.allclose(out, ref, atol=2e-4, rtol=2e-4), \
        float(jnp.max(jnp.abs(out - ref)))

    print("KERNEL_OK")
</pallas_src>

<mosaic_0001>
module attributes {stable_mosaic.version = 11 : i64} {
  func.func @fused_kernel(%arg0: i32, %arg1: memref<9x1x256xf32, #tpu.memory_space<vmem>>, %arg2: memref<9x32x128xf32, #tpu.memory_space<vmem>>, %arg3: memref<128x256xf32, #tpu.memory_space<vmem>>, %arg4: memref<256x196xf32, #tpu.memory_space<vmem>>, %arg5: memref<32x196xf32, #tpu.memory_space<vmem>>, %arg6: memref<32x196xf32, #tpu.memory_space<vmem>>, %arg7: memref<32x196xf32, #tpu.memory_space<vmem>>, %arg8: memref<32x196xf32, #tpu.memory_space<vmem>>, %arg9: memref<32x196xf32, #tpu.memory_space<vmem>>, %arg10: memref<32x196xf32, #tpu.memory_space<vmem>>, %arg11: memref<32x196xf32, #tpu.memory_space<vmem>>, %arg12: memref<32x196xf32, #tpu.memory_space<vmem>>, %arg13: memref<32x196xf32, #tpu.memory_space<vmem>>, %arg14: memref<32x196xf32, #tpu.memory_space<vmem>>, %arg15: memref<32x196xf32, #tpu.memory_space<vmem>>, %arg16: memref<32x196xf32, #tpu.memory_space<vmem>>, %arg17: memref<32x196xf32, #tpu.memory_space<vmem>>, %arg18: memref<32x196xf32, #tpu.memory_space<vmem>>, %arg19: memref<736x196xf32, #tpu.memory_space<vmem>>) attributes {dimension_semantics = [#tpu.dimension_semantics<arbitrary>], iteration_bounds = array<i64: 1>, scalar_prefetch = 0 : i64, scratch_operands = 0 : i64, tpu.core_type = #tpu.core_type<tc>, window_params = [{pipeline_mode = #tpu.pipeline_mode<synchronous>, transform_indices = @transform_0, window_bounds = array<i64: 9, 1, 256>}, {pipeline_mode = #tpu.pipeline_mode<synchronous>, transform_indices = @transform_1, window_bounds = array<i64: 9, 32, 128>}, {pipeline_mode = #tpu.pipeline_mode<synchronous>, transform_indices = @transform_2, window_bounds = array<i64: 128, 256>}, {pipeline_mode = #tpu.pipeline_mode<synchronous>, transform_indices = @transform_3, window_bounds = array<i64: 256, 196>}, {pipeline_mode = #tpu.pipeline_mode<synchronous>, transform_indices = @transform_4, window_bounds = array<i64: 32, 196>}, {pipeline_mode = #tpu.pipeline_mode<synchronous>, transform_indices = @transform_5, window_bounds = array<i64: 32, 196>}, {pipeline_mode = #tpu.pipeline_mode<synchronous>, transform_indices = @transform_6, window_bounds = array<i64: 32, 196>}, {pipeline_mode = #tpu.pipeline_mode<synchronous>, transform_indices = @transform_7, window_bounds = array<i64: 32, 196>}, {pipeline_mode = #tpu.pipeline_mode<synchronous>, transform_indices = @transform_8, window_bounds = array<i64: 32, 196>}, {pipeline_mode = #tpu.pipeline_mode<synchronous>, transform_indices = @transform_9, window_bounds = array<i64: 32, 196>}, {pipeline_mode = #tpu.pipeline_mode<synchronous>, transform_indices = @transform_10, window_bounds = array<i64: 32, 196>}, {pipeline_mode = #tpu.pipeline_mode<synchronous>, transform_indices = @transform_11, window_bounds = array<i64: 32, 196>}, {pipeline_mode = #tpu.pipeline_mode<synchronous>, transform_indices = @transform_12, window_bounds = array<i64: 32, 196>}, {pipeline_mode = #tpu.pipeline_mode<synchronous>, transform_indices = @transform_13, window_bounds = array<i64: 32, 196>}, {pipeline_mode = #tpu.pipeline_mode<synchronous>, transform_indices = @transform_14, window_bounds = array<i64: 32, 196>}, {pipeline_mode = #tpu.pipeline_mode<synchronous>, transform_indices = @transform_15, window_bounds = array<i64: 32, 196>}, {pipeline_mode = #tpu.pipeline_mode<synchronous>, transform_indices = @transform_16, window_bounds = array<i64: 32, 196>}, {pipeline_mode = #tpu.pipeline_mode<synchronous>, transform_indices = @transform_17, window_bounds = array<i64: 32, 196>}, {pipeline_mode = #tpu.pipeline_mode<synchronous>, transform_indices = @transform_18, window_bounds = array<i64: 736, 196>}]} {
    %c0 = arith.constant 0 : index
    %c0_0 = arith.constant 0 : index
    %0 = vector.load %arg4[%c0, %c0_0] : memref<256x196xf32, #tpu.memory_space<vmem>>, vector<256x196xf32>
    %c0_1 = arith.constant 0 : index
    %c0_2 = arith.constant 0 : index
    %1 = vector.load %arg19[%c0_1, %c0_2] : memref<736x196xf32, #tpu.memory_space<vmem>>, vector<256x196xf32>
    tpu.vector_store %arg19[%c0_1, %c0_2], %0 {strides = array<i32>} : memref<736x196xf32, #tpu.memory_space<vmem>>, vector<256x196xf32>,
    %c0_3 = arith.constant 0 : index
    %c0_4 = arith.constant 0 : index
    %2 = vector.load %arg5[%c0_3, %c0_4] : memref<32x196xf32, #tpu.memory_space<vmem>>, vector<32x196xf32>
    %c256 = arith.constant 256 : index
    %c0_5 = arith.constant 0 : index
    %3 = vector.load %arg19[%c256, %c0_5] : memref<736x196xf32, #tpu.memory_space<vmem>>, vector<32x196xf32>
    tpu.vector_store %arg19[%c256, %c0_5], %2 {strides = array<i32>} : memref<736x196xf32, #tpu.memory_space<vmem>>, vector<32x196xf32>,
    %c0_6 = arith.constant 0 : index
    %c0_7 = arith.constant 0 : index
    %4 = vector.load %arg6[%c0_6, %c0_7] : memref<32x196xf32, #tpu.memory_space<vmem>>, vector<32x196xf32>
    %c288 = arith.constant 288 : index
    %c0_8 = arith.constant 0 : index
    %5 = vector.load %arg19[%c288, %c0_8] : memref<736x196xf32, #tpu.memory_space<vmem>>, vector<32x196xf32>
    tpu.vector_store %arg19[%c288, %c0_8], %4 {strides = array<i32>} : memref<736x196xf32, #tpu.memory_space<vmem>>, vector<32x196xf32>,
    %c0_9 = arith.constant 0 : index
    %c0_10 = arith.constant 0 : index
    %6 = vector.load %arg7[%c0_9, %c0_10] : memref<32x196xf32, #tpu.memory_space<vmem>>, vector<32x196xf32>
    %c320 = arith.constant 320 : index
    %c0_11 = arith.constant 0 : index
    %7 = vector.load %arg19[%c320, %c0_11] : memref<736x196xf32, #tpu.memory_space<vmem>>, vector<32x196xf32>
    tpu.vector_store %arg19[%c320, %c0_11], %6 {strides = array<i32>} : memref<736x196xf32, #tpu.memory_space<vmem>>, vector<32x196xf32>,
    %c0_12 = arith.constant 0 : index
    %c0_13 = arith.constant 0 : index
    %8 = vector.load %arg8[%c0_12, %c0_13] : memref<32x196xf32, #tpu.memory_space<vmem>>, vector<32x196xf32>
    %c352 = arith.constant 352 : index
    %c0_14 = arith.constant 0 : index
    %9 = vector.load %arg19[%c352, %c0_14] : memref<736x196xf32, #tpu.memory_space<vmem>>, vector<32x196xf32>
    tpu.vector_store %arg19[%c352, %c0_14], %8 {strides = array<i32>} : memref<736x196xf32, #tpu.memory_space<vmem>>, vector<32x196xf32>,
    %c0_15 = arith.constant 0 : index
    %c0_16 = arith.constant 0 : index
    %10 = vector.load %arg9[%c0_15, %c0_16] : memref<32x196xf32, #tpu.memory_space<vmem>>, vector<32x196xf32>
    %c384 = arith.constant 384 : index
    %c0_17 = arith.constant 0 : index
    %11 = vector.load %arg19[%c384, %c0_17] : memref<736x196xf32, #tpu.memory_space<vmem>>, vector<32x196xf32>
    tpu.vector_store %arg19[%c384, %c0_17], %10 {strides = array<i32>} : memref<736x196xf32, #tpu.memory_space<vmem>>, vector<32x196xf32>,
    %c0_18 = arith.constant 0 : index
    %c0_19 = arith.constant 0 : index
    %12 = vector.load %arg10[%c0_18, %c0_19] : memref<32x196xf32, #tpu.memory_space<vmem>>, vector<32x196xf32>
    %c416 = arith.constant 416 : index
    %c0_20 = arith.constant 0 : index
    %13 = vector.load %arg19[%c416, %c0_20] : memref<736x196xf32, #tpu.memory_space<vmem>>, vector<32x196xf32>
    tpu.vector_store %arg19[%c416, %c0_20], %12 {strides = array<i32>} : memref<736x196xf32, #tpu.memory_space<vmem>>, vector<32x196xf32>,
    %c0_21 = arith.constant 0 : index
    %c0_22 = arith.constant 0 : index
    %14 = vector.load %arg11[%c0_21, %c0_22] : memref<32x196xf32, #tpu.memory_space<vmem>>, vector<32x196xf32>
    %c448 = arith.constant 448 : index
    %c0_23 = arith.constant 0 : index
    %15 = vector.load %arg19[%c448, %c0_23] : memref<736x196xf32, #tpu.memory_space<vmem>>, vector<32x196xf32>
    tpu.vector_store %arg19[%c448, %c0_23], %14 {strides = array<i32>} : memref<736x196xf32, #tpu.memory_space<vmem>>, vector<32x196xf32>,
    %c0_24 = arith.constant 0 : index
    %c0_25 = arith.constant 0 : index
    %16 = vector.load %arg12[%c0_24, %c0_25] : memref<32x196xf32, #tpu.memory_space<vmem>>, vector<32x196xf32>
    %c480 = arith.constant 480 : index
    %c0_26 = arith.constant 0 : index
    %17 = vector.load %arg19[%c480, %c0_26] : memref<736x196xf32, #tpu.memory_space<vmem>>, vector<32x196xf32>
    tpu.vector_store %arg19[%c480, %c0_26], %16 {strides = array<i32>} : memref<736x196xf32, #tpu.memory_space<vmem>>, vector<32x196xf32>,
    %c0_27 = arith.constant 0 : index
    %c0_28 = arith.constant 0 : index
    %18 = vector.load %arg13[%c0_27, %c0_28] : memref<32x196xf32, #tpu.memory_space<vmem>>, vector<32x196xf32>
    %c512 = arith.constant 512 : index
    %c0_29 = arith.constant 0 : index
    %19 = vector.load %arg19[%c512, %c0_29] : memref<736x196xf32, #tpu.memory_space<vmem>>, vector<32x196xf32>
    tpu.vector_store %arg19[%c512, %c0_29], %18 {strides = array<i32>} : memref<736x196xf32, #tpu.memory_space<vmem>>, vector<32x196xf32>,
    %c0_30 = arith.constant 0 : index
    %c0_31 = arith.constant 0 : index
    %20 = vector.load %arg14[%c0_30, %c0_31] : memref<32x196xf32, #tpu.memory_space<vmem>>, vector<32x196xf32>
    %c544 = arith.constant 544 : index
    %c0_32 = arith.constant 0 : index
    %21 = vector.load %arg19[%c544, %c0_32] : memref<736x196xf32, #tpu.memory_space<vmem>>, vector<32x196xf32>
    tpu.vector_store %arg19[%c544, %c0_32], %20 {strides = array<i32>} : memref<736x196xf32, #tpu.memory_space<vmem>>, vector<32x196xf32>,
    %c0_33 = arith.constant 0 : index
    %c0_34 = arith.constant 0 : index
    %22 = vector.load %arg15[%c0_33, %c0_34] : memref<32x196xf32, #tpu.memory_space<vmem>>, vector<32x196xf32>
    %c576 = arith.constant 576 : index
    %c0_35 = arith.constant 0 : index
    %23 = vector.load %arg19[%c576, %c0_35] : memref<736x196xf32, #tpu.memory_space<vmem>>, vector<32x196xf32>
    tpu.vector_store %arg19[%c576, %c0_35], %22 {strides = array<i32>} : memref<736x196xf32, #tpu.memory_space<vmem>>, vector<32x196xf32>,
    %c0_36 = arith.constant 0 : index
    %c0_37 = arith.constant 0 : index
    %24 = vector.load %arg16[%c0_36, %c0_37] : memref<32x196xf32, #tpu.memory_space<vmem>>, vector<32x196xf32>
    %c608 = arith.constant 608 : index
    %c0_38 = arith.constant 0 : index
    %25 = vector.load %arg19[%c608, %c0_38] : memref<736x196xf32, #tpu.memory_space<vmem>>, vector<32x196xf32>
    tpu.vector_store %arg19[%c608, %c0_38], %24 {strides = array<i32>} : memref<736x196xf32, #tpu.memory_space<vmem>>, vector<32x196xf32>,
    %c0_39 = arith.constant 0 : index
    %c0_40 = arith.constant 0 : index
    %26 = vector.load %arg17[%c0_39, %c0_40] : memref<32x196xf32, #tpu.memory_space<vmem>>, vector<32x196xf32>
    %c640 = arith.constant 640 : index
    %c0_41 = arith.constant 0 : index
    %27 = vector.load %arg19[%c640, %c0_41] : memref<736x196xf32, #tpu.memory_space<vmem>>, vector<32x196xf32>
    tpu.vector_store %arg19[%c640, %c0_41], %26 {strides = array<i32>} : memref<736x196xf32, #tpu.memory_space<vmem>>, vector<32x196xf32>,
    %c0_42 = arith.constant 0 : index
    %c0_43 = arith.constant 0 : index
    %28 = vector.load %arg18[%c0_42, %c0_43] : memref<32x196xf32, #tpu.memory_space<vmem>>, vector<32x196xf32>
    %c704 = arith.constant 704 : index
    %c0_44 = arith.constant 0 : index
    %29 = vector.load %arg19[%c704, %c0_44] : memref<736x196xf32, #tpu.memory_space<vmem>>, vector<32x196xf32>
    tpu.vector_store %arg19[%c704, %c0_44], %28 {strides = array<i32>} : memref<736x196xf32, #tpu.memory_space<vmem>>, vector<32x196xf32>,
    %c0_45 = arith.constant 0 : index
    %c0_46 = arith.constant 0 : index
    %30 = vector.load %arg3[%c0_45, %c0_46] : memref<128x256xf32, #tpu.memory_space<vmem>>, vector<128x256xf32>
    %cst = arith.constant 0.000000e+00 : f32
    %31 = vector.broadcast %cst : f32 to vector<32x256xf32>
    %c15_i32 = arith.constant 15 : i32
    %32 = tpu.dynamic_rotate %30 by %c15_i32 dim 1 : vector<128x256xf32>, i32 -> vector<128x256xf32>
    %c0_47 = arith.constant 0 : index
    %c0_48 = arith.constant 0 : index
    %c0_49 = arith.constant 0 : index
    %33 = vector.load %arg1[%c0_47, %c0_48, %c0_49] : memref<9x1x256xf32, #tpu.memory_space<vmem>>, vector<1x1x256xf32>
    %34 = vector.shape_cast %33 : vector<1x1x256xf32> to vector<1x256xf32>
    %35 = vector.broadcast %34 : vector<1x256xf32> to vector<128x256xf32>
    %36 = arith.mulf %32, %35 : vector<128x256xf32>
    %c0_50 = arith.constant 0 : index
    %c0_51 = arith.constant 0 : index
    %c0_52 = arith.constant 0 : index
    %37 = vector.load %arg2[%c0_50, %c0_51, %c0_52] : memref<9x32x128xf32, #tpu.memory_space<vmem>>, vector<1x32x128xf32>
    %38 = vector.shape_cast %37 : vector<1x32x128xf32> to vector<32x128xf32>
    %cst_53 = arith.constant dense<0.000000e+00> : vector<32x256xf32>
    %39 = tpu.matmul %38, %36, %cst_53 {dimension_numbers = #tpu.dot_dimension_numbers<[1], [0], [0], [1], [0, 0, 1, 1], [], []>} : vector<32x128xf32>, vector<128x256xf32>, vector<32x256xf32> -> vector<32x256xf32>
    %40 = arith.addf %31, %39 : vector<32x256xf32>
    %c14_i32 = arith.constant 14 : i32
    %41 = tpu.dynamic_rotate %30 by %c14_i32 dim 1 : vector<128x256xf32>, i32 -> vector<128x256xf32>
    %c1 = arith.constant 1 : index
    %c0_54 = arith.constant 0 : index
    %c0_55 = arith.constant 0 : index
    %42 = vector.load %arg1[%c1, %c0_54, %c0_55] : memref<9x1x256xf32, #tpu.memory_space<vmem>>, vector<1x1x256xf32>
    %43 = vector.shape_cast %42 : vector<1x1x256xf32> to vector<1x256xf32>
    %44 = vector.broadcast %43 : vector<1x256xf32> to vector<128x256xf32>
    %45 = arith.mulf %41, %44 : vector<128x256xf32>
    %c1_56 = arith.constant 1 : index
    %c0_57 = arith.constant 0 : index
    %c0_58 = arith.constant 0 : index
    %46 = vector.load %arg2[%c1_56, %c0_57, %c0_58] : memref<9x32x128xf32, #tpu.memory_space<vmem>>, vector<1x32x128xf32>
    %47 = vector.shape_cast %46 : vector<1x32x128xf32> to vector<32x128xf32>
    %cst_59 = arith.constant dense<0.000000e+00> : vector<32x256xf32>
    %48 = tpu.matmul %47, %45, %cst_59 {dimension_numbers = #tpu.dot_dimension_numbers<[1], [0], [0], [1], [0, 0, 1, 1], [], []>} : vector<32x128xf32>, vector<128x256xf32>, vector<32x256xf32> -> vector<32x256xf32>
    %49 = arith.addf %40, %48 : vector<32x256xf32>
    %c13_i32 = arith.constant 13 : i32
    %50 = tpu.dynamic_rotate %30 by %c13_i32 dim 1 : vector<128x256xf32>, i32 -> vector<128x256xf32>
    %c2 = arith.constant 2 : index
    %c0_60 = arith.constant 0 : index
    %c0_61 = arith.constant 0 : index
    %51 = vector.load %arg1[%c2, %c0_60, %c0_61] : memref<9x1x256xf32, #tpu.memory_space<vmem>>, vector<1x1x256xf32>
    %52 = vector.shape_cast %51 : vector<1x1x256xf32> to vector<1x256xf32>
    %53 = vector.broadcast %52 : vector<1x256xf32> to vector<128x256xf32>
    %54 = arith.mulf %50, %53 : vector<128x256xf32>
    %c2_62 = arith.constant 2 : index
    %c0_63 = arith.constant 0 : index
    %c0_64 = arith.constant 0 : index
    %55 = vector.load %arg2[%c2_62, %c0_63, %c0_64] : memref<9x32x128xf32, #tpu.memory_space<vmem>>, vector<1x32x128xf32>
    %56 = vector.shape_cast %55 : vector<1x32x128xf32> to vector<32x128xf32>
    %cst_65 = arith.constant dense<0.000000e+00> : vector<32x256xf32>
    %57 = tpu.matmul %56, %54, %cst_65 {dimension_numbers = #tpu.dot_dimension_numbers<[1], [0], [0], [1], [0, 0, 1, 1], [], []>} : vector<32x128xf32>, vector<128x256xf32>, vector<32x256xf32> -> vector<32x256xf32>
    %58 = arith.addf %49, %57 : vector<32x256xf32>
    %c1_i32 = arith.constant 1 : i32
    %59 = tpu.dynamic_rotate %30 by %c1_i32 dim 1 : vector<128x256xf32>, i32 -> vector<128x256xf32>
    %c3 = arith.constant 3 : index
    %c0_66 = arith.constant 0 : index
    %c0_67 = arith.constant 0 : index
    %60 = vector.load %arg1[%c3, %c0_66, %c0_67] : memref<9x1x256xf32, #tpu.memory_space<vmem>>, vector<1x1x256xf32>
    %61 = vector.shape_cast %60 : vector<1x1x256xf32> to vector<1x256xf32>
    %62 = vector.broadcast %61 : vector<1x256xf32> to vector<128x256xf32>
    %63 = arith.mulf %59, %62 : vector<128x256xf32>
    %c3_68 = arith.constant 3 : index
    %c0_69 = arith.constant 0 : index
    %c0_70 = arith.constant 0 : index
    %64 = vector.load %arg2[%c3_68, %c0_69, %c0_70] : memref<9x32x128xf32, #tpu.memory_space<vmem>>, vector<1x32x128xf32>
    %65 = vector.shape_cast %64 : vector<1x32x128xf32> to vector<32x128xf32>
    %cst_71 = arith.constant dense<0.000000e+00> : vector<32x256xf32>
    %66 = tpu.matmul %65, %63, %cst_71 {dimension_numbers = #tpu.dot_dimension_numbers<[1], [0], [0], [1], [0, 0, 1, 1], [], []>} : vector<32x128xf32>, vector<128x256xf32>, vector<32x256xf32> -> vector<32x256xf32>
    %67 = arith.addf %58, %66 : vector<32x256xf32>
    %c4 = arith.constant 4 : index
    %c0_72 = arith.constant 0 : index
    %c0_73 = arith.constant 0 : index
    %68 = vector.load %arg1[%c4, %c0_72, %c0_73] : memref<9x1x256xf32, #tpu.memory_space<vmem>>, vector<1x1x256xf32>
    %69 = vector.shape_cast %68 : vector<1x1x256xf32> to vector<1x256xf32>
    %70 = vector.broadcast %69 : vector<1x256xf32> to vector<128x256xf32>
    %71 = arith.mulf %30, %70 : vector<128x256xf32>
    %c4_74 = arith.constant 4 : index
    %c0_75 = arith.constant 0 : index
    %c0_76 = arith.constant 0 : index
    %72 = vector.load %arg2[%c4_74, %c0_75, %c0_76] : memref<9x32x128xf32, #tpu.memory_space<vmem>>, vector<1x32x128xf32>
    %73 = vector.shape_cast %72 : vector<1x32x128xf32> to vector<32x128xf32>
    %cst_77 = arith.constant dense<0.000000e+00> : vector<32x256xf32>
    %74 = tpu.matmul %73, %71, %cst_77 {dimension_numbers = #tpu.dot_dimension_numbers<[1], [0], [0], [1], [0, 0, 1, 1], [], []>} : vector<32x128xf32>, vector<128x256xf32>, vector<32x256xf32> -> vector<32x256xf32>
    %75 = arith.addf %67, %74 : vector<32x256xf32>
    %c255_i32 = arith.constant 255 : i32
    %76 = tpu.dynamic_rotate %30 by %c255_i32 dim 1 : vector<128x256xf32>, i32 -> vector<128x256xf32>
    %c5 = arith.constant 5 : index
    %c0_78 = arith.constant 0 : index
    %c0_79 = arith.constant 0 : index
    %77 = vector.load %arg1[%c5, %c0_78, %c0_79] : memref<9x1x256xf32, #tpu.memory_space<vmem>>, vector<1x1x256xf32>
    %78 = vector.shape_cast %77 : vector<1x1x256xf32> to vector<1x256xf32>
    %79 = vector.broadcast %78 : vector<1x256xf32> to vector<128x256xf32>
    %80 = arith.mulf %76, %79 : vector<128x256xf32>
    %c5_80 = arith.constant 5 : index
    %c0_81 = arith.constant 0 : index
    %c0_82 = arith.constant 0 : index
    %81 = vector.load %arg2[%c5_80, %c0_81, %c0_82] : memref<9x32x128xf32, #tpu.memory_space<vmem>>, vector<1x32x128xf32>
    %82 = vector.shape_cast %81 : vector<1x32x128xf32> to vector<32x128xf32>
    %cst_83 = arith.constant dense<0.000000e+00> : vector<32x256xf32>
    %83 = tpu.matmul %82, %80, %cst_83 {dimension_numbers = #tpu.dot_dimension_numbers<[1], [0], [0], [1], [0, 0, 1, 1], [], []>} : vector<32x128xf32>, vector<128x256xf32>, vector<32x256xf32> -> vector<32x256xf32>
    %84 = arith.addf %75, %83 : vector<32x256xf32>
    %c243_i32 = arith.constant 243 : i32
    %85 = tpu.dynamic_rotate %30 by %c243_i32 dim 1 : vector<128x256xf32>, i32 -> vector<128x256xf32>
    %c6 = arith.constant 6 : index
    %c0_84 = arith.constant 0 : index
    %c0_85 = arith.constant 0 : index
    %86 = vector.load %arg1[%c6, %c0_84, %c0_85] : memref<9x1x256xf32, #tpu.memory_space<vmem>>, vector<1x1x256xf32>
    %87 = vector.shape_cast %86 : vector<1x1x256xf32> to vector<1x256xf32>
    %88 = vector.broadcast %87 : vector<1x256xf32> to vector<128x256xf32>
    %89 = arith.mulf %85, %88 : vector<128x256xf32>
    %c6_86 = arith.constant 6 : index
    %c0_87 = arith.constant 0 : index
    %c0_88 = arith.constant 0 : index
    %90 = vector.load %arg2[%c6_86, %c0_87, %c0_88] : memref<9x32x128xf32, #tpu.memory_space<vmem>>, vector<1x32x128xf32>
    %91 = vector.shape_cast %90 : vector<1x32x128xf32> to vector<32x128xf32>
    %cst_89 = arith.constant dense<0.000000e+00> : vector<32x256xf32>
    %92 = tpu.matmul %91, %89, %cst_89 {dimension_numbers = #tpu.dot_dimension_numbers<[1], [0], [0], [1], [0, 0, 1, 1], [], []>} : vector<32x128xf32>, vector<128x256xf32>, vector<32x256xf32> -> vector<32x256xf32>
    %93 = arith.addf %84, %92 : vector<32x256xf32>
    %c242_i32 = arith.constant 242 : i32
    %94 = tpu.dynamic_rotate %30 by %c242_i32 dim 1 : vector<128x256xf32>, i32 -> vector<128x256xf32>
    %c7 = arith.constant 7 : index
    %c0_90 = arith.constant 0 : index
    %c0_91 = arith.constant 0 : index
    %95 = vector.load %arg1[%c7, %c0_90, %c0_91] : memref<9x1x256xf32, #tpu.memory_space<vmem>>, vector<1x1x256xf32>
    %96 = vector.shape_cast %95 : vector<1x1x256xf32> to vector<1x256xf32>
    %97 = vector.broadcast %96 : vector<1x256xf32> to vector<128x256xf32>
    %98 = arith.mulf %94, %97 : vector<128x256xf32>
    %c7_92 = arith.constant 7 : index
    %c0_93 = arith.constant 0 : index
    %c0_94 = arith.constant 0 : index
    %99 = vector.load %arg2[%c7_92, %c0_93, %c0_94] : memref<9x32x128xf32, #tpu.memory_space<vmem>>, vector<1x32x128xf32>
    %100 = vector.shape_cast %99 : vector<1x32x128xf32> to vector<32x128xf32>
    %cst_95 = arith.constant dense<0.000000e+00> : vector<32x256xf32>
    %101 = tpu.matmul %100, %98, %cst_95 {dimension_numbers = #tpu.dot_dimension_numbers<[1], [0], [0], [1], [0, 0, 1, 1], [], []>} : vector<32x128xf32>, vector<128x256xf32>, vector<32x256xf32> -> vector<32x256xf32>
    %102 = arith.addf %93, %101 : vector<32x256xf32>
    %c241_i32 = arith.constant 241 : i32
    %103 = tpu.dynamic_rotate %30 by %c241_i32 dim 1 : vector<128x256xf32>, i32 -> vector<128x256xf32>
    %c8 = arith.constant 8 : index
    %c0_96 = arith.constant 0 : index
    %c0_97 = arith.constant 0 : index
    %104 = vector.load %arg1[%c8, %c0_96, %c0_97] : memref<9x1x256xf32, #tpu.memory_space<vmem>>, vector<1x1x256xf32>
    %105 = vector.shape_cast %104 : vector<1x1x256xf32> to vector<1x256xf32>
    %106 = vector.broadcast %105 : vector<1x256xf32> to vector<128x256xf32>
    %107 = arith.mulf %103, %106 : vector<128x256xf32>
    %c8_98 = arith.constant 8 : index
    %c0_99 = arith.constant 0 : index
    %c0_100 = arith.constant 0 : index
    %108 = vector.load %arg2[%c8_98, %c0_99, %c0_100] : memref<9x32x128xf32, #tpu.memory_space<vmem>>, vector<1x32x128xf32>
    %109 = vector.shape_cast %108 : vector<1x32x128xf32> to vector<32x128xf32>
    %cst_101 = arith.constant dense<0.000000e+00> : vector<32x256xf32>
    %110 = tpu.matmul %109, %107, %cst_101 {dimension_numbers = #tpu.dot_dimension_numbers<[1], [0], [0], [1], [0, 0, 1, 1], [], []>} : vector<32x128xf32>, vector<128x256xf32>, vector<32x256xf32> -> vector<32x256xf32>
    %111 = arith.addf %102, %110 : vector<32x256xf32>
    %112 = vector.extract_strided_slice %111 {offsets = [0, 0], sizes = [32, 196], strides = [1, 1]} : vector<32x256xf32> to vector<32x196xf32>
    %c672 = arith.constant 672 : index
    %c0_102 = arith.constant 0 : index
    %113 = vector.load %arg19[%c672, %c0_102] : memref<736x196xf32, #tpu.memory_space<vmem>>, vector<32x196xf32>
    tpu.vector_store %arg19[%c672, %c0_102], %112 {strides = array<i32>} : memref<736x196xf32, #tpu.memory_space<vmem>>, vector<32x196xf32>,
    return
  }
  func.func @transform_0(%arg0: i32) -> (i32, i32, i32) {
    %c0_i32 = arith.constant 0 : i32
    %c0_i32_0 = arith.constant 0 : i32
    %c0_i32_1 = arith.constant 0 : i32
    %c0_i32_2 = arith.constant 0 : i32
    return %c0_i32, %c0_i32_0, %c0_i32_1 : i32, i32, i32
  }
  func.func @transform_1(%arg0: i32) -> (i32, i32, i32) {
    %c0_i32 = arith.constant 0 : i32
    %c0_i32_0 = arith.constant 0 : i32
    %c0_i32_1 = arith.constant 0 : i32
    %c0_i32_2 = arith.constant 0 : i32
    return %c0_i32, %c0_i32_0, %c0_i32_1 : i32, i32, i32
  }
  func.func @transform_2(%arg0: i32) -> (i32, i32) {
    %c0_i32 = arith.constant 0 : i32
    %c0_i32_0 = arith.constant 0 : i32
    %c0_i32_1 = arith.constant 0 : i32
    return %c0_i32, %c0_i32_0 : i32, i32
  }
  func.func @transform_3(%arg0: i32) -> (i32, i32) {
    %c0_i32 = arith.constant 0 : i32
    %c0_i32_0 = arith.constant 0 : i32
    %c0_i32_1 = arith.constant 0 : i32
    return %c0_i32, %c0_i32_0 : i32, i32
  }
  func.func @transform_4(%arg0: i32) -> (i32, i32) {
    %c0_i32 = arith.constant 0 : i32
    %c0_i32_0 = arith.constant 0 : i32
    %c0_i32_1 = arith.constant 0 : i32
    return %c0_i32, %c0_i32_0 : i32, i32
  }
  func.func @transform_5(%arg0: i32) -> (i32, i32) {
    %c0_i32 = arith.constant 0 : i32
    %c0_i32_0 = arith.constant 0 : i32
    %c0_i32_1 = arith.constant 0 : i32
    return %c0_i32, %c0_i32_0 : i32, i32
  }
  func.func @transform_6(%arg0: i32) -> (i32, i32) {
    %c0_i32 = arith.constant 0 : i32
    %c0_i32_0 = arith.constant 0 : i32
    %c0_i32_1 = arith.constant 0 : i32
    return %c0_i32, %c0_i32_0 : i32, i32
  }
  func.func @transform_7(%arg0: i32) -> (i32, i32) {
    %c0_i32 = arith.constant 0 : i32
    %c0_i32_0 = arith.constant 0 : i32
    %c0_i32_1 = arith.constant 0 : i32
    return %c0_i32, %c0_i32_0 : i32, i32
  }
  func.func @transform_8(%arg0: i32) -> (i32, i32) {
    %c0_i32 = arith.constant 0 : i32
    %c0_i32_0 = arith.constant 0 : i32
    %c0_i32_1 = arith.constant 0 : i32
    return %c0_i32, %c0_i32_0 : i32, i32
  }
  func.func @transform_9(%arg0: i32) -> (i32, i32) {
    %c0_i32 = arith.constant 0 : i32
    %c0_i32_0 = arith.constant 0 : i32
    %c0_i32_1 = arith.constant 0 : i32
    return %c0_i32, %c0_i32_0 : i32, i32
  }
  func.func @transform_10(%arg0: i32) -> (i32, i32) {
    %c0_i32 = arith.constant 0 : i32
    %c0_i32_0 = arith.constant 0 : i32
    %c0_i32_1 = arith.constant 0 : i32
    return %c0_i32, %c0_i32_0 : i32, i32
  }
  func.func @transform_11(%arg0: i32) -> (i32, i32) {
    %c0_i32 = arith.constant 0 : i32
    %c0_i32_0 = arith.constant 0 : i32
    %c0_i32_1 = arith.constant 0 : i32
    return %c0_i32, %c0_i32_0 : i32, i32
  }
  func.func @transform_12(%arg0: i32) -> (i32, i32) {
    %c0_i32 = arith.constant 0 : i32
    %c0_i32_0 = arith.constant 0 : i32
    %c0_i32_1 = arith.constant 0 : i32
    return %c0_i32, %c0_i32_0 : i32, i32
  }
  func.func @transform_13(%arg0: i32) -> (i32, i32) {
    %c0_i32 = arith.constant 0 : i32
    %c0_i32_0 = arith.constant 0 : i32
    %c0_i32_1 = arith.constant 0 : i32
    return %c0_i32, %c0_i32_0 : i32, i32
  }
  func.func @transform_14(%arg0: i32) -> (i32, i32) {
    %c0_i32 = arith.constant 0 : i32
    %c0_i32_0 = arith.constant 0 : i32
    %c0_i32_1 = arith.constant 0 : i32
    return %c0_i32, %c0_i32_0 : i32, i32
  }
  func.func @transform_15(%arg0: i32) -> (i32, i32) {
    %c0_i32 = arith.constant 0 : i32
    %c0_i32_0 = arith.constant 0 : i32
    %c0_i32_1 = arith.constant 0 : i32
    return %c0_i32, %c0_i32_0 : i32, i32
  }
  func.func @transform_16(%arg0: i32) -> (i32, i32) {
    %c0_i32 = arith.constant 0 : i32
    %c0_i32_0 = arith.constant 0 : i32
    %c0_i32_1 = arith.constant 0 : i32
    return %c0_i32, %c0_i32_0 : i32, i32
  }
  func.func @transform_17(%arg0: i32) -> (i32, i32) {
    %c0_i32 = arith.constant 0 : i32
    %c0_i32_0 = arith.constant 0 : i32
    %c0_i32_1 = arith.constant 0 : i32
    return %c0_i32, %c0_i32_0 : i32, i32
  }
  func.func @transform_18(%arg0: i32) -> (i32, i32) {
    %c0_i32 = arith.constant 0 : i32
    %c0_i32_0 = arith.constant 0 : i32
    %c0_i32_1 = arith.constant 0 : i32
    return %c0_i32, %c0_i32_0 : i32, i32
  }
}

</mosaic_0001>

<bundles_post_ra>
// kernel: forward.1
= control target key start
LH: loop header
LB: loop body
LE: loop exit
PB: predicated region body
PF: predicated region fallthrough
CT: control target
= control target key end

     0   :  { %s3004_s19 = smov 15   ;;  %s3005_s26 = smov 14   ;;  %v6396_v32 = vlaneseq  ;;  %vm124_vm8 = vcmask 556032   ;;  %s6372_s2 = inlined_call_operand.vmem [shape: f32[128,256], index: 2, kind: input, shape index: {}]   ;;  %s6373_s0 = inlined_call_operand.vmem [shape: f32[9,1,256], index: 0, kind: input, shape index: {}]   ;;  %s6374_s1 = inlined_call_operand.vmem [shape: f32[9,32,128], index: 1, kind: input, shape index: {}]   ;;  %s6375_s3 = inlined_call_operand.vmem [shape: f32[256,196], index: 3, kind: input, shape index: {}]   ;;  %s6376_s18 = inlined_call_operand.vmem [shape: f32[736,196], index: 18, kind: output, shape index: {}]   ;;  %s6377_s4 = inlined_call_operand.vmem [shape: f32[32,196], index: 4, kind: input, shape index: {}]   ;;  %s6378_s5 = inlined_call_operand.vmem [shape: f32[32,196], index: 5, kind: input, shape index: {}]   ;;  %s6379_s6 = inlined_call_operand.vmem [shape: f32[32,196], index: 6, kind: input, shape index: {}]   ;;  %s6380_s7 = inlined_call_operand.vmem [shape: f32[32,196], index: 7, kind: input, shape index: {}]   ;;  %s6381_s8 = inlined_call_operand.vmem [shape: f32[32,196], index: 8, kind: input, shape index: {}]   ;;  %s6382_s9 = inlined_call_operand.vmem [shape: f32[32,196], index: 9, kind: input, shape index: {}]   ;;  %s6383_s10 = inlined_call_operand.vmem [shape: f32[32,196], index: 10, kind: input, shape index: {}]   ;;  %s6384_s11 = inlined_call_operand.vmem [shape: f32[32,196], index: 11, kind: input, shape index: {}]   ;;  %s6385_s12 = inlined_call_operand.vmem [shape: f32[32,196], index: 12, kind: input, shape index: {}]   ;;  %s6386_s13 = inlined_call_operand.vmem [shape: f32[32,196], index: 13, kind: input, shape index: {}]   ;;  %s6387_s14 = inlined_call_operand.vmem [shape: f32[32,196], index: 14, kind: input, shape index: {}]   ;;  %s6388_s15 = inlined_call_operand.vmem [shape: f32[32,196], index: 15, kind: input, shape index: {}]   ;;  %s6389_s16 = inlined_call_operand.vmem [shape: f32[32,196], index: 16, kind: input, shape index: {}]   ;;  %s6390_s17 = inlined_call_operand.vmem [shape: f32[32,196], index: 17, kind: input, shape index: {}]  }
   0x1   :  { %6408 = sst [smem:[#allocation13_spill]] %s6372_s2  ;;  %s3007_s20 = smov 127  }
   0x2   :  { %6409 = sst [smem:[#allocation14_spill]] %s6373_s0  ;;  %s6411_s29 = sld [smem:[#allocation13_spill]]  ;;  %v546_v33 = vshrl.u32 %v6396_v32, 7 }
   0x3   :  { %6410 = sst [smem:[#allocation15_spill]] %s6374_s1  ;;  %s6415_s28 = sld [smem:[#allocation14_spill]] }
   0x4   :  { %v3357_v34 = vsub.s32 1, %v546_v33  ;;  %v3359_v35 = vsub.s32 0, %v546_v33  ;;  %s6416_s0 = sld [smem:[#allocation15_spill]]  ;;  %s3009_s30 = smov 115  }
   0x5   :  { %s3010_s21 = smov 1   ;;  %s3011_s2 = smov 114  }
   0x8   :  { %v3111_v0 = vld [vmem:[%s6411_s29 + $0x20] sm:$0xff]  ;;  %v3125_v2 = vld [vmem:[%s6411_s29 + $0x30] sm:$0xff]  ;;  %v3223_v16 = vld [vmem:[%s6411_s29 + $0x18] sm:$0xff] }
   0x9   :  { %v3116_v1 = vld [vmem:[%s6411_s29] sm:$0xff]  ;;  %448 = vrot.lane.b32.xlu1 %v3111_v0, %s3004_s19  ;;  %v3130_v3 = vld [vmem:[%s6411_s29 + $0x10] sm:$0xff]  ;;  %v3228_v17 = vld [vmem:[%s6411_s29 + $0x8] sm:$0xff] }
   0xa   :  { %444 = vrot.lane.b32.xlu0 %v3116_v1, %s3004_s19  ;;  %v3139_v4 = vld [vmem:[%s6411_s29 + $0x50] sm:$0xff]  ;;  %v3144_v5 = vld [vmem:[%s6411_s29 + $0x40] sm:$0xff]  ;;  %v3237_v18 = vld [vmem:[%s6411_s29 + $0x38] sm:$0xff] }
   0xb   :  { %v3153_v6 = vld [vmem:[%s6411_s29 + $0x70] sm:$0xff]  ;;  %v3158_v7 = vld [vmem:[%s6411_s29 + $0x60] sm:$0xff]  ;;  %v3242_v19 = vld [vmem:[%s6411_s29 + $0x28] sm:$0xff] }
   0xc   :  { %v3167_v8 = vld [vmem:[%s6411_s29 + $0x90] sm:$0xff]  ;;  %v3172_v9 = vld [vmem:[%s6411_s29 + $0x80] sm:$0xff]  ;;  %v3251_v20 = vld [vmem:[%s6411_s29 + $0x58] sm:$0xff] }
   0xd   :  { %450 = vrot.lane.b32.xlu1 %v3125_v2, %s3004_s19  ;;  %6412 = vst [vmem:[#allocation2_spill] sm:$0xff] %v3172_v9  ;;  %v3181_v10 = vld [vmem:[%s6411_s29 + $0xb0] sm:$0xff]  ;;  %v3186_v11 = vld [vmem:[%s6411_s29 + $0xa0] sm:$0xff]  ;;  %v3256_v21 = vld [vmem:[%s6411_s29 + $0x48] sm:$0xff] }
   0xe   :  { %446 = vrot.lane.b32.xlu0 %v3130_v3, %s3004_s19  ;;  %v3195_v12 = vld [vmem:[%s6411_s29 + $0xd0] sm:$0xff]  ;;  %v3200_v13 = vld [vmem:[%s6411_s29 + $0xc0] sm:$0xff]  ;;  %v3265_v22 = vld [vmem:[%s6411_s29 + $0x78] sm:$0xff] }
   0xf   :  { %v3209_v14 = vld [vmem:[%s6411_s29 + $0xf0] sm:$0xff]  ;;  %v3214_v15 = vld [vmem:[%s6411_s29 + $0xe0] sm:$0xff]  ;;  %v3270_v23 = vld [vmem:[%s6411_s29 + $0x68] sm:$0xff] }
  0x10   :  { %v3279_v24 = vld [vmem:[%s6411_s29 + $0x98] sm:$0xff]  ;;  %v3284_v25 = vld [vmem:[%s6411_s29 + $0x88] sm:$0xff] }
  0x11   :  { %454 = vrot.lane.b32.xlu1 %v3139_v4, %s3004_s19  ;;  %6413 = vst [vmem:[#allocation3_spill] sm:$0xff] %v3279_v24  ;;  %6414 = vst [vmem:[#allocation4_spill] sm:$0xff] %v3284_v25  ;;  %v3293_v26 = vld [vmem:[%s6411_s29 + $0xb8] sm:$0xff]  ;;  %v3298_v27 = vld [vmem:[%s6411_s29 + $0xa8] sm:$0xff] }
  0x12   :  { %452 = vrot.lane.b32.xlu0 %v3144_v5, %s3004_s19  ;;  %v3307_v28 = vld [vmem:[%s6411_s29 + $0xd8] sm:$0xff]  ;;  %v3312_v29 = vld [vmem:[%s6411_s29 + $0xc8] sm:$0xff] }
  0x13   :  { %v3321_v30 = vld [vmem:[%s6411_s29 + $0xf8] sm:$0xff]  ;;  %v3326_v31 = vld [vmem:[%s6411_s29 + $0xe8] sm:$0xff] }
  0x14   :  { %v2554_v36 = vld [vmem:[%s6415_s28 + $0x8] sm:$0x3] }
  0x15   :  { %458 = vrot.lane.b32.xlu1 %v3153_v6, %s3004_s19  ;;  %v3365_v37 = vrot.slane %v2554_v36, %v3357_v34  ;;  %v3372_v38 = vrot.slane %v2554_v36, %v3359_v35 }
  0x16   :  { %456 = vrot.lane.b32.xlu0 %v3158_v7, %s3004_s19 }
  0x17   :  { %v1418_v39 = vmul.f32 %v3365_v37, %v3228_v17  ;;  %v1420_v40 = vmul.f32 %v3365_v37, %v3223_v16  ;;  %v1417_v41 = vmul.f32 %v3372_v38, %v3116_v1  ;;  %v1419_v42 = vmul.f32 %v3372_v38, %v3130_v3 }
  0x18   :  { %v1422_v45 = vmul.f32 %v3365_v37, %v3242_v19  ;;  %v1424_v46 = vmul.f32 %v3365_v37, %v3237_v18  ;;  %v1421_v47 = vmul.f32 %v3372_v38, %v3111_v0  ;;  %v1423_v48 = vmul.f32 %v3372_v38, %v3125_v2 }
  0x19   :  { %462 = vrot.lane.b32.xlu1 %v3167_v8, %s3004_s19  ;;  %v2707_v43 = vpack.c.bf16 %v1420_v40, %v1418_v39  ;;  %v2709_v44 = vpack.c.bf16 %v1419_v42, %v1417_v41  ;;  %v1426_v51 = vmul.f32 %v3365_v37, %v3256_v21  ;;  %v1428_v52 = vmul.f32 %v3365_v37, %v3251_v20 }
  0x1a   :  { %460 = vrot.lane.b32.xlu0 %v3172_v9, %s3004_s19  ;;  %v2711_v49 = vpack.c.bf16 %v1424_v46, %v1422_v45  ;;  %v2713_v50 = vpack.c.bf16 %v1423_v48, %v1421_v47  ;;  %v1425_v53 = vmul.f32 %v3372_v38, %v3144_v5  ;;  %v1427_v54 = vmul.f32 %v3372_v38, %v3139_v4 }
  0x1b   :  { %2708 = vmatprep.subr.bf16.mxu0 %v2707_v43  ;;  %v2715_v55 = vpack.c.bf16 %v1428_v52, %v1426_v51  ;;  %v1430_v57 = vmul.f32 %v3365_v37, %v3270_v23  ;;  %v1432_v58 = vmul.f32 %v3365_v37, %v3265_v22  ;;  %v1429_v59 = vmul.f32 %v3372_v38, %v3158_v7 }
  0x1c   :  { %2710 = vmatpush1.bf16.msra.mxu0 %v2709_v44  ;;  %v2717_v56 = vpack.c.bf16 %v1427_v54, %v1425_v53  ;;  %v1431_v60 = vmul.f32 %v3372_v38, %v3153_v6  ;;  %v1434_v63 = vmul.f32 %v3365_v37, %v3284_v25  ;;  %v1436_v33 = vmul.f32 %v3365_v37, %v3279_v24 }
  0x1d   :  { %466 = vrot.lane.b32.xlu1 %v3181_v10, %s3004_s19  ;;  %2712 = vmatprep.subr.bf16.mxu0 %v2711_v49  ;;  %v2719_v61 = vpack.c.bf16 %v1432_v58, %v1430_v57  ;;  %v1433_v36 = vmul.f32 %v3372_v38, %v3172_v9  ;;  %v1435_v39 = vmul.f32 %v3372_v38, %v3167_v8 }
  0x1e   :  { %464 = vrot.lane.b32.xlu0 %v3186_v11, %s3004_s19  ;;  %v2721_v62 = vpack.c.bf16 %v1431_v60, %v1429_v59  ;;  %v2723_v40 = vpack.c.bf16 %v1436_v33, %v1434_v63  ;;  %v1438_v42 = vmul.f32 %v3365_v37, %v3298_v27  ;;  %v1440_v43 = vmul.f32 %v3365_v37, %v3293_v26 }
  0x1f   :  { %v2725_v41 = vpack.c.bf16 %v1435_v39, %v1433_v36  ;;  %v1437_v44 = vmul.f32 %v3372_v38, %v3186_v11  ;;  %v1439_v45 = vmul.f32 %v3372_v38, %v3181_v10  ;;  %v1442_v48 = vmul.f32 %v3365_v37, %v3312_v29 }
  0x20   :  { %2714 = vmatpush1.bf16.msra.mxu0 %v2713_v50  ;;  %v2727_v46 = vpack.c.bf16 %v1440_v43, %v1438_v42  ;;  %v1444_v49 = vmul.f32 %v3365_v37, %v3307_v28  ;;  %v1441_v52 = vmul.f32 %v3372_v38, %v3200_v13  ;;  %v1443_v53 = vmul.f32 %v3372_v38, %v3195_v12 }
  0x21   :  { %470 = vrot.lane.b32.xlu1 %v3195_v12, %s3004_s19  ;;  %2716 = vmatprep.subr.bf16.mxu0 %v2715_v55  ;;  %v2729_v47 = vpack.c.bf16 %v1439_v45, %v1437_v44  ;;  %v1448_v57 = vmul.f32 %v3365_v37, %v3321_v30  ;;  %v1445_v60 = vmul.f32 %v3372_v38, %v3214_v15 }
  0x22   :  { %468 = vrot.lane.b32.xlu0 %v3200_v13, %s3004_s19  ;;  %v2731_v54 = vpack.c.bf16 %v1444_v49, %v1442_v48  ;;  %v2733_v55 = vpack.c.bf16 %v1443_v53, %v1441_v52 }
  0x24   :  { %2718 = vmatpush1.bf16.msra.mxu0 %v2717_v56  ;;  %v1446_v56 = vmul.f32 %v3365_v37, %v3326_v31  ;;  %v6394_v37 = vmov 0.0  }
  0x25   :  { %474 = vrot.lane.b32.xlu1 %v3209_v14, %s3004_s19  ;;  %2720 = vmatprep.subr.bf16.mxu0 %v2719_v61  ;;  %v1447_v61 = vmul.f32 %v3372_v38, %v3209_v14  ;;  %v2555_v38 = vld [vmem:[%s6416_s0 + $0x80] sm:$0xff] }
  0x26   :  { %472 = vrot.lane.b32.xlu0 %v3214_v15, %s3004_s19  ;;  %802 = vmatprep.mubr.f32.mxu1 %v6394_v37 }
  0x27   :  { %v2737_v63 = vpack.c.bf16 %v1447_v61, %v1445_v60  ;;  %1518 = vmatprep.mubr.f32.mxu0 %v6394_v37 }
  0x28   :  { %2722 = vmatpush1.bf16.msra.mxu0 %v2721_v62  ;;  %v2735_v62 = vpack.c.bf16 %v1448_v57, %v1446_v56 }
  0x29   :  { %478 = vrot.lane.b32.xlu1 %v3223_v16, %s3004_s19  ;;  %2724 = vmatprep.subr.bf16.mxu0 %v2723_v40 }
  0x2a   :  { %476 = vrot.lane.b32.xlu0 %v3228_v17, %s3004_s19 }
  0x2c   :  { %2726 = vmatpush1.bf16.msra.mxu0 %v2725_v41 }
  0x2d   :  { %482 = vrot.lane.b32.xlu1 %v3237_v18, %s3004_s19  ;;  %2728 = vmatprep.subr.bf16.mxu0 %v2727_v46 }
  0x2e   :  { %480 = vrot.lane.b32.xlu0 %v3242_v19, %s3004_s19 }
  0x30   :  { %2730 = vmatpush1.bf16.msra.mxu0 %v2729_v47 }
  0x31   :  { %486 = vrot.lane.b32.xlu1 %v3251_v20, %s3004_s19  ;;  %2732 = vmatprep.subr.bf16.mxu0 %v2731_v54 }
  0x32   :  { %484 = vrot.lane.b32.xlu0 %v3256_v21, %s3004_s19 }
  0x34   :  { %2734 = vmatpush1.bf16.msra.mxu0 %v2733_v55 }
  0x35   :  { %490 = vrot.lane.b32.xlu1 %v3265_v22, %s3004_s19  ;;  %2736 = vmatprep.subr.bf16.mxu0 %v2735_v62 }
  0x36   :  { %488 = vrot.lane.b32.xlu0 %v3270_v23, %s3004_s19 }
  0x38   :  { %2738 = vmatpush1.bf16.msra.mxu0 %v2737_v63 }
  0x39   :  { %494 = vrot.lane.b32.xlu1 %v3279_v24, %s3004_s19 }
  0x3a   :  { %492 = vrot.lane.b32.xlu0 %v3284_v25, %s3004_s19 }
  0x3b   :  { %1519 = vmatmul.mubr.f32.vlgmr.msra.gmra.mrb[0].mxu0 %v2555_v38 }
  0x3c   :  { %1524 = vmatprep.mubr.f32.mxu0 %v6394_v37 }
  0x3d   :  { %498 = vrot.lane.b32.xlu1 %v3293_v26, %s3004_s19 }
  0x3e   :  { %496 = vrot.lane.b32.xlu0 %v3298_v27, %s3004_s19 }
  0x41   :  { %502 = vrot.lane.b32.xlu1 %v3307_v28, %s3004_s19 }
  0x42   :  { %500 = vrot.lane.b32.xlu0 %v3312_v29, %s3004_s19 }
  0x45   :  { %506 = vrot.lane.b32.xlu1 %v3321_v30, %s3004_s19 }
  0x46   :  { %504 = vrot.lane.b32.xlu0 %v3326_v31, %s3004_s19 }
  0x49   :  { %593 = vrot.lane.b32.xlu1 %v3130_v3, %s3005_s26 }
  0x4a   :  { %591 = vrot.lane.b32.xlu0 %v3116_v1, %s3005_s26 }
  0x4d   :  { %623 = vrot.lane.b32.xlu1 %v3228_v17, %s3005_s26 }
  0x4e   :  { %595 = vrot.lane.b32.xlu0 %v3111_v0, %s3005_s26 }
  0x51   :  { %597 = vrot.lane.b32.xlu1 %v3125_v2, %s3005_s26 }
  0x52   :  { %625 = vrot.lane.b32.xlu0 %v3223_v16, %s3005_s26 }
  0x55   :  { %629 = vrot.lane.b32.xlu1 %v3237_v18, %s3005_s26 }
  0x56   :  { %627 = vrot.lane.b32.xlu0 %v3242_v19, %s3005_s26 }
  0x59   :  { %601 = vrot.lane.b32.xlu1 %v3139_v4, %s3005_s26 }
  0x5a   :  { %599 = vrot.lane.b32.xlu0 %v3144_v5, %s3005_s26 }
  0x5d   :  { %633 = vrot.lane.b32.xlu1 %v3251_v20, %s3005_s26 }
  0x5e   :  { %631 = vrot.lane.b32.xlu0 %v3256_v21, %s3005_s26 }
  0x61   :  { %605 = vrot.lane.b32.xlu1 %v3153_v6, %s3005_s26 }
  0x62   :  { %603 = vrot.lane.b32.xlu0 %v3158_v7, %s3005_s26 }
  0x65   :  { %637 = vrot.lane.b32.xlu1 %v3265_v22, %s3005_s26 }
  0x66   :  { %635 = vrot.lane.b32.xlu0 %v3270_v23, %s3005_s26 }
  0x69   :  { %609 = vrot.lane.b32.xlu1 %v3167_v8, %s3005_s26 }
  0x6a   :  { %607 = vrot.lane.b32.xlu0 %v3172_v9, %s3005_s26 }
  0x6d   :  { %641 = vrot.lane.b32.xlu1 %v3279_v24, %s3005_s26 }
  0x6e   :  { %639 = vrot.lane.b32.xlu0 %v3284_v25, %s3005_s26 }
  0x71   :  { %613 = vrot.lane.b32.xlu1 %v3181_v10, %s3005_s26 }
  0x72   :  { %611 = vrot.lane.b32.xlu0 %v3186_v11, %s3005_s26 }
  0x75   :  { %645 = vrot.lane.b32.xlu1 %v3293_v26, %s3005_s26 }
  0x76   :  { %643 = vrot.lane.b32.xlu0 %v3298_v27, %s3005_s26 }
  0x79   :  { %617 = vrot.lane.b32.xlu1 %v3195_v12, %s3005_s26 }
  0x7a   :  { %615 = vrot.lane.b32.xlu0 %v3200_v13, %s3005_s26 }
  0x7b   :  { %v3450_v50 = vpop.permute.xlu1 %448 }
  0x7c   :  { %v3452_v51 = vpop.permute.xlu0 %444 }
  0x7d   :  { %649 = vrot.lane.b32.xlu1 %v3307_v28, %s3005_s26 }
  0x7e   :  { %647 = vrot.lane.b32.xlu0 %v3312_v29, %s3005_s26 }
  0x7f   :  { %v3466_v58 = vpop.permute.xlu1 %450 }
  0x80   :  { %v3468_v59 = vpop.permute.xlu0 %446 }
  0x81   :  { %621 = vrot.lane.b32.xlu1 %v3209_v14, %s3005_s26 }
  0x82   :  { %619 = vrot.lane.b32.xlu0 %v3214_v15, %s3005_s26 }
  0x83   :  { %v3479_v33 = vpop.permute.xlu1 %454 }
  0x84   :  { %v3481_v36 = vpop.permute.xlu0 %452 }
  0x85   :  { %653 = vrot.lane.b32.xlu1 %v3321_v30, %s3005_s26 }
  0x86   :  { %651 = vrot.lane.b32.xlu0 %v3326_v31, %s3005_s26  ;;  %s3008_s26 = smov 13  }
  0x87   :  { %v3491_v39 = vpop.permute.xlu1 %458 }
  0x88   :  { %v3493_v40 = vpop.permute.xlu0 %456 }
  0x89   :  { %1553 = vrot.lane.b32.xlu1 %v3130_v3, %s3007_s20 }
  0x8a   :  { %1551 = vrot.lane.b32.xlu0 %v3116_v1, %s3007_s20 }
  0x8b   :  { %v3500_v41 = vpop.permute.xlu1 %462 }
  0x8c   :  { %v3502_v42 = vpop.permute.xlu0 %460 }
  0x8d   :  { %1585 = vrot.lane.b32.xlu1 %v3223_v16, %s3007_s20 }
  0x8e   :  { %1583 = vrot.lane.b32.xlu0 %v3228_v17, %s3007_s20 }
  0x8f   :  { %v3508_v43 = vpop.permute.xlu1 %466 }
  0x90   :  { %v3510_v44 = vpop.permute.xlu0 %464 }
  0x91   :  { %1557 = vrot.lane.b32.xlu1 %v3125_v2, %s3007_s20 }
  0x92   :  { %1555 = vrot.lane.b32.xlu0 %v3111_v0, %s3007_s20 }
  0x93   :  { %v3516_v45 = vpop.permute.xlu1 %470 }
  0x94   :  { %6417 = vst [vmem:[#allocation5_spill] sm:$0xff] %v3516_v45  ;;  %v3518_v46 = vpop.permute.xlu0 %468 }
  0x95   :  { %6418 = vst [vmem:[#allocation6_spill] sm:$0xff] %v3518_v46  ;;  %1589 = vrot.lane.b32.xlu1 %v3237_v18, %s3007_s20  ;;  %v6425_v46 = vlaneseq }
  0x96   :  { %1587 = vrot.lane.b32.xlu0 %v3242_v19, %s3007_s20 }
  0x97   :  { %v3524_v47 = vpop.permute.xlu1 %474 }
  0x98   :  { %6419 = vst [vmem:[#allocation7_spill] sm:$0xff] %v3524_v47  ;;  %v3526_v48 = vpop.permute.xlu0 %472 }
  0x99   :  { %6420 = vst [vmem:[#allocation8_spill] sm:$0xff] %v3526_v48  ;;  %1561 = vrot.lane.b32.xlu1 %v3139_v4, %s3007_s20 }
  0x9a   :  { %1559 = vrot.lane.b32.xlu0 %v3144_v5, %s3007_s20 }
  0x9b   :  { %v3532_v49 = vpop.permute.xlu1 %478 }
  0x9c   :  { %v3534_v52 = vpop.permute.xlu0 %476 }
  0x9d   :  { %1593 = vrot.lane.b32.xlu1 %v3251_v20, %s3007_s20 }
  0x9e   :  { %1591 = vrot.lane.b32.xlu0 %v3256_v21, %s3007_s20 }
  0x9f   :  { %v3540_v53 = vpop.permute.xlu1 %482 }
  0xa0   :  { %v3542_v54 = vpop.permute.xlu0 %480 }
  0xa1   :  { %1565 = vrot.lane.b32.xlu1 %v3153_v6, %s3007_s20 }
  0xa2   :  { %1563 = vrot.lane.b32.xlu0 %v3158_v7, %s3007_s20 }
  0xa3   :  { %v3548_v55 = vpop.permute.xlu1 %486 }
  0xa4   :  { %v3550_v56 = vpop.permute.xlu0 %484 }
  0xa5   :  { %1597 = vrot.lane.b32.xlu1 %v3265_v22, %s3007_s20 }
  0xa6   :  { %1595 = vrot.lane.b32.xlu0 %v3270_v23, %s3007_s20 }
  0xa7   :  { %v3556_v57 = vpop.permute.xlu1 %490 }
  0xa8   :  { %v3558_v60 = vpop.permute.xlu0 %488 }
  0xa9   :  { %1569 = vrot.lane.b32.xlu1 %v3167_v8, %s3007_s20 }
  0xaa   :  { %1567 = vrot.lane.b32.xlu0 %v3172_v9, %s3007_s20 }
  0xab   :  { %v3564_v61 = vpop.permute.xlu1 %494 }
  0xac   :  { %v3566_v62 = vpop.permute.xlu0 %492 }
  0xad   :  { %1601 = vrot.lane.b32.xlu1 %v3279_v24, %s3007_s20  ;;  %v6426_v24 = vmov 0.0  }
  0xae   :  { %1599 = vrot.lane.b32.xlu0 %v3284_v25, %s3007_s20 }
  0xaf   :  { %v3572_v63 = vpop.permute.xlu1 %498 }
  0xb0   :  { %v3574_v38 = vpop.permute.xlu0 %496 }
  0xb1   :  { %1573 = vrot.lane.b32.xlu1 %v3181_v10, %s3007_s20 }
  0xb2   :  { %1571 = vrot.lane.b32.xlu0 %v3186_v11, %s3007_s20 }
  0xb3   :  { %v3580_v37 = vpop.permute.xlu1 %502 }
  0xb4   :  { %6421 = vst [vmem:[#allocation9_spill] sm:$0xff] %v3580_v37  ;;  %v3582_v32 = vpop.permute.xlu0 %500 }
  0xb5   :  { %6422 = vst [vmem:[#allocation10_spill] sm:$0xff] %v3582_v32  ;;  %1605 = vrot.lane.b32.xlu1 %v3293_v26, %s3007_s20  ;;  %v3597_v32 = vand.u32 127, %v6425_v46  ;;  %v2539_v26 = vld [vmem:[%s6415_s28 + $0x2] sm:$0x3] }
  0xb6   :  { %1603 = vrot.lane.b32.xlu0 %v3298_v27, %s3007_s20  ;;  %v3613_v46 = vrot.slane %v2539_v26, %v3357_v34 }
  0xb7   :  { %v3588_v48 = vpop.permute.xlu1 %506  ;;  %vm655_vm0 = vcmp.lt.s32.totalorder %v3597_v32, 14  ;;  %vm510_vm1 = vcmp.lt.s32.totalorder %v3597_v32, 15  ;;  %vm1615_vm2 = vcmp.lt.s32.totalorder %v3597_v32, 127  ;;  %vm980_vm3 = vcmp.lt.s32.totalorder %v3597_v32, 13 }
  0xb8   :  { %6423 = vst [vmem:[#allocation11_spill] sm:$0xff] %v3588_v48  ;;  %v3590_v47 = vpop.permute.xlu0 %504  ;;  %vm1859_vm4 = vcmp.lt.s32.totalorder %v3597_v32, 115  ;;  %vm1224_vm5 = vcmp.lt.s32.totalorder %v3597_v32, 1  ;;  %vm2103_vm6 = vcmp.lt.s32.totalorder %v3597_v32, 114  ;;  %vm2347_vm7 = vcmp.lt.s32.totalorder %v3597_v32, 113  ;;  %v2576_v32 = vld [vmem:[%s6416_s0 + $0x108] sm:$0xff] }
  0xb9   :  { %6424 = vst [vmem:[#allocation12_spill] sm:$0xff] %v3590_v47  ;;  %1577 = vrot.lane.b32.xlu1 %v3195_v12, %s3007_s20  ;;  %v2556_v47 = vld [vmem:[%s6416_s0 + $0x88] sm:$0xff] }
  0xba   :  { %1575 = vrot.lane.b32.xlu0 %v3200_v13, %s3007_s20  ;;  %v3610_v13 = vrot.slane %v2539_v26, %v3359_v35  ;;  %1525 = vmatmul.mubr.f32.gmra.mrb[2].mxu0 %v2556_v47  ;;  %v2557_v47 = vld [vmem:[%s6416_s0 + $0x90] sm:$0xff] }
  0xbb   :  { %v594_v10 = vpop.permute.xlu1 %593  ;;  %1530 = vmatprep.mubr.f32.mxu0 %v6426_v24 }
  0xbc   :  { %v592_v11 = vpop.permute.xlu0 %591 }
  0xbd   :  { %1609 = vrot.lane.b32.xlu1 %v3307_v28, %s3007_s20 }
  0xbe   :  { %1607 = vrot.lane.b32.xlu0 %v3312_v29, %s3007_s20  ;;  %1531 = vmatmul.mubr.f32.gmra.mrb[4].mxu0 %v2557_v47 }
  0xbf   :  { %v624_v12 = vpop.permute.xlu1 %623  ;;  %1536 = vmatprep.mubr.f32.mxu0 %v6426_v24 }
  0xc0   :  { %v596_v27 = vpop.permute.xlu0 %595  ;;  %v672_v28 = vsel %vm655_vm0, %v624_v12, %v592_v11  ;;  %v656_v29 = vsel %vm655_vm0, %v592_v11, %v624_v12 }
  0xc1   :  { %1581 = vrot.lane.b32.xlu1 %v3209_v14, %s3007_s20  ;;  %v701_v12 = vmul.f32 %v3610_v13, %v672_v28 }
  0xc2   :  { %1579 = vrot.lane.b32.xlu0 %v3214_v15, %s3007_s20  ;;  %v702_v15 = vmul.f32 %v3613_v46, %v656_v29 }
  0xc3   :  { %v598_v14 = vpop.permute.xlu1 %597 }
  0xc4   :  { %v626_v48 = vpop.permute.xlu0 %625 }
  0xc5   :  { %v673_v26 = vsel %vm655_vm0, %v626_v48, %v594_v10  ;;  %v657_v25 = vsel %vm655_vm0, %v594_v10, %v626_v48  ;;  %1613 = vrot.lane.b32.xlu1 %v3321_v30, %s3007_s20 }
  0xc6   :  { %v704_v11 = vmul.f32 %v3613_v46, %v657_v25  ;;  %v703_v45 = vmul.f32 %v3610_v13, %v673_v26  ;;  %1611 = vrot.lane.b32.xlu0 %v3326_v31, %s3007_s20 }
  0xc7   :  { %v630_v48 = vpop.permute.xlu1 %629 }
  0xc8   :  { %v628_v10 = vpop.permute.xlu0 %627  ;;  %v2579_v37 = vpack.c.bf16 %v704_v11, %v702_v15  ;;  %v2581_v9 = vpack.c.bf16 %v703_v45, %v701_v12  ;;  %v659_v30 = vsel %vm655_vm0, %v598_v14, %v630_v48  ;;  %v675_v25 = vsel %vm655_vm0, %v630_v48, %v598_v14 }
  0xc9   :  { %v658_v28 = vsel %vm655_vm0, %v596_v27, %v628_v10  ;;  %v674_v31 = vsel %vm655_vm0, %v628_v10, %v596_v27  ;;  %v707_v29 = vmul.f32 %v3610_v13, %v675_v25  ;;  %v708_v26 = vmul.f32 %v3613_v46, %v659_v30  ;;  %918 = vrot.lane.b32.xlu1 %v3130_v3, %s3008_s26  ;;  %v2558_v27 = vld [vmem:[%s6416_s0 + $0x98] sm:$0xff] }
  0xca   :  { %v705_v45 = vmul.f32 %v3610_v13, %v674_v31  ;;  %v706_v15 = vmul.f32 %v3613_v46, %v658_v28  ;;  %916 = vrot.lane.b32.xlu0 %v3116_v1, %s3008_s26  ;;  %2580 = vmatprep.subr.bf16.mxu1 %v2579_v37 }
  0xcb   :  { %2582 = vmatpush1.bf16.msra.mxu1 %v2581_v9  ;;  %v602_v14 = vpop.permute.xlu1 %601  ;;  %1537 = vmatmul.mubr.f32.gmra.mrb[6].mxu0 %v2558_v27 }
  0xcc   :  { %v600_v11 = vpop.permute.xlu0 %599  ;;  %v2583_v12 = vpack.c.bf16 %v708_v26, %v706_v15  ;;  %v2585_v47 = vpack.c.bf16 %v707_v29, %v705_v45  ;;  %1762 = vmatprep.mubr.f32.mxu0 %v6426_v24 }
  0xcd   :  { %950 = vrot.lane.b32.xlu1 %v3223_v16, %s3008_s26 }
  0xce   :  { %2584 = vmatprep.subr.bf16.mxu1 %v2583_v12  ;;  %948 = vrot.lane.b32.xlu0 %v3228_v17, %s3008_s26 }
  0xcf   :  { %2586 = vmatpush1.bf16.msra.mxu1 %v2585_v47  ;;  %v634_v37 = vpop.permute.xlu1 %633 }
  0xd0   :  { %v632_v48 = vpop.permute.xlu0 %631  ;;  %v661_v9 = vsel %vm655_vm0, %v602_v14, %v634_v37  ;;  %v677_v10 = vsel %vm655_vm0, %v634_v37, %v602_v14 }
  0xd1   :  { %v660_v30 = vsel %vm655_vm0, %v600_v11, %v632_v48  ;;  %v676_v25 = vsel %vm655_vm0, %v632_v48, %v600_v11  ;;  %v711_v28 = vmul.f32 %v3610_v13, %v677_v10  ;;  %v712_v31 = vmul.f32 %v3613_v46, %v661_v9  ;;  %1797 = vrot.lane.b32.xlu1 %v3130_v3, %s3009_s30 }
  0xd2   :  { %v709_v29 = vmul.f32 %v3610_v13, %v676_v25  ;;  %v710_v26 = vmul.f32 %v3613_v46, %v660_v30  ;;  %1795 = vrot.lane.b32.xlu0 %v3116_v1, %s3009_s30 }
  0xd3   :  { %v606_v45 = vpop.permute.xlu1 %605 }
  0xd4   :  { %v604_v15 = vpop.permute.xlu0 %603  ;;  %v2587_v27 = vpack.c.bf16 %v712_v31, %v710_v26  ;;  %v2589_v14 = vpack.c.bf16 %v711_v28, %v709_v29 }
  0xd5   :  { %1829 = vrot.lane.b32.xlu1 %v3223_v16, %s3009_s30 }
  0xd6   :  { %2588 = vmatprep.subr.bf16.mxu1 %v2587_v27  ;;  %1827 = vrot.lane.b32.xlu0 %v3228_v17, %s3009_s30 }
  0xd7   :  { %2590 = vmatpush1.bf16.msra.mxu1 %v2589_v14  ;;  %v638_v11 = vpop.permute.xlu1 %637 }
  0xd8   :  { %v636_v12 = vpop.permute.xlu0 %635  ;;  %v663_v3 = vsel %vm655_vm0, %v606_v45, %v638_v11  ;;  %v679_v1 = vsel %vm655_vm0, %v638_v11, %v606_v45 }
  0xd9   :  { %v662_v47 = vsel %vm655_vm0, %v604_v15, %v636_v12  ;;  %v678_v37 = vsel %vm655_vm0, %v636_v12, %v604_v15  ;;  %v715_v16 = vmul.f32 %v3610_v13, %v679_v1  ;;  %v716_v48 = vmul.f32 %v3613_v46, %v663_v3  ;;  %922 = vrot.lane.b32.xlu1 %v3125_v2, %s3008_s26 }
  0xda   :  { %v713_v17 = vmul.f32 %v3610_v13, %v678_v37  ;;  %v714_v9 = vmul.f32 %v3613_v46, %v662_v47  ;;  %920 = vrot.lane.b32.xlu0 %v3111_v0, %s3008_s26 }
  0xdb   :  { %v610_v10 = vpop.permute.xlu1 %609 }
  0xdc   :  { %v608_v30 = vpop.permute.xlu0 %607  ;;  %v2591_v25 = vpack.c.bf16 %v716_v48, %v714_v9  ;;  %v2593_v28 = vpack.c.bf16 %v715_v16, %v713_v17 }
  0xdd   :  { %954 = vrot.lane.b32.xlu1 %v3237_v18, %s3008_s26 }
  0xde   :  { %2592 = vmatprep.subr.bf16.mxu1 %v2591_v25  ;;  %952 = vrot.lane.b32.xlu0 %v3242_v19, %s3008_s26 }
  0xdf   :  { %2594 = vmatpush1.bf16.msra.mxu1 %v2593_v28  ;;  %v642_v31 = vpop.permute.xlu1 %641 }
  0xe0   :  { %v640_v29 = vpop.permute.xlu0 %639  ;;  %v665_v26 = vsel %vm655_vm0, %v610_v10, %v642_v31  ;;  %v681_v45 = vsel %vm655_vm0, %v642_v31, %v610_v10 }
  0xe1   :  { %v664_v15 = vsel %vm655_vm0, %v608_v30, %v640_v29  ;;  %v680_v27 = vsel %vm655_vm0, %v640_v29, %v608_v30  ;;  %v719_v14 = vmul.f32 %v3610_v13, %v681_v45  ;;  %v720_v11 = vmul.f32 %v3613_v46, %v665_v26  ;;  %1801 = vrot.lane.b32.xlu1 %v3125_v2, %s3009_s30  ;;  %v543_v45 = vld [vmem:[%s6415_s28] sm:$0x3] }
  0xe2   :  { %v717_v12 = vmul.f32 %v3610_v13, %v680_v27  ;;  %v718_v3 = vmul.f32 %v3613_v46, %v664_v15  ;;  %1799 = vrot.lane.b32.xlu0 %v3111_v0, %s3009_s30 }
  0xe3   :  { %v614_v1 = vpop.permute.xlu1 %613 }
  0xe4   :  { %v612_v47 = vpop.permute.xlu0 %611  ;;  %v2595_v37 = vpack.c.bf16 %v720_v11, %v718_v3  ;;  %v2597_v16 = vpack.c.bf16 %v719_v14, %v717_v12 }
  0xe5   :  { %1833 = vrot.lane.b32.xlu1 %v3237_v18, %s3009_s30 }
  0xe6   :  { %2596 = vmatprep.subr.bf16.mxu1 %v2595_v37  ;;  %1831 = vrot.lane.b32.xlu0 %v3242_v19, %s3009_s30 }
  0xe7   :  { %2598 = vmatpush1.bf16.msra.mxu1 %v2597_v16  ;;  %v646_v48 = vpop.permute.xlu1 %645 }
  0xe8   :  { %v644_v17 = vpop.permute.xlu0 %643  ;;  %v667_v2 = vsel %vm655_vm0, %v614_v1, %v646_v48  ;;  %v683_v0 = vsel %vm655_vm0, %v646_v48, %v614_v1  ;;  %v512_v48 = vsel %vm510_vm1, %v3468_v59, %v3532_v49 }
  0xe9   :  { %v666_v9 = vsel %vm655_vm0, %v612_v47, %v644_v17  ;;  %v682_v10 = vsel %vm655_vm0, %v644_v17, %v612_v47  ;;  %v723_v18 = vmul.f32 %v3610_v13, %v683_v0  ;;  %v724_v30 = vmul.f32 %v3613_v46, %v667_v2  ;;  %926 = vrot.lane.b32.xlu1 %v3139_v4, %s3008_s26 }
  0xea   :  { %v721_v19 = vmul.f32 %v3610_v13, %v682_v10  ;;  %v722_v25 = vmul.f32 %v3613_v46, %v666_v9  ;;  %924 = vrot.lane.b32.xlu0 %v3144_v5, %s3008_s26  ;;  %v3768_v17 = vrot.slane %v543_v45, %v3359_v35  ;;  %v3771_v2 = vrot.slane %v543_v45, %v3357_v34 }
  0xeb   :  { %v618_v28 = vpop.permute.xlu1 %617  ;;  %v528_v0 = vsel %vm510_vm1, %v3532_v49, %v3468_v59  ;;  %v513_v59 = vsel %vm510_vm1, %v3450_v50, %v3542_v54 }
  0xec   :  { %v616_v31 = vpop.permute.xlu0 %615  ;;  %v2599_v29 = vpack.c.bf16 %v724_v30, %v722_v25  ;;  %v2601_v26 = vpack.c.bf16 %v723_v18, %v721_v19  ;;  %v511_v19 = vsel %vm510_vm1, %v3452_v51, %v3534_v52  ;;  %v3798_v49 = vmul.f32 %v3768_v17, %v528_v0 }
  0xed   :  { %958 = vrot.lane.b32.xlu1 %v3251_v20, %s3008_s26  ;;  %v558_v25 = vmul.f32 %v3771_v2, %v512_v48 }
  0xee   :  { %2600 = vmatprep.subr.bf16.mxu1 %v2599_v29  ;;  %956 = vrot.lane.b32.xlu0 %v3256_v21, %s3008_s26 }
  0xef   :  { %2602 = vmatpush1.bf16.msra.mxu1 %v2601_v26  ;;  %v650_v15 = vpop.permute.xlu1 %649 }
  0xf0   :  { %v648_v27 = vpop.permute.xlu0 %647  ;;  %v669_v14 = vsel %vm655_vm0, %v618_v28, %v650_v15  ;;  %v685_v11 = vsel %vm655_vm0, %v650_v15, %v618_v28 }
  0xf1   :  { %v668_v12 = vsel %vm655_vm0, %v616_v31, %v648_v27  ;;  %v684_v3 = vsel %vm655_vm0, %v648_v27, %v616_v31  ;;  %v727_v1 = vmul.f32 %v3610_v13, %v685_v11  ;;  %v728_v47 = vmul.f32 %v3613_v46, %v669_v14  ;;  %1805 = vrot.lane.b32.xlu1 %v3139_v4, %s3009_s30 }
  0xf2   :  { %v725_v37 = vmul.f32 %v3610_v13, %v684_v3  ;;  %v726_v16 = vmul.f32 %v3613_v46, %v668_v12  ;;  %1803 = vrot.lane.b32.xlu0 %v3144_v5, %s3009_s30  ;;  %v527_v4 = vsel %vm510_vm1, %v3534_v52, %v3452_v51  ;;  %v514_v5 = vsel %vm510_vm1, %v3466_v58, %v3540_v53 }
  0xf3   :  { %v622_v9 = vpop.permute.xlu1 %621  ;;  %v3802_v51 = vmul.f32 %v3768_v17, %v527_v4  ;;  %v556_v52 = vmul.f32 %v3771_v2, %v511_v19  ;;  %v3812_v28 = vmul.f32 %v3771_v2, %v514_v5  ;;  %v3815_v31 = vmul.f32 %v3771_v2, %v513_v59 }
  0xf4   :  { %v620_v10 = vpop.permute.xlu0 %619  ;;  %v2603_v18 = vpack.c.bf16 %v728_v47, %v726_v16  ;;  %v2605_v30 = vpack.c.bf16 %v727_v1, %v725_v37  ;;  %v529_v3 = vsel %vm510_vm1, %v3542_v54, %v3450_v50  ;;  %v516_v1 = vsel %vm510_vm1, %v3479_v33, %v3548_v55 }
  0xf5   :  { %1837 = vrot.lane.b32.xlu1 %v3251_v20, %s3009_s30  ;;  %v530_v20 = vsel %vm510_vm1, %v3540_v53, %v3466_v58  ;;  %v515_v50 = vsel %vm510_vm1, %v3481_v36, %v3550_v56  ;;  %v531_v54 = vsel %vm510_vm1, %v3550_v56, %v3481_v36  ;;  %v2611_v4 = vpack.c.bf16 %v558_v25, %v556_v52  ;;  %v2540_v52 = vld [vmem:[%s6416_s0 + $0x20] sm:$0xff] }
  0xf6   :  { %2604 = vmatprep.subr.bf16.mxu1 %v2603_v18  ;;  %1835 = vrot.lane.b32.xlu0 %v3256_v21, %s3009_s30  ;;  %v2559_v21 = vld [vmem:[%s6415_s28 + $0xa] sm:$0x3]  ;;  %v3862_v48 = vmul.f32 %v3768_v17, %v530_v20  ;;  %v2615_v56 = vpack.c.bf16 %v3812_v28, %v3815_v31  ;;  %v3878_v18 = vmul.f32 %v3768_v17, %v531_v54 }
  0xf7   :  { %2606 = vmatpush1.bf16.msra.mxu1 %v2605_v30  ;;  %v654_v29 = vpop.permute.xlu1 %653  ;;  %v3865_v0 = vrot.slane %v2559_v21, %v3357_v34  ;;  %v564_v30 = vmul.f32 %v3771_v2, %v515_v50  ;;  %v518_v19 = vsel %vm510_vm1, %v3491_v39, %v3556_v57  ;;  %v534_v5 = vsel %vm510_vm1, %v3556_v57, %v3491_v39 }
  0xf8   :  { %v652_v26 = vpop.permute.xlu0 %651  ;;  %v671_v45 = vsel %vm655_vm0, %v622_v9, %v654_v29  ;;  %v687_v15 = vsel %vm655_vm0, %v654_v29, %v622_v9  ;;  %v559_v9 = vmul.f32 %v3768_v17, %v529_v3  ;;  %v517_v59 = vsel %vm510_vm1, %v3493_v40, %v3558_v60 }
  0xf9   :  { %v670_v58 = vsel %vm655_vm0, %v620_v10, %v652_v26  ;;  %v686_v53 = vsel %vm655_vm0, %v652_v26, %v620_v10  ;;  %v731_v27 = vmul.f32 %v3610_v13, %v687_v15  ;;  %v732_v14 = vmul.f32 %v3613_v46, %v671_v45  ;;  %930 = vrot.lane.b32.xlu1 %v3153_v6, %s3008_s26 }
  0xfa   :  { %v729_v11 = vmul.f32 %v3610_v13, %v686_v53  ;;  %v730_v12 = vmul.f32 %v3613_v46, %v670_v58  ;;  %v532_v13 = vsel %vm510_vm1, %v3548_v55, %v3479_v33  ;;  %928 = vrot.lane.b32.xlu0 %v3158_v7, %s3008_s26  ;;  %v3849_v46 = vrot.slane %v2559_v21, %v3359_v35 }
  0xfb   :  { %v1554_v47 = vpop.permute.xlu1 %1553  ;;  %v2613_v55 = vpack.c.bf16 %v3798_v49, %v3802_v51  ;;  %v3870_v36 = vmul.f32 %v3768_v17, %v532_v13  ;;  %v566_v10 = vmul.f32 %v3771_v2, %v516_v1  ;;  %v533_v49 = vsel %vm510_vm1, %v3558_v60, %v3493_v40 }
  0xfc   :  { %v1552_v37 = vpop.permute.xlu0 %1551  ;;  %v2607_v16 = vpack.c.bf16 %v732_v14, %v730_v12  ;;  %v2609_v33 = vpack.c.bf16 %v731_v27, %v729_v11  ;;  %v570_v26 = vmul.f32 %v3771_v2, %v518_v19  ;;  %v568_v21 = vmul.f32 %v3771_v2, %v517_v59  ;;  %v6427_v19 = vld [vmem:[#allocation2_spill] sm:$0xff] }
  0xfd   :  { %962 = vrot.lane.b32.xlu1 %v3265_v22, %s3008_s26  ;;  %v520_v45 = vsel %vm510_vm1, %v3500_v41, %v3564_v61  ;;  %v536_v15 = vsel %vm510_vm1, %v3564_v61, %v3500_v41  ;;  %v2617_v14 = vpack.c.bf16 %v3862_v48, %v559_v9  ;;  %v2621_v11 = vpack.c.bf16 %v3870_v36, %v3878_v18 }
  0xfe   :  { %2608 = vmatprep.subr.bf16.mxu1 %v2607_v16  ;;  %960 = vrot.lane.b32.xlu0 %v3270_v23, %s3008_s26  ;;  %v535_v41 = vsel %vm510_vm1, %v3566_v62, %v3502_v42  ;;  %v569_v61 = vmul.f32 %v3768_v17, %v534_v5  ;;  %v567_v12 = vmul.f32 %v3768_v17, %v533_v49 }
  0xff   :  { %2610 = vmatpush1.bf16.msra.mxu1 %v2609_v33  ;;  %v1586_v25 = vpop.permute.xlu1 %1585  ;;  %v2619_v3 = vpack.c.bf16 %v566_v10, %v564_v30  ;;  %v3945_v1 = vmul.f32 %v3768_v17, %v536_v15  ;;  %v574_v13 = vmul.f32 %v3771_v2, %v520_v45  ;;  %v521_v54 = vsel %vm510_vm1, %v3510_v44, %v3574_v38 }
 0x100   :  { %v1584_v51 = vpop.permute.xlu0 %1583  ;;  %2612 = vmatprep.subr.bf16.mxu1 %v2611_v4  ;;  %v1617_v39 = vsel %vm1615_vm2, %v1554_v47, %v1586_v25  ;;  %v1633_v57 = vsel %vm1615_vm2, %v1586_v25, %v1554_v47  ;;  %v538_v10 = vsel %vm510_vm1, %v3572_v63, %v3508_v43  ;;  %v537_v30 = vsel %vm510_vm1, %v3574_v38, %v3510_v44  ;;  %v6429_v44 = vld [vmem:[#allocation5_spill] sm:$0xff] }
 0x101   :  { %v1616_v20 = vsel %vm1615_vm2, %v1552_v37, %v1584_v51  ;;  %v1632_v28 = vsel %vm1615_vm2, %v1584_v51, %v1552_v37  ;;  %v1663_v40 = vmul.f32 %v3849_v46, %v1617_v39  ;;  %v1664_v60 = vmul.f32 %v3865_v0, %v1633_v57  ;;  %1809 = vrot.lane.b32.xlu1 %v3153_v6, %s3009_s30  ;;  %v2541_v37 = vld [vmem:[%s6416_s0 + $0x28] sm:$0xff]  ;;  %v6428_v51 = vld [vmem:[#allocation9_spill] sm:$0xff]  ;;  %v2542_v39 = vld [vmem:[%s6416_s0 + $0x30] sm:$0xff] }
 0x102   :  { %v1661_v31 = vmul.f32 %v3849_v46, %v1616_v20  ;;  %v1662_v29 = vmul.f32 %v3865_v0, %v1632_v28  ;;  %1807 = vrot.lane.b32.xlu0 %v3158_v7, %s3009_s30  ;;  %803 = vmatmul.mubr.f32.vlgmr.msra.gmra.mrb[0].mxu1 %v2540_v52  ;;  %v519_v7 = vsel %vm510_vm1, %v3502_v42, %v3566_v62  ;;  %v6430_v52 = vld [vmem:[#allocation3_spill] sm:$0xff]  ;;  %v6431_v28 = vld [vmem:[#allocation4_spill] sm:$0xff] }
 0x103   :  { %2614 = vmatpush1.bf16.msra.mxu1 %v2613_v55  ;;  %v1558_v6 = vpop.permute.xlu1 %1557  ;;  %808 = vmatprep.mubr.f32.mxu1 %v6426_v24  ;;  %v2623_v42 = vpack.c.bf16 %v570_v26, %v568_v21  ;;  %v3951_v62 = vmul.f32 %v3768_v17, %v535_v41  ;;  %v572_v50 = vmul.f32 %v3771_v2, %v519_v7 }
 0x104   :  { %v2741_v58 = vpack.c.bf16 %v1663_v40, %v1661_v31  ;;  %v1556_v53 = vpop.permute.xlu0 %1555  ;;  %v2739_v27 = vpack.c.bf16 %v1664_v60, %v1662_v29  ;;  %2616 = vmatprep.subr.bf16.mxu1 %v2615_v56  ;;  %v576_v5 = vmul.f32 %v3771_v2, %v521_v54  ;;  %v524_v38 = vsel %vm510_vm1, %v6429_v44, %v6428_v51  ;;  %v6432_v31 = vld [vmem:[#allocation10_spill] sm:$0xff]  ;;  %v6435_v54 = vld [vmem:[#allocation7_spill] sm:$0xff] }
 0x105   :  { %1841 = vrot.lane.b32.xlu1 %v3265_v22, %s3009_s30  ;;  %v522_v22 = vsel %vm510_vm1, %v3508_v43, %v3572_v63  ;;  %v2625_v43 = vpack.c.bf16 %v569_v61, %v567_v12  ;;  %v2629_v63 = vpack.c.bf16 %v3945_v1, %v3951_v62  ;;  %v577_v57 = vmul.f32 %v3768_v17, %v538_v10  ;;  %v6433_v29 = vld [vmem:[#allocation6_spill] sm:$0xff]  ;;  %v4033_v61 = vld [vmem:[%s6411_s29 + $0x90] sm:$0xff]  ;;  %v2543_v12 = vld [vmem:[%s6416_s0 + $0x38] sm:$0xff] }
 0x106   :  { %2740 = vmatprep.subr.bf16.mxu0 %v2739_v27  ;;  %1839 = vrot.lane.b32.xlu0 %v3270_v23, %s3009_s30  ;;  %v578_v18 = vmul.f32 %v3771_v2, %v522_v22  ;;  %v575_v20 = vmul.f32 %v3768_v17, %v537_v30  ;;  %v2627_v40 = vpack.c.bf16 %v574_v13, %v572_v50  ;;  %v6434_v22 = vld [vmem:[#allocation11_spill] sm:$0xff]  ;;  %v4072_v10 = vld [vmem:[%s6411_s29 + $0x98] sm:$0xff] }
 0x107   :  { %2742 = vmatpush1.bf16.msra.mxu0 %v2741_v58  ;;  %2618 = vmatpush1.bf16.msra.mxu1 %v2617_v14  ;;  %v1590_v47 = vpop.permute.xlu1 %1589  ;;  %v540_v60 = vsel %vm510_vm1, %v6428_v51, %v6429_v44  ;;  %v523_v26 = vsel %vm510_vm1, %v6433_v29, %v6432_v31  ;;  %v539_v21 = vsel %vm510_vm1, %v6432_v31, %v6433_v29 }
 0x108   :  { %v1588_v23 = vpop.permute.xlu0 %1587  ;;  %v1619_v16 = vsel %vm1615_vm2, %v1558_v6, %v1590_v47  ;;  %v1635_v33 = vsel %vm1615_vm2, %v1590_v47, %v1558_v6  ;;  %2620 = vmatprep.subr.bf16.mxu1 %v2619_v3  ;;  %809 = vmatmul.mubr.f32.gmra.mrb[2].mxu1 %v2541_v37  ;;  %v2631_v15 = vpack.c.bf16 %v578_v18, %v576_v5  ;;  %v6437_v37 = vld [vmem:[#allocation8_spill] sm:$0xff] }
 0x109   :  { %v1618_v55 = vsel %vm1615_vm2, %v1556_v53, %v1588_v23  ;;  %v1634_v48 = vsel %vm1615_vm2, %v1588_v23, %v1556_v53  ;;  %v1667_v4 = vmul.f32 %v3849_v46, %v1619_v16  ;;  %v1668_v9 = vmul.f32 %v3865_v0, %v1635_v33  ;;  %934 = vrot.lane.b32.xlu1 %v3167_v8, %s3008_s26  ;;  %v6436_v23 = vld [vmem:[#allocation12_spill] sm:$0xff] }
 0x10a   :  { %v1665_v36 = vmul.f32 %v3849_v46, %v1618_v55  ;;  %v1666_v56 = vmul.f32 %v3865_v0, %v1634_v48  ;;  %932 = vrot.lane.b32.xlu0 %v6427_v19, %s3008_s26  ;;  %814 = vmatprep.mubr.f32.mxu1 %v6426_v24  ;;  %v582_v58 = vmul.f32 %v3771_v2, %v524_v38  ;;  %v4082_v19 = vld [vmem:[%s6411_s29 + $0x88] sm:$0xff] }
 0x10b   :  { %2622 = vmatpush1.bf16.msra.mxu1 %v2621_v11  ;;  %v1562_v8 = vpop.permute.xlu1 %1561  ;;  %v580_v3 = vmul.f32 %v3771_v2, %v523_v26  ;;  %v581_v62 = vmul.f32 %v3768_v17, %v540_v60  ;;  %v579_v50 = vmul.f32 %v3768_v17, %v539_v21  ;;  %v526_v47 = vsel %vm510_vm1, %v6435_v54, %v6434_v22  ;;  %v4117_v21 = vld [vmem:[%s6411_s29 + $0xb8] sm:$0xff] }
 0x10c   :  { %v2745_v59 = vpack.c.bf16 %v1667_v4, %v1665_v36  ;;  %v1560_v49 = vpop.permute.xlu0 %1559  ;;  %v2743_v25 = vpack.c.bf16 %v1668_v9, %v1666_v56  ;;  %2624 = vmatprep.subr.bf16.mxu1 %v2623_v42  ;;  %815 = vmatmul.mubr.f32.gmra.mrb[4].mxu1 %v2542_v39  ;;  %v4046_v42 = vld [vmem:[%s6411_s29 + $0x80] sm:$0xff]  ;;  %v525_v16 = vsel %vm510_vm1, %v6437_v37, %v6436_v23 }
 0x10d   :  { %966 = vrot.lane.b32.xlu1 %v6430_v52, %s3008_s26  ;;  %820 = vmatprep.mubr.f32.mxu1 %v6426_v24  ;;  %v2633_v9 = vpack.c.bf16 %v577_v57, %v575_v20  ;;  %v542_v36 = vsel %vm510_vm1, %v6434_v22, %v6435_v54  ;;  %v541_v56 = vsel %vm510_vm1, %v6436_v23, %v6437_v37  ;;  %v4110_v20 = vld [vmem:[%s6411_s29 + $0xa0] sm:$0xff] }
 0x10e   :  { %2744 = vmatprep.subr.bf16.mxu0 %v2743_v25  ;;  %964 = vrot.lane.b32.xlu0 %v6431_v28, %s3008_s26  ;;  %v586_v18 = vmul.f32 %v3771_v2, %v526_v47  ;;  %v584_v30 = vmul.f32 %v3771_v2, %v525_v16  ;;  %v2635_v5 = vpack.c.bf16 %v582_v58, %v580_v3  ;;  %v587_v58 = vld [vmem:[%s6416_s0] sm:$0xff] }
 0x10f   :  { %2746 = vmatpush1.bf16.msra.mxu0 %v2745_v59  ;;  %2626 = vmatpush1.bf16.msra.mxu1 %v2625_v43  ;;  %v1594_v45 = vpop.permute.xlu1 %1593  ;;  %v2637_v59 = vpack.c.bf16 %v581_v62, %v579_v50  ;;  %v583_v25 = vmul.f32 %v3768_v17, %v541_v56 }
 0x110   :  { %v1621_v6 = vsel %vm1615_vm2, %v1562_v8, %v1594_v45  ;;  %v1637_v53 = vsel %vm1615_vm2, %v1594_v45, %v1562_v8  ;;  %v1592_v27 = vpop.permute.xlu0 %1591  ;;  %2628 = vmatprep.subr.bf16.mxu1 %v2627_v40  ;;  %821 = vmatmul.mubr.f32.gmra.mrb[6].mxu1 %v2543_v12  ;;  %v2639_v28 = vpack.c.bf16 %v586_v18, %v584_v30  ;;  %v4124_v45 = vld [vmem:[%s6411_s29 + $0xa8] sm:$0xff] }
 0x111   :  { %v1671_v14 = vmul.f32 %v3849_v46, %v1621_v6  ;;  %v1672_v11 = vmul.f32 %v3865_v0, %v1637_v53  ;;  %v1620_v7 = vsel %vm1615_vm2, %v1560_v49, %v1592_v27  ;;  %v1636_v41 = vsel %vm1615_vm2, %v1592_v27, %v1560_v49  ;;  %1813 = vrot.lane.b32.xlu1 %v4033_v61, %s3009_s30 }
 0x112   :  { %v1669_v1 = vmul.f32 %v3849_v46, %v1620_v7  ;;  %v1670_v13 = vmul.f32 %v3865_v0, %v1636_v41  ;;  %1811 = vrot.lane.b32.xlu0 %v4046_v42, %s3009_s30  ;;  %891 = vmatprep.mubr.f32.mxu1 %v6426_v24  ;;  %v585_v49 = vmul.f32 %v3768_v17, %v542_v36  ;;  %v4101_v17 = vld [vmem:[%s6411_s29 + $0xb0] sm:$0xff]  ;;  %v4174_v36 = vld [vmem:[%s6411_s29 + $0xc0] sm:$0xff] }
 0x113   :  { %2630 = vmatpush1.bf16.msra.mxu1 %v2629_v63  ;;  %v1566_v33 = vpop.permute.xlu1 %1565 }
 0x114   :  { %v2749_v55 = vpack.c.bf16 %v1671_v14, %v1669_v1  ;;  %v1564_v48 = vpop.permute.xlu0 %1563  ;;  %2632 = vmatprep.subr.bf16.mxu1 %v2631_v15  ;;  %v2747_v4 = vpack.c.bf16 %v1672_v11, %v1670_v13  ;;  %v2641_v26 = vpack.c.bf16 %v585_v49, %v583_v25 }
 0x115   :  { %1845 = vrot.lane.b32.xlu1 %v4072_v10, %s3009_s30 }
 0x116   :  { %1843 = vrot.lane.b32.xlu0 %v4082_v19, %s3009_s30  ;;  %2748 = vmatprep.subr.bf16.mxu0 %v2747_v4 }
 0x117   :  { %2634 = vmatpush1.bf16.msra.mxu1 %v2633_v9  ;;  %2750 = vmatpush1.bf16.msra.mxu0 %v2749_v55  ;;  %v1598_v8 = vpop.permute.xlu1 %1597 }
 0x118   :  { %v1623_v2 = vsel %vm1615_vm2, %v1566_v33, %v1598_v8  ;;  %v1639_v43 = vsel %vm1615_vm2, %v1598_v8, %v1566_v33  ;;  %v1596_v63 = vpop.permute.xlu0 %1595  ;;  %2636 = vmatprep.subr.bf16.mxu1 %v2635_v5  ;;  %v4188_v8 = vld [vmem:[%s6411_s29 + $0xc8] sm:$0xff] }
 0x119   :  { %v1675_v51 = vmul.f32 %v3849_v46, %v1623_v2  ;;  %v1676_v44 = vmul.f32 %v3865_v0, %v1639_v43  ;;  %v1622_v38 = vsel %vm1615_vm2, %v1564_v48, %v1596_v63  ;;  %v1638_v52 = vsel %vm1615_vm2, %v1596_v63, %v1564_v48  ;;  %938 = vrot.lane.b32.xlu1 %v4101_v17, %s3008_s26  ;;  %v4165_v48 = vld [vmem:[%s6411_s29 + $0xd0] sm:$0xff] }
 0x11a   :  { %v1673_v39 = vmul.f32 %v3849_v46, %v1622_v38  ;;  %v1674_v57 = vmul.f32 %v3865_v0, %v1638_v52  ;;  %936 = vrot.lane.b32.xlu0 %v4110_v20, %s3008_s26 }
 0x11b   :  { %2638 = vmatpush1.bf16.msra.mxu1 %v2637_v59  ;;  %v1570_v40 = vpop.permute.xlu1 %1569  ;;  %v4181_v59 = vld [vmem:[%s6411_s29 + $0xd8] sm:$0xff] }
 0x11c   :  { %v2753_v60 = vpack.c.bf16 %v1675_v51, %v1673_v39  ;;  %v1568_v31 = vpop.permute.xlu0 %1567  ;;  %2640 = vmatprep.subr.bf16.mxu1 %v2639_v28  ;;  %v2751_v29 = vpack.c.bf16 %v1676_v44, %v1674_v57 }
 0x11d   :  { %970 = vrot.lane.b32.xlu1 %v4117_v21, %s3008_s26 }
 0x11e   :  { %968 = vrot.lane.b32.xlu0 %v4124_v45, %s3008_s26  ;;  %2752 = vmatprep.subr.bf16.mxu0 %v2751_v29 }
 0x11f   :  { %2642 = vmatpush1.bf16.msra.mxu1 %v2641_v26  ;;  %2754 = vmatpush1.bf16.msra.mxu0 %v2753_v60  ;;  %v1602_v15 = vpop.permute.xlu1 %1601 }
 0x120   :  { %v1625_v6 = vsel %vm1615_vm2, %v1570_v40, %v1602_v15  ;;  %v1641_v53 = vsel %vm1615_vm2, %v1602_v15, %v1570_v40  ;;  %v1600_v27 = vpop.permute.xlu0 %1599 }
 0x121   :  { %v1679_v14 = vmul.f32 %v3849_v46, %v1625_v6  ;;  %v1680_v11 = vmul.f32 %v3865_v0, %v1641_v53  ;;  %v1624_v7 = vsel %vm1615_vm2, %v1568_v31, %v1600_v27  ;;  %v1640_v41 = vsel %vm1615_vm2, %v1600_v27, %v1568_v31  ;;  %1817 = vrot.lane.b32.xlu1 %v4101_v17, %s3009_s30 }
 0x122   :  { %v1677_v12 = vmul.f32 %v3849_v46, %v1624_v7  ;;  %v1678_v3 = vmul.f32 %v3865_v0, %v1640_v41  ;;  %1815 = vrot.lane.b32.xlu0 %v4110_v20, %s3009_s30  ;;  %892 = vmatmul.mubr.f32.vlgmr.msra.gmra.mrb[0].mxu1 %v587_v58  ;;  %v4234_v41 = vld [vmem:[%s6411_s29 + $0xe0] sm:$0xff] }
 0x123   :  { %v1574_v1 = vpop.permute.xlu1 %1573  ;;  %897 = vmatprep.mubr.f32.mxu1 %v6426_v24 }
 0x124   :  { %v2757_v13 = vpack.c.bf16 %v1679_v14, %v1677_v12  ;;  %v1572_v62 = vpop.permute.xlu0 %1571  ;;  %v2755_v50 = vpack.c.bf16 %v1680_v11, %v1678_v3  ;;  %v4225_v14 = vld [vmem:[%s6411_s29 + $0xf0] sm:$0xff]  ;;  %v2544_v12 = vld [vmem:[%s6415_s28 + $0x4] sm:$0x3]  ;;  %v588_v3 = vld [vmem:[%s6416_s0 + $0x8] sm:$0xff] }
 0x125   :  { %1849 = vrot.lane.b32.xlu1 %v4117_v21, %s3009_s30 }
 0x126   :  { %1847 = vrot.lane.b32.xlu0 %v4124_v45, %s3009_s30  ;;  %2756 = vmatprep.subr.bf16.mxu0 %v2755_v50  ;;  %v4254_v50 = vrot.slane %v2544_v12, %v3359_v35 }
 0x127   :  { %2758 = vmatpush1.bf16.msra.mxu0 %v2757_v13  ;;  %v1606_v22 = vpop.permute.xlu1 %1605  ;;  %898 = vmatmul.mubr.f32.gmra.mrb[2].mxu1 %v588_v3 }
 0x128   :  { %v1627_v54 = vsel %vm1615_vm2, %v1574_v1, %v1606_v22  ;;  %v1643_v47 = vsel %vm1615_vm2, %v1606_v22, %v1574_v1  ;;  %v1604_v23 = vpop.permute.xlu0 %1603  ;;  %903 = vmatprep.mubr.f32.mxu1 %v6426_v24  ;;  %v4257_v22 = vrot.slane %v2544_v12, %v3357_v34 }
 0x129   :  { %v1683_v37 = vmul.f32 %v3849_v46, %v1627_v54  ;;  %v1684_v16 = vmul.f32 %v3865_v0, %v1643_v47  ;;  %v1626_v33 = vsel %vm1615_vm2, %v1572_v62, %v1604_v23  ;;  %v1642_v55 = vsel %vm1615_vm2, %v1604_v23, %v1572_v62  ;;  %942 = vrot.lane.b32.xlu1 %v4165_v48, %s3008_s26  ;;  %v4249_v62 = vld [vmem:[%s6411_s29 + $0xf8] sm:$0xff]  ;;  %v4262_v54 = vld [vmem:[%s6411_s29 + $0xe8] sm:$0xff]  ;;  %v589_v47 = vld [vmem:[%s6416_s0 + $0x10] sm:$0xff] }
 0x12a   :  { %v1681_v4 = vmul.f32 %v3849_v46, %v1626_v33  ;;  %v1682_v9 = vmul.f32 %v3865_v0, %v1642_v55  ;;  %940 = vrot.lane.b32.xlu0 %v4174_v36, %s3008_s26 }
 0x12b   :  { %v1578_v56 = vpop.permute.xlu1 %1577  ;;  %904 = vmatmul.mubr.f32.gmra.mrb[4].mxu1 %v589_v47 }
 0x12c   :  { %v2761_v18 = vpack.c.bf16 %v1683_v37, %v1681_v4  ;;  %v1576_v30 = vpop.permute.xlu0 %1575  ;;  %v2759_v5 = vpack.c.bf16 %v1684_v16, %v1682_v9  ;;  %v2560_v37 = vld [vmem:[%s6416_s0 + $0xa0] sm:$0xff]  ;;  %909 = vmatprep.mubr.f32.mxu1 %v6426_v24 }
 0x12d   :  { %974 = vrot.lane.b32.xlu1 %v4181_v59, %s3008_s26 }
 0x12e   :  { %972 = vrot.lane.b32.xlu0 %v4188_v8, %s3008_s26  ;;  %2760 = vmatprep.subr.bf16.mxu0 %v2759_v5 }
 0x12f   :  { %2762 = vmatpush1.bf16.msra.mxu0 %v2761_v18  ;;  %v1610_v49 = vpop.permute.xlu1 %1609 }
 0x130   :  { %v1629_v25 = vsel %vm1615_vm2, %v1578_v56, %v1610_v49  ;;  %v1645_v2 = vsel %vm1615_vm2, %v1610_v49, %v1578_v56  ;;  %v1608_v43 = vpop.permute.xlu0 %1607  ;;  %v2564_v49 = vld [vmem:[%s6415_s28 + $0xc] sm:$0x3] }
 0x131   :  { %v1687_v63 = vmul.f32 %v3849_v46, %v1629_v25  ;;  %v1688_v51 = vmul.f32 %v3865_v0, %v1645_v2  ;;  %v1628_v44 = vsel %vm1615_vm2, %v1576_v30, %v1608_v43  ;;  %v1644_v38 = vsel %vm1615_vm2, %v1608_v43, %v1576_v30  ;;  %1821 = vrot.lane.b32.xlu1 %v4165_v48, %s3009_s30  ;;  %v590_v25 = vld [vmem:[%s6416_s0 + $0x18] sm:$0xff] }
 0x132   :  { %v1685_v52 = vmul.f32 %v3849_v46, %v1628_v44  ;;  %v1686_v39 = vmul.f32 %v3865_v0, %v1644_v38  ;;  %1819 = vrot.lane.b32.xlu0 %v4174_v36, %s3009_s30  ;;  %910 = vmatmul.mubr.f32.gmra.mrb[6].mxu1 %v590_v25  ;;  %v2561_v44 = vld [vmem:[%s6416_s0 + $0xa8] sm:$0xff]  ;;  %v4304_v38 = vrot.slane %v2564_v49, %v3359_v35 }
 0x133   :  { %v1582_v57 = vpop.permute.xlu1 %1581  ;;  %1127 = vmatprep.mubr.f32.mxu1 %v6426_v24 }
 0x134   :  { %v2765_v28 = vpack.c.bf16 %v1687_v63, %v1685_v52  ;;  %v1580_v40 = vpop.permute.xlu0 %1579  ;;  %v2763_v60 = vpack.c.bf16 %v1688_v51, %v1686_v39  ;;  %v4307_v52 = vrot.slane %v2564_v49, %v3357_v34 }
 0x135   :  { %1853 = vrot.lane.b32.xlu1 %v4181_v59, %s3009_s30 }
 0x136   :  { %1851 = vrot.lane.b32.xlu0 %v4188_v8, %s3009_s30  ;;  %2764 = vmatprep.subr.bf16.mxu0 %v2763_v60  ;;  %v2562_v60 = vld [vmem:[%s6416_s0 + $0xb0] sm:$0xff] }
 0x137   :  { %2766 = vmatpush1.bf16.msra.mxu0 %v2765_v28  ;;  %v1614_v31 = vpop.permute.xlu1 %1613 }
 0x138   :  { %v1631_v29 = vsel %vm1615_vm2, %v1582_v57, %v1614_v31  ;;  %v1647_v26 = vsel %vm1615_vm2, %v1614_v31, %v1582_v57  ;;  %v1612_v15 = vpop.permute.xlu0 %1611 }
 0x139   :  { %v1691_v58 = vmul.f32 %v3849_v46, %v1631_v29  ;;  %v1692_v6 = vmul.f32 %v3865_v0, %v1647_v26  ;;  %v1630_v53 = vsel %vm1615_vm2, %v1580_v40, %v1612_v15  ;;  %v1646_v27 = vsel %vm1615_vm2, %v1612_v15, %v1580_v40  ;;  %946 = vrot.lane.b32.xlu1 %v4225_v14, %s3008_s26 }
 0x13a   :  { %v1689_v11 = vmul.f32 %v3849_v46, %v1630_v53  ;;  %v1690_v7 = vmul.f32 %v3865_v0, %v1646_v27  ;;  %944 = vrot.lane.b32.xlu0 %v4234_v41, %s3008_s26  ;;  %v4337_v27 = vld [vmem:[%s6411_s29] sm:$0xff] }
 0x13b   :  { %v919_v1 = vpop.permute.xlu1 %918 }
 0x13c   :  { %v2769_v46 = vpack.c.bf16 %v1691_v58, %v1689_v11  ;;  %v917_v0 = vpop.permute.xlu0 %916  ;;  %v2767_v13 = vpack.c.bf16 %v1692_v6, %v1690_v7  ;;  %v4328_v58 = vld [vmem:[%s6411_s29 + $0x10] sm:$0xff] }
 0x13d   :  { %978 = vrot.lane.b32.xlu1 %v4249_v62, %s3008_s26 }
 0x13e   :  { %976 = vrot.lane.b32.xlu0 %v4262_v54, %s3008_s26  ;;  %2768 = vmatprep.subr.bf16.mxu0 %v2767_v13 }
 0x13f   :  { %2770 = vmatpush1.bf16.msra.mxu0 %v2769_v46  ;;  %v951_v23 = vpop.permute.xlu1 %950  ;;  %v2563_v46 = vld [vmem:[%s6416_s0 + $0xb8] sm:$0xff] }
 0x140   :  { %v982_v16 = vsel %vm980_vm3, %v919_v1, %v951_v23  ;;  %v998_v33 = vsel %vm980_vm3, %v951_v23, %v919_v1  ;;  %v949_v55 = vpop.permute.xlu0 %948  ;;  %v4345_v1 = vld [vmem:[%s6411_s29 + $0x18] sm:$0xff] }
 0x141   :  { %v1028_v4 = vmul.f32 %v4254_v50, %v998_v33  ;;  %v1029_v9 = vmul.f32 %v4257_v22, %v982_v16  ;;  %v981_v56 = vsel %vm980_vm3, %v917_v0, %v949_v55  ;;  %v997_v18 = vsel %vm980_vm3, %v949_v55, %v917_v0  ;;  %1825 = vrot.lane.b32.xlu1 %v4225_v14, %s3009_s30  ;;  %v4355_v0 = vld [vmem:[%s6411_s29 + $0x8] sm:$0xff] }
 0x142   :  { %v1026_v30 = vmul.f32 %v4254_v50, %v997_v18  ;;  %v1027_v5 = vmul.f32 %v4257_v22, %v981_v56  ;;  %1823 = vrot.lane.b32.xlu0 %v4234_v41, %s3009_s30  ;;  %1763 = vmatmul.mubr.f32.vlgmr.msra.gmra.mrb[0].mxu0 %v2560_v37 }
 0x143   :  { %v1798_v2 = vpop.permute.xlu1 %1797  ;;  %1768 = vmatprep.mubr.f32.mxu0 %v6426_v24 }
 0x144   :  { %v2645_v43 = vpack.c.bf16 %v1028_v4, %v1026_v30  ;;  %v1796_v63 = vpop.permute.xlu0 %1795  ;;  %v2643_v51 = vpack.c.bf16 %v1029_v9, %v1027_v5 }
 0x145   :  { %1857 = vrot.lane.b32.xlu1 %v4249_v62, %s3009_s30 }
 0x146   :  { %1855 = vrot.lane.b32.xlu0 %v4262_v54, %s3009_s30  ;;  %2644 = vmatprep.subr.bf16.mxu1 %v2643_v51 }
 0x147   :  { %2646 = vmatpush1.bf16.msra.mxu1 %v2645_v43  ;;  %v1830_v39 = vpop.permute.xlu1 %1829  ;;  %1769 = vmatmul.mubr.f32.gmra.mrb[2].mxu0 %v2561_v44 }
 0x148   :  { %v1861_v57 = vsel %vm1859_vm4, %v1798_v2, %v1830_v39  ;;  %v1877_v28 = vsel %vm1859_vm4, %v1830_v39, %v1798_v2  ;;  %v1828_v40 = vpop.permute.xlu0 %1827  ;;  %1774 = vmatprep.mubr.f32.mxu0 %v6426_v24 }
 0x149   :  { %v1907_v31 = vmul.f32 %v4304_v38, %v1861_v57  ;;  %v1908_v29 = vmul.f32 %v4307_v52, %v1877_v28  ;;  %v1860_v26 = vsel %vm1859_vm4, %v1796_v63, %v1828_v40  ;;  %v1876_v15 = vsel %vm1859_vm4, %v1828_v40, %v1796_v63  ;;  %1162 = vrot.lane.b32.xlu1 %v4328_v58, %s3010_s21  ;;  %v4393_v28 = vld [vmem:[%s6411_s29 + $0x30] sm:$0xff] }
 0x14a   :  { %v1905_v6 = vmul.f32 %v4304_v38, %v1860_v26  ;;  %v1906_v53 = vmul.f32 %v4307_v52, %v1876_v15  ;;  %1160 = vrot.lane.b32.xlu0 %v4337_v27, %s3010_s21 }
 0x14b   :  { %v923_v11 = vpop.permute.xlu1 %922  ;;  %1775 = vmatmul.mubr.f32.gmra.mrb[4].mxu0 %v2562_v60 }
 0x14c   :  { %v2773_v7 = vpack.c.bf16 %v1907_v31, %v1905_v6  ;;  %v921_v12 = vpop.permute.xlu0 %920  ;;  %v2771_v3 = vpack.c.bf16 %v1908_v29, %v1906_v53  ;;  %1780 = vmatprep.mubr.f32.mxu0 %v6426_v24  ;;  %v4402_v31 = vld [vmem:[%s6411_s29 + $0x20] sm:$0xff]  ;;  %v4409_v53 = vld [vmem:[%s6411_s29 + $0x38] sm:$0xff] }
 0x14d   :  { %1194 = vrot.lane.b32.xlu1 %v4345_v1, %s3010_s21 }
 0x14e   :  { %1192 = vrot.lane.b32.xlu0 %v4355_v0, %s3010_s21  ;;  %2772 = vmatprep.subr.bf16.mxu0 %v2771_v3 }
 0x14f   :  { %2774 = vmatpush1.bf16.msra.mxu0 %v2773_v7  ;;  %v955_v13 = vpop.permute.xlu1 %954 }
 0x150   :  { %v984_v47 = vsel %vm980_vm3, %v923_v11, %v955_v13  ;;  %v1000_v23 = vsel %vm980_vm3, %v955_v13, %v923_v11  ;;  %v953_v37 = vpop.permute.xlu0 %952  ;;  %1781 = vmatmul.mubr.f32.gmra.mrb[6].mxu0 %v2563_v46  ;;  %v4416_v11 = vld [vmem:[%s6411_s29 + $0x28] sm:$0xff] }
 0x151   :  { %v1032_v16 = vmul.f32 %v4254_v50, %v1000_v23  ;;  %v1033_v33 = vmul.f32 %v4257_v22, %v984_v47  ;;  %v983_v55 = vsel %vm980_vm3, %v921_v12, %v953_v37  ;;  %v999_v4 = vsel %vm980_vm3, %v953_v37, %v921_v12  ;;  %2041 = vrot.lane.b32.xlu1 %v4328_v58, %s3011_s2 }
 0x152   :  { %v1030_v9 = vmul.f32 %v4254_v50, %v999_v4  ;;  %v1031_v56 = vmul.f32 %v4257_v22, %v983_v55  ;;  %2039 = vrot.lane.b32.xlu0 %v4337_v27, %s3011_s2  ;;  %2006 = vmatprep.mubr.f32.mxu0 %v6426_v24 }
 0x153   :  { %v1802_v18 = vpop.permute.xlu1 %1801 }
 0x154   :  { %v2649_v30 = vpack.c.bf16 %v1032_v16, %v1030_v9  ;;  %v1800_v5 = vpop.permute.xlu0 %1799  ;;  %v2647_v49 = vpack.c.bf16 %v1033_v33, %v1031_v56 }
 0x155   :  { %2073 = vrot.lane.b32.xlu1 %v4345_v1, %s3011_s2 }
 0x156   :  { %2071 = vrot.lane.b32.xlu0 %v4355_v0, %s3011_s2  ;;  %2648 = vmatprep.subr.bf16.mxu1 %v2647_v49 }
 0x157   :  { %2650 = vmatpush1.bf16.msra.mxu1 %v2649_v30  ;;  %v1834_v25 = vpop.permute.xlu1 %1833 }
 0x158   :  { %v1863_v2 = vsel %vm1859_vm4, %v1802_v18, %v1834_v25  ;;  %v1879_v43 = vsel %vm1859_vm4, %v1834_v25, %v1802_v18  ;;  %v1832_v63 = vpop.permute.xlu0 %1831 }
 0x159   :  { %v1911_v51 = vmul.f32 %v4304_v38, %v1863_v2  ;;  %v1912_v44 = vmul.f32 %v4307_v52, %v1879_v43  ;;  %v1862_v39 = vsel %vm1859_vm4, %v1800_v5, %v1832_v63  ;;  %v1878_v57 = vsel %vm1859_vm4, %v1832_v63, %v1800_v5  ;;  %1166 = vrot.lane.b32.xlu1 %v4393_v28, %s3010_s21 }
 0x15a   :  { %v1909_v40 = vmul.f32 %v4304_v38, %v1862_v39  ;;  %v1910_v60 = vmul.f32 %v4307_v52, %v1878_v57  ;;  %1164 = vrot.lane.b32.xlu0 %v4402_v31, %s3010_s21  ;;  %v4462_v57 = vld [vmem:[%s6411_s29 + $0x40] sm:$0xff] }
 0x15b   :  { %v927_v29 = vpop.permute.xlu1 %926 }
 0x15c   :  { %v2777_v26 = vpack.c.bf16 %v1911_v51, %v1909_v40  ;;  %v925_v15 = vpop.permute.xlu0 %924  ;;  %v2775_v6 = vpack.c.bf16 %v1912_v44, %v1910_v60  ;;  %v4453_v51 = vld [vmem:[%s6411_s29 + $0x50] sm:$0xff] }
 0x15d   :  { %1198 = vrot.lane.b32.xlu1 %v4409_v53, %s3010_s21 }
 0x15e   :  { %1196 = vrot.lane.b32.xlu0 %v4416_v11, %s3010_s21  ;;  %2776 = vmatprep.subr.bf16.mxu0 %v2775_v6  ;;  %v4476_v6 = vld [vmem:[%s6411_s29 + $0x48] sm:$0xff] }
 0x15f   :  { %2778 = vmatpush1.bf16.msra.mxu0 %v2777_v26  ;;  %v959_v7 = vpop.permute.xlu1 %958 }
 0x160   :  { %v986_v12 = vsel %vm980_vm3, %v927_v29, %v959_v7  ;;  %v1002_v3 = vsel %vm980_vm3, %v959_v7, %v927_v29  ;;  %v957_v46 = vpop.permute.xlu0 %956 }
 0x161   :  { %v1036_v13 = vmul.f32 %v4254_v50, %v1002_v3  ;;  %v1037_v47 = vmul.f32 %v4257_v22, %v986_v12  ;;  %v985_v23 = vsel %vm980_vm3, %v925_v15, %v957_v46  ;;  %v1001_v37 = vsel %vm980_vm3, %v957_v46, %v925_v15  ;;  %2045 = vrot.lane.b32.xlu1 %v4393_v28, %s3011_s2  ;;  %v4469_v15 = vld [vmem:[%s6411_s29 + $0x58] sm:$0xff] }
 0x162   :  { %v1034_v16 = vmul.f32 %v4254_v50, %v1001_v37  ;;  %v1035_v33 = vmul.f32 %v4257_v22, %v985_v23  ;;  %2043 = vrot.lane.b32.xlu0 %v4402_v31, %s3011_s2 }
 0x163   :  { %v1806_v55 = vpop.permute.xlu1 %1805 }
 0x164   :  { %v2653_v4 = vpack.c.bf16 %v1036_v13, %v1034_v16  ;;  %v1804_v9 = vpop.permute.xlu0 %1803  ;;  %v2651_v56 = vpack.c.bf16 %v1037_v47, %v1035_v33 }
 0x165   :  { %2077 = vrot.lane.b32.xlu1 %v4409_v53, %s3011_s2 }
 0x166   :  { %2075 = vrot.lane.b32.xlu0 %v4416_v11, %s3011_s2  ;;  %2652 = vmatprep.subr.bf16.mxu1 %v2651_v56 }
 0x167   :  { %2654 = vmatpush1.bf16.msra.mxu1 %v2653_v4  ;;  %v1838_v18 = vpop.permute.xlu1 %1837 }
 0x168   :  { %v1865_v30 = vsel %vm1859_vm4, %v1806_v55, %v1838_v18  ;;  %v1881_v5 = vsel %vm1859_vm4, %v1838_v18, %v1806_v55  ;;  %v1836_v49 = vpop.permute.xlu0 %1835 }
 0x169   :  { %v1915_v25 = vmul.f32 %v4304_v38, %v1865_v30  ;;  %v1916_v2 = vmul.f32 %v4307_v52, %v1881_v5  ;;  %v1864_v43 = vsel %vm1859_vm4, %v1804_v9, %v1836_v49  ;;  %v1880_v63 = vsel %vm1859_vm4, %v1836_v49, %v1804_v9  ;;  %1170 = vrot.lane.b32.xlu1 %v4453_v51, %s3010_s21 }
 0x16a   :  { %v1913_v44 = vmul.f32 %v4304_v38, %v1864_v43  ;;  %v1914_v39 = vmul.f32 %v4307_v52, %v1880_v63  ;;  %1168 = vrot.lane.b32.xlu0 %v4462_v57, %s3010_s21 }
 0x16b   :  { %v931_v40 = vpop.permute.xlu1 %930 }
 0x16c   :  { %v2781_v60 = vpack.c.bf16 %v1915_v25, %v1913_v44  ;;  %v929_v29 = vpop.permute.xlu0 %928  ;;  %v2779_v26 = vpack.c.bf16 %v1916_v2, %v1914_v39  ;;  %v4513_v44 = vld [vmem:[%s6411_s29 + $0x70] sm:$0xff] }
 0x16d   :  { %1202 = vrot.lane.b32.xlu1 %v4469_v15, %s3010_s21 }
 0x16e   :  { %1200 = vrot.lane.b32.xlu0 %v4476_v6, %s3010_s21  ;;  %2780 = vmatprep.subr.bf16.mxu0 %v2779_v26 }
 0x16f   :  { %2782 = vmatpush1.bf16.msra.mxu0 %v2781_v60  ;;  %v963_v7 = vpop.permute.xlu1 %962  ;;  %v4522_v60 = vld [vmem:[%s6411_s29 + $0x60] sm:$0xff] }
 0x170   :  { %v988_v12 = vsel %vm980_vm3, %v931_v40, %v963_v7  ;;  %v1004_v3 = vsel %vm980_vm3, %v963_v7, %v931_v40  ;;  %v961_v46 = vpop.permute.xlu0 %960 }
 0x171   :  { %v1040_v13 = vmul.f32 %v4254_v50, %v1004_v3  ;;  %v1041_v47 = vmul.f32 %v4257_v22, %v988_v12  ;;  %v987_v23 = vsel %vm980_vm3, %v929_v29, %v961_v46  ;;  %v1003_v37 = vsel %vm980_vm3, %v961_v46, %v929_v29  ;;  %2049 = vrot.lane.b32.xlu1 %v4453_v51, %s3011_s2  ;;  %v4529_v3 = vld [vmem:[%s6411_s29 + $0x78] sm:$0xff]  ;;  %v4536_v46 = vld [vmem:[%s6411_s29 + $0x68] sm:$0xff] }
 0x172   :  { %v1038_v16 = vmul.f32 %v4254_v50, %v1003_v37  ;;  %v1039_v33 = vmul.f32 %v4257_v22, %v987_v23  ;;  %2047 = vrot.lane.b32.xlu0 %v4462_v57, %s3011_s2 }
 0x173   :  { %v1810_v55 = vpop.permute.xlu1 %1809 }
 0x174   :  { %v2657_v4 = vpack.c.bf16 %v1040_v13, %v1038_v16  ;;  %v1808_v9 = vpop.permute.xlu0 %1807  ;;  %v2655_v56 = vpack.c.bf16 %v1041_v47, %v1039_v33 }
 0x175   :  { %2081 = vrot.lane.b32.xlu1 %v4469_v15, %s3011_s2 }
 0x176   :  { %2079 = vrot.lane.b32.xlu0 %v4476_v6, %s3011_s2  ;;  %2656 = vmatprep.subr.bf16.mxu1 %v2655_v56 }
 0x177   :  { %2658 = vmatpush1.bf16.msra.mxu1 %v2657_v4  ;;  %v1842_v18 = vpop.permute.xlu1 %1841 }
 0x178   :  { %v1867_v30 = vsel %vm1859_vm4, %v1810_v55, %v1842_v18  ;;  %v1883_v5 = vsel %vm1859_vm4, %v1842_v18, %v1810_v55  ;;  %v1840_v49 = vpop.permute.xlu0 %1839 }
 0x179   :  { %v1919_v25 = vmul.f32 %v4304_v38, %v1867_v30  ;;  %v1920_v2 = vmul.f32 %v4307_v52, %v1883_v5  ;;  %v1866_v43 = vsel %vm1859_vm4, %v1808_v9, %v1840_v49  ;;  %v1882_v63 = vsel %vm1859_vm4, %v1840_v49, %v1808_v9  ;;  %1174 = vrot.lane.b32.xlu1 %v4513_v44, %s3010_s21 }
 0x17a   :  { %v1917_v39 = vmul.f32 %v4304_v38, %v1866_v43  ;;  %v1918_v40 = vmul.f32 %v4307_v52, %v1882_v63  ;;  %1172 = vrot.lane.b32.xlu0 %v4522_v60, %s3010_s21 }
 0x17b   :  { %v935_v29 = vpop.permute.xlu1 %934 }
 0x17c   :  { %v2785_v26 = vpack.c.bf16 %v1919_v25, %v1917_v39  ;;  %v933_v7 = vpop.permute.xlu0 %932  ;;  %v2783_v12 = vpack.c.bf16 %v1920_v2, %v1918_v40 }
 0x17d   :  { %1206 = vrot.lane.b32.xlu1 %v4529_v3, %s3010_s21 }
 0x17e   :  { %1204 = vrot.lane.b32.xlu0 %v4536_v46, %s3010_s21  ;;  %2784 = vmatprep.subr.bf16.mxu0 %v2783_v12 }
 0x17f   :  { %2786 = vmatpush1.bf16.msra.mxu0 %v2785_v26  ;;  %v967_v13 = vpop.permute.xlu1 %966 }
 0x180   :  { %v990_v47 = vsel %vm980_vm3, %v935_v29, %v967_v13  ;;  %v1006_v23 = vsel %vm980_vm3, %v967_v13, %v935_v29  ;;  %v965_v37 = vpop.permute.xlu0 %964 }
 0x181   :  { %v1044_v16 = vmul.f32 %v4254_v50, %v1006_v23  ;;  %v1045_v33 = vmul.f32 %v4257_v22, %v990_v47  ;;  %v989_v55 = vsel %vm980_vm3, %v933_v7, %v965_v37  ;;  %v1005_v4 = vsel %vm980_vm3, %v965_v37, %v933_v7  ;;  %2053 = vrot.lane.b32.xlu1 %v4513_v44, %s3011_s2 }
 0x182   :  { %v1042_v9 = vmul.f32 %v4254_v50, %v1005_v4  ;;  %v1043_v56 = vmul.f32 %v4257_v22, %v989_v55  ;;  %2051 = vrot.lane.b32.xlu0 %v4522_v60, %s3011_s2 }
 0x183   :  { %v1814_v18 = vpop.permute.xlu1 %1813 }
 0x184   :  { %v2661_v30 = vpack.c.bf16 %v1044_v16, %v1042_v9  ;;  %v1812_v5 = vpop.permute.xlu0 %1811  ;;  %v2659_v49 = vpack.c.bf16 %v1045_v33, %v1043_v56 }
 0x185   :  { %2085 = vrot.lane.b32.xlu1 %v4529_v3, %s3011_s2 }
 0x186   :  { %2083 = vrot.lane.b32.xlu0 %v4536_v46, %s3011_s2  ;;  %2660 = vmatprep.subr.bf16.mxu1 %v2659_v49 }
 0x187   :  { %2662 = vmatpush1.bf16.msra.mxu1 %v2661_v30  ;;  %v1846_v25 = vpop.permute.xlu1 %1845 }
 0x188   :  { %v1869_v2 = vsel %vm1859_vm4, %v1814_v18, %v1846_v25  ;;  %v1885_v43 = vsel %vm1859_vm4, %v1846_v25, %v1814_v18  ;;  %v1844_v63 = vpop.permute.xlu0 %1843 }
 0x189   :  { %v1923_v39 = vmul.f32 %v4304_v38, %v1869_v2  ;;  %v1924_v40 = vmul.f32 %v4307_v52, %v1885_v43  ;;  %v1868_v29 = vsel %vm1859_vm4, %v1812_v5, %v1844_v63  ;;  %v1884_v26 = vsel %vm1859_vm4, %v1844_v63, %v1812_v5  ;;  %1178 = vrot.lane.b32.xlu1 %v4033_v61, %s3010_s21 }
 0x18a   :  { %v1921_v7 = vmul.f32 %v4304_v38, %v1868_v29  ;;  %v1922_v12 = vmul.f32 %v4307_v52, %v1884_v26  ;;  %1176 = vrot.lane.b32.xlu0 %v4046_v42, %s3010_s21 }
 0x18b   :  { %v939_v13 = vpop.permute.xlu1 %938 }
 0x18c   :  { %v2789_v47 = vpack.c.bf16 %v1923_v39, %v1921_v7  ;;  %v937_v23 = vpop.permute.xlu0 %936  ;;  %v2787_v37 = vpack.c.bf16 %v1924_v40, %v1922_v12 }
 0x18d   :  { %1210 = vrot.lane.b32.xlu1 %v4072_v10, %s3010_s21 }
 0x18e   :  { %1208 = vrot.lane.b32.xlu0 %v4082_v19, %s3010_s21  ;;  %2788 = vmatprep.subr.bf16.mxu0 %v2787_v37 }
 0x18f   :  { %2790 = vmatpush1.bf16.msra.mxu0 %v2789_v47  ;;  %v971_v16 = vpop.permute.xlu1 %970 }
 0x190   :  { %v992_v33 = vsel %vm980_vm3, %v939_v13, %v971_v16  ;;  %v1008_v55 = vsel %vm980_vm3, %v971_v16, %v939_v13  ;;  %v969_v4 = vpop.permute.xlu0 %968 }
 0x191   :  { %v1048_v9 = vmul.f32 %v4254_v50, %v1008_v55  ;;  %v1049_v56 = vmul.f32 %v4257_v22, %v992_v33  ;;  %v991_v18 = vsel %vm980_vm3, %v937_v23, %v969_v4  ;;  %v1007_v30 = vsel %vm980_vm3, %v969_v4, %v937_v23  ;;  %2057 = vrot.lane.b32.xlu1 %v4033_v61, %s3011_s2 }
 0x192   :  { %v1046_v5 = vmul.f32 %v4254_v50, %v1007_v30  ;;  %v1047_v49 = vmul.f32 %v4257_v22, %v991_v18  ;;  %2055 = vrot.lane.b32.xlu0 %v4046_v42, %s3011_s2 }
 0x193   :  { %v1818_v25 = vpop.permute.xlu1 %1817 }
 0x194   :  { %v2665_v2 = vpack.c.bf16 %v1048_v9, %v1046_v5  ;;  %v1816_v43 = vpop.permute.xlu0 %1815  ;;  %v2663_v63 = vpack.c.bf16 %v1049_v56, %v1047_v49 }
 0x195   :  { %2089 = vrot.lane.b32.xlu1 %v4072_v10, %s3011_s2 }
 0x196   :  { %2087 = vrot.lane.b32.xlu0 %v4082_v19, %s3011_s2  ;;  %2664 = vmatprep.subr.bf16.mxu1 %v2663_v63 }
 0x197   :  { %2666 = vmatpush1.bf16.msra.mxu1 %v2665_v2  ;;  %v1850_v61 = vpop.permute.xlu1 %1849 }
 0x198   :  { %v1871_v39 = vsel %vm1859_vm4, %v1818_v25, %v1850_v61  ;;  %v1887_v40 = vsel %vm1859_vm4, %v1850_v61, %v1818_v25  ;;  %v1848_v42 = vpop.permute.xlu0 %1847 }
 0x199   :  { %v1927_v29 = vmul.f32 %v4304_v38, %v1871_v39  ;;  %v1928_v26 = vmul.f32 %v4307_v52, %v1887_v40  ;;  %v1870_v10 = vsel %vm1859_vm4, %v1816_v43, %v1848_v42  ;;  %v1886_v19 = vsel %vm1859_vm4, %v1848_v42, %v1816_v43  ;;  %1182 = vrot.lane.b32.xlu1 %v4101_v17, %s3010_s21 }
 0x19a   :  { %v1925_v7 = vmul.f32 %v4304_v38, %v1870_v10  ;;  %v1926_v12 = vmul.f32 %v4307_v52, %v1886_v19  ;;  %1180 = vrot.lane.b32.xlu0 %v4110_v20, %s3010_s21 }
 0x19b   :  { %v943_v13 = vpop.permute.xlu1 %942 }
 0x19c   :  { %v2793_v47 = vpack.c.bf16 %v1927_v29, %v1925_v7  ;;  %v941_v23 = vpop.permute.xlu0 %940  ;;  %v2791_v37 = vpack.c.bf16 %v1928_v26, %v1926_v12 }
 0x19d   :  { %1214 = vrot.lane.b32.xlu1 %v4117_v21, %s3010_s21 }
 0x19e   :  { %1212 = vrot.lane.b32.xlu0 %v4124_v45, %s3010_s21  ;;  %2792 = vmatprep.subr.bf16.mxu0 %v2791_v37 }
 0x19f   :  { %2794 = vmatpush1.bf16.msra.mxu0 %v2793_v47  ;;  %v975_v16 = vpop.permute.xlu1 %974 }
 0x1a0   :  { %v994_v33 = vsel %vm980_vm3, %v943_v13, %v975_v16  ;;  %v1010_v55 = vsel %vm980_vm3, %v975_v16, %v943_v13  ;;  %v973_v4 = vpop.permute.xlu0 %972 }
 0x1a1   :  { %v1052_v9 = vmul.f32 %v4254_v50, %v1010_v55  ;;  %v1053_v56 = vmul.f32 %v4257_v22, %v994_v33  ;;  %v993_v18 = vsel %vm980_vm3, %v941_v23, %v973_v4  ;;  %v1009_v30 = vsel %vm980_vm3, %v973_v4, %v941_v23  ;;  %2061 = vrot.lane.b32.xlu1 %v4101_v17, %s3011_s2 }
 0x1a2   :  { %v1050_v5 = vmul.f32 %v4254_v50, %v1009_v30  ;;  %v1051_v49 = vmul.f32 %v4257_v22, %v993_v18  ;;  %2059 = vrot.lane.b32.xlu0 %v4110_v20, %s3011_s2 }
 0x1a3   :  { %v1822_v25 = vpop.permute.xlu1 %1821 }
 0x1a4   :  { %v2669_v2 = vpack.c.bf16 %v1052_v9, %v1050_v5  ;;  %v1820_v43 = vpop.permute.xlu0 %1819  ;;  %v2667_v63 = vpack.c.bf16 %v1053_v56, %v1051_v49 }
 0x1a5   :  { %2093 = vrot.lane.b32.xlu1 %v4117_v21, %s3011_s2 }
 0x1a6   :  { %2091 = vrot.lane.b32.xlu0 %v4124_v45, %s3011_s2  ;;  %2668 = vmatprep.subr.bf16.mxu1 %v2667_v63 }
 0x1a7   :  { %2670 = vmatpush1.bf16.msra.mxu1 %v2669_v2  ;;  %v1854_v17 = vpop.permute.xlu1 %1853 }
 0x1a8   :  { %v1873_v61 = vsel %vm1859_vm4, %v1822_v25, %v1854_v17  ;;  %v1889_v39 = vsel %vm1859_vm4, %v1854_v17, %v1822_v25  ;;  %v1852_v20 = vpop.permute.xlu0 %1851 }
 0x1a9   :  { %v1931_v40 = vmul.f32 %v4304_v38, %v1873_v61  ;;  %v1932_v42 = vmul.f32 %v4307_v52, %v1889_v39  ;;  %v1872_v21 = vsel %vm1859_vm4, %v1820_v43, %v1852_v20  ;;  %v1888_v45 = vsel %vm1859_vm4, %v1852_v20, %v1820_v43  ;;  %1186 = vrot.lane.b32.xlu1 %v4165_v48, %s3010_s21  ;;  %v2549_v61 = vld [vmem:[%s6415_s28 + $0x6] sm:$0x3] }
 0x1aa   :  { %v1929_v29 = vmul.f32 %v4304_v38, %v1872_v21  ;;  %v1930_v26 = vmul.f32 %v4307_v52, %v1888_v45  ;;  %1184 = vrot.lane.b32.xlu0 %v4174_v36, %s3010_s21  ;;  %v4713_v21 = vrot.slane %v2549_v61, %v3357_v34 }
 0x1ab   :  { %v947_v10 = vpop.permute.xlu1 %946 }
 0x1ac   :  { %v2797_v19 = vpack.c.bf16 %v1931_v40, %v1929_v29  ;;  %v945_v7 = vpop.permute.xlu0 %944  ;;  %v2795_v12 = vpack.c.bf16 %v1932_v42, %v1930_v26  ;;  %v2565_v29 = vld [vmem:[%s6416_s0 + $0xc0] sm:$0xff] }
 0x1ad   :  { %1218 = vrot.lane.b32.xlu1 %v4181_v59, %s3010_s21 }
 0x1ae   :  { %1216 = vrot.lane.b32.xlu0 %v4188_v8, %s3010_s21  ;;  %2796 = vmatprep.subr.bf16.mxu0 %v2795_v12 }
 0x1af   :  { %2798 = vmatpush1.bf16.msra.mxu0 %v2797_v19  ;;  %v979_v13 = vpop.permute.xlu1 %978 }
 0x1b0   :  { %v996_v47 = vsel %vm980_vm3, %v947_v10, %v979_v13  ;;  %v1012_v23 = vsel %vm980_vm3, %v979_v13, %v947_v10  ;;  %v977_v37 = vpop.permute.xlu0 %976 }
 0x1b1   :  { %v1056_v16 = vmul.f32 %v4254_v50, %v1012_v23  ;;  %v1057_v33 = vmul.f32 %v4257_v22, %v996_v47  ;;  %v995_v55 = vsel %vm980_vm3, %v945_v7, %v977_v37  ;;  %v1011_v4 = vsel %vm980_vm3, %v977_v37, %v945_v7  ;;  %2065 = vrot.lane.b32.xlu1 %v4165_v48, %s3011_s2  ;;  %v2547_v7 = vld [vmem:[%s6416_s0 + $0x50] sm:$0xff] }
 0x1b2   :  { %v1054_v9 = vmul.f32 %v4254_v50, %v1011_v4  ;;  %v1055_v56 = vmul.f32 %v4257_v22, %v995_v55  ;;  %2063 = vrot.lane.b32.xlu0 %v4174_v36, %s3011_s2  ;;  %v2545_v50 = vld [vmem:[%s6416_s0 + $0x40] sm:$0xff] }
 0x1b3   :  { %v1826_v18 = vpop.permute.xlu1 %1825 }
 0x1b4   :  { %v2673_v30 = vpack.c.bf16 %v1056_v16, %v1054_v9  ;;  %v1824_v5 = vpop.permute.xlu0 %1823  ;;  %v2671_v49 = vpack.c.bf16 %v1057_v33, %v1055_v56  ;;  %v2569_v33 = vld [vmem:[%s6415_s28 + $0xe] sm:$0x3] }
 0x1b5   :  { %2097 = vrot.lane.b32.xlu1 %v4181_v59, %s3011_s2 }
 0x1b6   :  { %2095 = vrot.lane.b32.xlu0 %v4188_v8, %s3011_s2  ;;  %2672 = vmatprep.subr.bf16.mxu1 %v2671_v49 }
 0x1b7   :  { %2674 = vmatpush1.bf16.msra.mxu1 %v2673_v30  ;;  %v1858_v48 = vpop.permute.xlu1 %1857  ;;  %v2548_v30 = vld [vmem:[%s6416_s0 + $0x58] sm:$0xff] }
 0x1b8   :  { %v1875_v36 = vsel %vm1859_vm4, %v1826_v18, %v1858_v48  ;;  %v1891_v22 = vsel %vm1859_vm4, %v1858_v48, %v1826_v18  ;;  %v1856_v25 = vpop.permute.xlu0 %1855  ;;  %v4755_v18 = vrot.slane %v2569_v33, %v3357_v34 }
 0x1b9   :  { %v1935_v2 = vmul.f32 %v4304_v38, %v1875_v36  ;;  %v1936_v59 = vmul.f32 %v4307_v52, %v1891_v22  ;;  %v1874_v8 = vsel %vm1859_vm4, %v1824_v5, %v1856_v25  ;;  %v1890_v43 = vsel %vm1859_vm4, %v1856_v25, %v1824_v5  ;;  %1190 = vrot.lane.b32.xlu1 %v4225_v14, %s3010_s21 }
 0x1ba   :  { %v1933_v63 = vmul.f32 %v4304_v38, %v1874_v8  ;;  %v1934_v17 = vmul.f32 %v4307_v52, %v1890_v43  ;;  %1188 = vrot.lane.b32.xlu0 %v4234_v41, %s3010_s21  ;;  %1128 = vmatmul.mubr.f32.vlgmr.msra.gmra.mrb[0].mxu1 %v2545_v50  ;;  %v2546_v38 = vld [vmem:[%s6416_s0 + $0x48] sm:$0xff]  ;;  %v4710_v52 = vrot.slane %v2549_v61, %v3359_v35  ;;  %v2567_v50 = vld [vmem:[%s6416_s0 + $0xd0] sm:$0xff] }
 0x1bb   :  { %v1163_v39 = vpop.permute.xlu1 %1162  ;;  %1133 = vmatprep.mubr.f32.mxu1 %v6426_v24 }
 0x1bc   :  { %v2801_v20 = vpack.c.bf16 %v1935_v2, %v1933_v63  ;;  %v1161_v40 = vpop.permute.xlu0 %1160  ;;  %v2799_v42 = vpack.c.bf16 %v1936_v59, %v1934_v17 }
 0x1bd   :  { %1222 = vrot.lane.b32.xlu1 %v4249_v62, %s3010_s21 }
 0x1be   :  { %1220 = vrot.lane.b32.xlu0 %v4262_v54, %s3010_s21  ;;  %2800 = vmatprep.subr.bf16.mxu0 %v2799_v42 }
 0x1bf   :  { %2802 = vmatpush1.bf16.msra.mxu0 %v2801_v20  ;;  %v1195_v45 = vpop.permute.xlu1 %1194  ;;  %1134 = vmatmul.mubr.f32.gmra.mrb[2].mxu1 %v2546_v38 }
 0x1c0   :  { %v1226_v26 = vsel %vm1224_vm5, %v1163_v39, %v1195_v45  ;;  %v1242_v10 = vsel %vm1224_vm5, %v1195_v45, %v1163_v39  ;;  %v1193_v19 = vpop.permute.xlu0 %1192  ;;  %1139 = vmatprep.mubr.f32.mxu1 %v6426_v24 }
 0x1c1   :  { %v1272_v12 = vmul.f32 %v4710_v52, %v1242_v10  ;;  %v1273_v13 = vmul.f32 %v4713_v21, %v1226_v26  ;;  %v1225_v47 = vsel %vm1224_vm5, %v1161_v40, %v1193_v19  ;;  %v1241_v23 = vsel %vm1224_vm5, %v1193_v19, %v1161_v40  ;;  %2069 = vrot.lane.b32.xlu1 %v4225_v14, %s3011_s2  ;;  %v2566_v14 = vld [vmem:[%s6416_s0 + $0xc8] sm:$0xff] }
 0x1c2   :  { %v1270_v37 = vmul.f32 %v4710_v52, %v1241_v23  ;;  %v1271_v16 = vmul.f32 %v4713_v21, %v1225_v47  ;;  %2067 = vrot.lane.b32.xlu0 %v4234_v41, %s3011_s2  ;;  %2007 = vmatmul.mubr.f32.vlgmr.msra.gmra.mrb[0].mxu0 %v2565_v29  ;;  %v4752_v41 = vrot.slane %v2569_v33, %v3359_v35 }
 0x1c3   :  { %v2042_v55 = vpop.permute.xlu1 %2041  ;;  %1140 = vmatmul.mubr.f32.gmra.mrb[4].mxu1 %v2547_v7  ;;  %2012 = vmatprep.mubr.f32.mxu0 %v6426_v24 }
 0x1c4   :  { %v2677_v4 = vpack.c.bf16 %v1272_v12, %v1270_v37  ;;  %v2040_v9 = vpop.permute.xlu0 %2039  ;;  %v2675_v56 = vpack.c.bf16 %v1273_v13, %v1271_v16  ;;  %1145 = vmatprep.mubr.f32.mxu1 %v6426_v24 }
 0x1c5   :  { %2101 = vrot.lane.b32.xlu1 %v4249_v62, %s3011_s2 }
 0x1c6   :  { %2099 = vrot.lane.b32.xlu0 %v4262_v54, %s3011_s2  ;;  %2676 = vmatprep.subr.bf16.mxu1 %v2675_v56  ;;  %s3012_s2 = smov 113  }
 0x1c7   :  { %2678 = vmatpush1.bf16.msra.mxu1 %v2677_v4  ;;  %v2074_v5 = vpop.permute.xlu1 %2073  ;;  %2013 = vmatmul.mubr.f32.gmra.mrb[2].mxu0 %v2566_v14 }
 0x1c8   :  { %v2105_v62 = vsel %vm2103_vm6, %v2042_v55, %v2074_v5  ;;  %v2121_v49 = vsel %vm2103_vm6, %v2074_v5, %v2042_v55  ;;  %v2072_v48 = vpop.permute.xlu0 %2071  ;;  %1146 = vmatmul.mubr.f32.gmra.mrb[6].mxu1 %v2548_v30  ;;  %2018 = vmatprep.mubr.f32.mxu0 %v6426_v24 }
 0x1c9   :  { %v2151_v54 = vmul.f32 %v4752_v41, %v2105_v62  ;;  %v2152_v36 = vmul.f32 %v4755_v18, %v2121_v49  ;;  %v2104_v22 = vsel %vm2103_vm6, %v2040_v9, %v2072_v48  ;;  %v2120_v25 = vsel %vm2103_vm6, %v2072_v48, %v2040_v9  ;;  %2285 = vrot.lane.b32.xlu1 %v4328_v58, %s3012_s2  ;;  %v2568_v58 = vld [vmem:[%s6416_s0 + $0xd8] sm:$0xff] }
 0x1ca   :  { %v2149_v2 = vmul.f32 %v4752_v41, %v2104_v22  ;;  %v2150_v59 = vmul.f32 %v4755_v18, %v2120_v25  ;;  %2283 = vrot.lane.b32.xlu0 %v4337_v27, %s3012_s2  ;;  %1371 = vmatprep.mubr.f32.mxu1 %v6426_v24 }
 0x1cb   :  { %v1167_v8 = vpop.permute.xlu1 %1166  ;;  %2019 = vmatmul.mubr.f32.gmra.mrb[4].mxu0 %v2567_v50 }
 0x1cc   :  { %v2805_v43 = vpack.c.bf16 %v2151_v54, %v2149_v2  ;;  %v1165_v63 = vpop.permute.xlu0 %1164  ;;  %v2803_v17 = vpack.c.bf16 %v2152_v36, %v2150_v59  ;;  %2024 = vmatprep.mubr.f32.mxu0 %v6426_v24  ;;  %v2988_v59 = vld [vmem:[%s6411_s29 + $0x90] sm:$0xff] }
 0x1cd   :  { %2317 = vrot.lane.b32.xlu1 %v4345_v1, %s3012_s2 }
 0x1ce   :  { %2315 = vrot.lane.b32.xlu0 %v4355_v0, %s3012_s2  ;;  %2804 = vmatprep.subr.bf16.mxu0 %v2803_v17 }
 0x1cf   :  { %2806 = vmatpush1.bf16.msra.mxu0 %v2805_v43  ;;  %v1199_v27 = vpop.permute.xlu1 %1198 }
 0x1d0   :  { %v1228_v61 = vsel %vm1224_vm5, %v1167_v8, %v1199_v27  ;;  %v1244_v39 = vsel %vm1224_vm5, %v1199_v27, %v1167_v8  ;;  %v1197_v20 = vpop.permute.xlu0 %1196  ;;  %2025 = vmatmul.mubr.f32.gmra.mrb[6].mxu0 %v2568_v58 }
 0x1d1   :  { %v1276_v1 = vmul.f32 %v4710_v52, %v1244_v39  ;;  %v1277_v40 = vmul.f32 %v4713_v21, %v1228_v61  ;;  %v1227_v42 = vsel %vm1224_vm5, %v1165_v63, %v1197_v20  ;;  %v1243_v0 = vsel %vm1224_vm5, %v1197_v20, %v1165_v63  ;;  %2289 = vrot.lane.b32.xlu1 %v4393_v28, %s3012_s2  ;;  %v2989_v63 = vld [vmem:[%s6411_s29 + $0x80] sm:$0xff]  ;;  %v2990_v39 = vld [vmem:[%s6411_s29 + $0x98] sm:$0xff]  ;;  %v2991_v20 = vld [vmem:[%s6411_s29 + $0x88] sm:$0xff] }
 0x1d2   :  { %v1274_v38 = vmul.f32 %v4710_v52, %v1243_v0  ;;  %v1275_v45 = vmul.f32 %v4713_v21, %v1227_v42  ;;  %2287 = vrot.lane.b32.xlu0 %v4402_v31, %s3012_s2  ;;  %2250 = vmatprep.mubr.f32.mxu0 %v6426_v24 }
 0x1d3   :  { %v2046_v29 = vpop.permute.xlu1 %2045 }
 0x1d4   :  { %v2681_v26 = vpack.c.bf16 %v1276_v1, %v1274_v38  ;;  %v2044_v10 = vpop.permute.xlu0 %2043  ;;  %v2679_v19 = vpack.c.bf16 %v1277_v40, %v1275_v45 }
 0x1d5   :  { %2321 = vrot.lane.b32.xlu1 %v4409_v53, %s3012_s2 }
 0x1d6   :  { %2319 = vrot.lane.b32.xlu0 %v4416_v11, %s3012_s2  ;;  %2680 = vmatprep.subr.bf16.mxu1 %v2679_v19 }
 0x1d7   :  { %2682 = vmatpush1.bf16.msra.mxu1 %v2681_v26  ;;  %v2078_v28 = vpop.permute.xlu1 %2077 }
 0x1d8   :  { %v2107_v7 = vsel %vm2103_vm6, %v2046_v29, %v2078_v28  ;;  %v2123_v31 = vsel %vm2103_vm6, %v2078_v28, %v2046_v29  ;;  %v2076_v12 = vpop.permute.xlu0 %2075 }
 0x1d9   :  { %v2155_v13 = vmul.f32 %v4752_v41, %v2107_v7  ;;  %v2156_v47 = vmul.f32 %v4755_v18, %v2123_v31  ;;  %v2106_v53 = vsel %vm2103_vm6, %v2044_v10, %v2076_v12  ;;  %v2122_v11 = vsel %vm2103_vm6, %v2076_v12, %v2044_v10  ;;  %2293 = vrot.lane.b32.xlu1 %v4453_v51, %s3012_s2  ;;  %v2992_v10 = vld [vmem:[%s6411_s29 + $0xb0] sm:$0xff]  ;;  %v2993_v7 = vld [vmem:[%s6411_s29 + $0xa0] sm:$0xff] }
 0x1da   :  { %v2153_v23 = vmul.f32 %v4752_v41, %v2106_v53  ;;  %v2154_v37 = vmul.f32 %v4755_v18, %v2122_v11  ;;  %2291 = vrot.lane.b32.xlu0 %v4462_v57, %s3012_s2  ;;  %v2994_v53 = vld [vmem:[%s6411_s29 + $0xb8] sm:$0xff]  ;;  %v2995_v11 = vld [vmem:[%s6411_s29 + $0xa8] sm:$0xff] }
 0x1db   :  { %v1171_v16 = vpop.permute.xlu1 %1170 }
 0x1dc   :  { %v2809_v33 = vpack.c.bf16 %v2155_v13, %v2153_v23  ;;  %v1169_v55 = vpop.permute.xlu0 %1168  ;;  %v2807_v4 = vpack.c.bf16 %v2156_v47, %v2154_v37 }
 0x1dd   :  { %2325 = vrot.lane.b32.xlu1 %v4469_v15, %s3012_s2 }
 0x1de   :  { %2323 = vrot.lane.b32.xlu0 %v4476_v6, %s3012_s2  ;;  %2808 = vmatprep.subr.bf16.mxu0 %v2807_v4 }
 0x1df   :  { %2810 = vmatpush1.bf16.msra.mxu0 %v2809_v33  ;;  %v1203_v51 = vpop.permute.xlu1 %1202 }
 0x1e0   :  { %v1230_v9 = vsel %vm1224_vm5, %v1171_v16, %v1203_v51  ;;  %v1246_v56 = vsel %vm1224_vm5, %v1203_v51, %v1171_v16  ;;  %v1201_v57 = vpop.permute.xlu0 %1200 }
 0x1e1   :  { %v1280_v14 = vmul.f32 %v4710_v52, %v1246_v56  ;;  %v1281_v30 = vmul.f32 %v4713_v21, %v1230_v9  ;;  %v1229_v15 = vsel %vm1224_vm5, %v1169_v55, %v1201_v57  ;;  %v1245_v6 = vsel %vm1224_vm5, %v1201_v57, %v1169_v55  ;;  %2297 = vrot.lane.b32.xlu1 %v4513_v44, %s3012_s2  ;;  %v2996_v56 = vld [vmem:[%s6411_s29 + $0xd0] sm:$0xff] }
 0x1e2   :  { %v1278_v5 = vmul.f32 %v4710_v52, %v1245_v6  ;;  %v1279_v62 = vmul.f32 %v4713_v21, %v1229_v15  ;;  %2295 = vrot.lane.b32.xlu0 %v4522_v60, %s3012_s2 }
 0x1e3   :  { %v2050_v49 = vpop.permute.xlu1 %2049 }
 0x1e4   :  { %v2685_v48 = vpack.c.bf16 %v1280_v14, %v1278_v5  ;;  %v2048_v50 = vpop.permute.xlu0 %2047  ;;  %v2683_v54 = vpack.c.bf16 %v1281_v30, %v1279_v62  ;;  %v2997_v30 = vld [vmem:[%s6411_s29 + $0xc0] sm:$0xff] }
 0x1e5   :  { %2329 = vrot.lane.b32.xlu1 %v4529_v3, %s3012_s2 }
 0x1e6   :  { %2327 = vrot.lane.b32.xlu0 %v4536_v46, %s3012_s2  ;;  %2684 = vmatprep.subr.bf16.mxu1 %v2683_v54 }
 0x1e7   :  { %2686 = vmatpush1.bf16.msra.mxu1 %v2685_v48  ;;  %v2082_v44 = vpop.permute.xlu1 %2081  ;;  %v2999_v48 = vld [vmem:[%s6411_s29 + $0xc8] sm:$0xff] }
 0x1e8   :  { %v2109_v36 = vsel %vm2103_vm6, %v2050_v49, %v2082_v44  ;;  %v2125_v22 = vsel %vm2103_vm6, %v2082_v44, %v2050_v49  ;;  %v2080_v60 = vpop.permute.xlu0 %2079  ;;  %v2998_v49 = vld [vmem:[%s6411_s29 + $0xd8] sm:$0xff] }
 0x1e9   :  { %v2159_v25 = vmul.f32 %v4752_v41, %v2109_v36  ;;  %v2160_v2 = vmul.f32 %v4755_v18, %v2125_v22  ;;  %v2108_v3 = vsel %vm2103_vm6, %v2048_v50, %v2080_v60  ;;  %v2124_v46 = vsel %vm2103_vm6, %v2080_v60, %v2048_v50  ;;  %2301 = vrot.lane.b32.xlu1 %v2988_v59, %s3012_s2 }
 0x1ea   :  { %v2157_v8 = vmul.f32 %v4752_v41, %v2108_v3  ;;  %v2158_v43 = vmul.f32 %v4755_v18, %v2124_v46  ;;  %2299 = vrot.lane.b32.xlu0 %v2989_v63, %s3012_s2  ;;  %v3000_v3 = vld [vmem:[%s6411_s29 + $0xf0] sm:$0xff] }
 0x1eb   :  { %v1175_v17 = vpop.permute.xlu1 %1174 }
 0x1ec   :  { %v2813_v58 = vpack.c.bf16 %v2159_v25, %v2157_v8  ;;  %v1173_v27 = vpop.permute.xlu0 %1172  ;;  %v2811_v61 = vpack.c.bf16 %v2160_v2, %v2158_v43  ;;  %v3001_v8 = vld [vmem:[%s6411_s29 + $0xe0] sm:$0xff] }
 0x1ed   :  { %2333 = vrot.lane.b32.xlu1 %v2990_v39, %s3012_s2 }
 0x1ee   :  { %2331 = vrot.lane.b32.xlu0 %v2991_v20, %s3012_s2  ;;  %2812 = vmatprep.subr.bf16.mxu0 %v2811_v61  ;;  %v3003_v61 = vld [vmem:[%s6411_s29 + $0xe8] sm:$0xff] }
 0x1ef   :  { %2814 = vmatpush1.bf16.msra.mxu0 %v2813_v58  ;;  %v1207_v1 = vpop.permute.xlu1 %1206 }
 0x1f0   :  { %v1232_v40 = vsel %vm1224_vm5, %v1175_v17, %v1207_v1  ;;  %v1248_v42 = vsel %vm1224_vm5, %v1207_v1, %v1175_v17  ;;  %v1205_v0 = vpop.permute.xlu0 %1204 }
 0x1f1   :  { %v1284_v38 = vmul.f32 %v4710_v52, %v1248_v42  ;;  %v1285_v45 = vmul.f32 %v4713_v21, %v1232_v40  ;;  %v1231_v29 = vsel %vm1224_vm5, %v1173_v27, %v1205_v0  ;;  %v1247_v26 = vsel %vm1224_vm5, %v1205_v0, %v1173_v27  ;;  %2305 = vrot.lane.b32.xlu1 %v2992_v10, %s3012_s2  ;;  %v3002_v27 = vld [vmem:[%s6411_s29 + $0xf8] sm:$0xff] }
 0x1f2   :  { %v1282_v19 = vmul.f32 %v4710_v52, %v1247_v26  ;;  %v1283_v28 = vmul.f32 %v4713_v21, %v1231_v29  ;;  %2303 = vrot.lane.b32.xlu0 %v2993_v7, %s3012_s2 }
 0x1f3   :  { %v2054_v31 = vpop.permute.xlu1 %2053 }
 0x1f4   :  { %v2689_v12 = vpack.c.bf16 %v1284_v38, %v1282_v19  ;;  %v2052_v13 = vpop.permute.xlu0 %2051  ;;  %v2687_v47 = vpack.c.bf16 %v1285_v45, %v1283_v28 }
 0x1f5   :  { %2337 = vrot.lane.b32.xlu1 %v2994_v53, %s3012_s2 }
 0x1f6   :  { %2335 = vrot.lane.b32.xlu0 %v2995_v11, %s3012_s2  ;;  %2688 = vmatprep.subr.bf16.mxu1 %v2687_v47 }
 0x1f7   :  { %2690 = vmatpush1.bf16.msra.mxu1 %v2689_v12  ;;  %v2086_v23 = vpop.permute.xlu1 %2085 }
 0x1f8   :  { %v2111_v37 = vsel %vm2103_vm6, %v2054_v31, %v2086_v23  ;;  %v2127_v16 = vsel %vm2103_vm6, %v2086_v23, %v2054_v31  ;;  %v2084_v33 = vpop.permute.xlu0 %2083 }
 0x1f9   :  { %v2163_v55 = vmul.f32 %v4752_v41, %v2111_v37  ;;  %v2164_v4 = vmul.f32 %v4755_v18, %v2127_v16  ;;  %v2110_v51 = vsel %vm2103_vm6, %v2052_v13, %v2084_v33  ;;  %v2126_v9 = vsel %vm2103_vm6, %v2084_v33, %v2052_v13  ;;  %2309 = vrot.lane.b32.xlu1 %v2996_v56, %s3012_s2 }
 0x1fa   :  { %v2161_v57 = vmul.f32 %v4752_v41, %v2110_v51  ;;  %v2162_v14 = vmul.f32 %v4755_v18, %v2126_v9  ;;  %2307 = vrot.lane.b32.xlu0 %v2997_v30, %s3012_s2 }
 0x1fb   :  { %v1179_v15 = vpop.permute.xlu1 %1178 }
 0x1fc   :  { %v2817_v6 = vpack.c.bf16 %v2163_v55, %v2161_v57  ;;  %v1177_v5 = vpop.permute.xlu0 %1176  ;;  %v2815_v62 = vpack.c.bf16 %v2164_v4, %v2162_v14 }
 0x1fd   :  { %2341 = vrot.lane.b32.xlu1 %v2998_v49, %s3012_s2 }
 0x1fe   :  { %2339 = vrot.lane.b32.xlu0 %v2999_v48, %s3012_s2  ;;  %2816 = vmatprep.subr.bf16.mxu0 %v2815_v62 }
 0x1ff   :  { %2818 = vmatpush1.bf16.msra.mxu0 %v2817_v6  ;;  %v1211_v50 = vpop.permute.xlu1 %1210 }
 0x200   :  { %v1234_v54 = vsel %vm1224_vm5, %v1179_v15, %v1211_v50  ;;  %v1250_v44 = vsel %vm1224_vm5, %v1211_v50, %v1179_v15  ;;  %v1209_v36 = vpop.permute.xlu0 %1208 }
 0x201   :  { %v1288_v22 = vmul.f32 %v4710_v52, %v1250_v44  ;;  %v1289_v60 = vmul.f32 %v4713_v21, %v1234_v54  ;;  %v1233_v25 = vsel %vm1224_vm5, %v1177_v5, %v1209_v36  ;;  %v1249_v2 = vsel %vm1224_vm5, %v1209_v36, %v1177_v5  ;;  %2313 = vrot.lane.b32.xlu1 %v3000_v3, %s3012_s2 }
 0x202   :  { %v1286_v46 = vmul.f32 %v4710_v52, %v1249_v2  ;;  %v1287_v59 = vmul.f32 %v4713_v21, %v1233_v25  ;;  %2311 = vrot.lane.b32.xlu0 %v3001_v8, %s3012_s2 }
 0x203   :  { %v2058_v43 = vpop.permute.xlu1 %2057 }
 0x204   :  { %v2693_v63 = vpack.c.bf16 %v1288_v22, %v1286_v46  ;;  %v2056_v17 = vpop.permute.xlu0 %2055  ;;  %v2691_v58 = vpack.c.bf16 %v1289_v60, %v1287_v59 }
 0x205   :  { %2345 = vrot.lane.b32.xlu1 %v3002_v27, %s3012_s2 }
 0x206   :  { %2343 = vrot.lane.b32.xlu0 %v3003_v61, %s3012_s2  ;;  %2692 = vmatprep.subr.bf16.mxu1 %v2691_v58 }
 0x207   :  { %2694 = vmatpush1.bf16.msra.mxu1 %v2693_v63  ;;  %v2090_v39 = vpop.permute.xlu1 %2089 }
 0x208   :  { %v2113_v20 = vsel %vm2103_vm6, %v2058_v43, %v2090_v39  ;;  %v2129_v1 = vsel %vm2103_vm6, %v2090_v39, %v2058_v43  ;;  %v2088_v40 = vpop.permute.xlu0 %2087 }
 0x209   :  { %v2167_v42 = vmul.f32 %v4752_v41, %v2113_v20  ;;  %v2168_v0 = vmul.f32 %v4755_v18, %v2129_v1  ;;  %v2112_v38 = vsel %vm2103_vm6, %v2056_v17, %v2088_v40  ;;  %v2128_v45 = vsel %vm2103_vm6, %v2088_v40, %v2056_v17 }
 0x20a   :  { %v2165_v29 = vmul.f32 %v4752_v41, %v2112_v38  ;;  %v2166_v26 = vmul.f32 %v4755_v18, %v2128_v45 }
 0x20b   :  { %v1183_v10 = vpop.permute.xlu1 %1182 }
 0x20c   :  { %v2821_v19 = vpack.c.bf16 %v2167_v42, %v2165_v29  ;;  %v1181_v28 = vpop.permute.xlu0 %1180  ;;  %v2819_v7 = vpack.c.bf16 %v2168_v0, %v2166_v26 }
 0x20e   :  { %2820 = vmatprep.subr.bf16.mxu0 %v2819_v7 }
 0x20f   :  { %2822 = vmatpush1.bf16.msra.mxu0 %v2821_v19  ;;  %v1215_v31 = vpop.permute.xlu1 %1214 }
 0x210   :  { %v1236_v12 = vsel %vm1224_vm5, %v1183_v10, %v1215_v31  ;;  %v1252_v13 = vsel %vm1224_vm5, %v1215_v31, %v1183_v10  ;;  %v1213_v47 = vpop.permute.xlu0 %1212 }
 0x211   :  { %v1292_v53 = vmul.f32 %v4710_v52, %v1252_v13  ;;  %v1293_v11 = vmul.f32 %v4713_v21, %v1236_v12  ;;  %v1235_v23 = vsel %vm1224_vm5, %v1181_v28, %v1213_v47  ;;  %v1251_v37 = vsel %vm1224_vm5, %v1213_v47, %v1181_v28 }
 0x212   :  { %v1290_v16 = vmul.f32 %v4710_v52, %v1251_v37  ;;  %v1291_v33 = vmul.f32 %v4713_v21, %v1235_v23 }
 0x213   :  { %v2062_v55 = vpop.permute.xlu1 %2061 }
 0x214   :  { %v2697_v4 = vpack.c.bf16 %v1292_v53, %v1290_v16  ;;  %v2060_v51 = vpop.permute.xlu0 %2059  ;;  %v2695_v9 = vpack.c.bf16 %v1293_v11, %v1291_v33 }
 0x216   :  { %2696 = vmatprep.subr.bf16.mxu1 %v2695_v9 }
 0x217   :  { %2698 = vmatpush1.bf16.msra.mxu1 %v2697_v4  ;;  %v2094_v56 = vpop.permute.xlu1 %2093 }
 0x218   :  { %v2115_v57 = vsel %vm2103_vm6, %v2062_v55, %v2094_v56  ;;  %v2131_v14 = vsel %vm2103_vm6, %v2094_v56, %v2062_v55  ;;  %v2092_v30 = vpop.permute.xlu0 %2091 }
 0x219   :  { %v2171_v15 = vmul.f32 %v4752_v41, %v2115_v57  ;;  %v2172_v6 = vmul.f32 %v4755_v18, %v2131_v14  ;;  %v2114_v5 = vsel %vm2103_vm6, %v2060_v51, %v2092_v30  ;;  %v2130_v62 = vsel %vm2103_vm6, %v2092_v30, %v2060_v51  ;;  %v2550_v57 = vld [vmem:[%s6416_s0 + $0x60] sm:$0xff] }
 0x21a   :  { %v2169_v49 = vmul.f32 %v4752_v41, %v2114_v5  ;;  %v2170_v48 = vmul.f32 %v4755_v18, %v2130_v62 }
 0x21b   :  { %v1187_v50 = vpop.permute.xlu1 %1186 }
 0x21c   :  { %v2825_v54 = vpack.c.bf16 %v2171_v15, %v2169_v49  ;;  %v1185_v44 = vpop.permute.xlu0 %1184  ;;  %v2823_v36 = vpack.c.bf16 %v2172_v6, %v2170_v48  ;;  %v2574_v48 = vld [vmem:[%s6415_s28 + $0x10] sm:$0x3] }
 0x21e   :  { %2824 = vmatprep.subr.bf16.mxu0 %v2823_v36 }
 0x21f   :  { %2826 = vmatpush1.bf16.msra.mxu0 %v2825_v54  ;;  %v1219_v22 = vpop.permute.xlu1 %1218  ;;  %v2551_v54 = vld [vmem:[%s6416_s0 + $0x68] sm:$0xff] }
 0x220   :  { %v1238_v60 = vsel %vm1224_vm5, %v1187_v50, %v1219_v22  ;;  %v1254_v25 = vsel %vm1224_vm5, %v1219_v22, %v1187_v50  ;;  %v1217_v2 = vpop.permute.xlu0 %1216 }
 0x221   :  { %v1296_v3 = vmul.f32 %v4710_v52, %v1254_v25  ;;  %v1297_v46 = vmul.f32 %v4713_v21, %v1238_v60  ;;  %v1237_v59 = vsel %vm1224_vm5, %v1185_v44, %v1217_v2  ;;  %v1253_v8 = vsel %vm1224_vm5, %v1217_v2, %v1185_v44  ;;  %v2552_v25 = vld [vmem:[%s6416_s0 + $0x70] sm:$0xff]  ;;  %v2570_v2 = vld [vmem:[%s6416_s0 + $0xe0] sm:$0xff] }
 0x222   :  { %v1294_v43 = vmul.f32 %v4710_v52, %v1253_v8  ;;  %v1295_v63 = vmul.f32 %v4713_v21, %v1237_v59 }
 0x223   :  { %v2066_v17 = vpop.permute.xlu1 %2065 }
 0x224   :  { %v2701_v58 = vpack.c.bf16 %v1296_v3, %v1294_v43  ;;  %v2064_v27 = vpop.permute.xlu0 %2063  ;;  %v2699_v61 = vpack.c.bf16 %v1297_v46, %v1295_v63 }
 0x226   :  { %2700 = vmatprep.subr.bf16.mxu1 %v2699_v61  ;;  %v2571_v61 = vld [vmem:[%s6416_s0 + $0xe8] sm:$0xff] }
 0x227   :  { %2702 = vmatpush1.bf16.msra.mxu1 %v2701_v58  ;;  %v2098_v39 = vpop.permute.xlu1 %2097 }
 0x228   :  { %v2117_v20 = vsel %vm2103_vm6, %v2066_v17, %v2098_v39  ;;  %v2133_v1 = vsel %vm2103_vm6, %v2098_v39, %v2066_v17  ;;  %v2096_v40 = vpop.permute.xlu0 %2095 }
 0x229   :  { %v2175_v42 = vmul.f32 %v4752_v41, %v2117_v20  ;;  %v2176_v0 = vmul.f32 %v4755_v18, %v2133_v1  ;;  %v2116_v38 = vsel %vm2103_vm6, %v2064_v27, %v2096_v40  ;;  %v2132_v45 = vsel %vm2103_vm6, %v2096_v40, %v2064_v27  ;;  %v2553_v27 = vld [vmem:[%s6416_s0 + $0x78] sm:$0xff] }
 0x22a   :  { %v2173_v29 = vmul.f32 %v4752_v41, %v2116_v38  ;;  %v2174_v26 = vmul.f32 %v4755_v18, %v2132_v45 }
 0x22b   :  { %v1191_v10 = vpop.permute.xlu1 %1190 }
 0x22c   :  { %v2829_v19 = vpack.c.bf16 %v2175_v42, %v2173_v29  ;;  %v1189_v28 = vpop.permute.xlu0 %1188  ;;  %v2827_v7 = vpack.c.bf16 %v2176_v0, %v2174_v26  ;;  %v2572_v42 = vld [vmem:[%s6416_s0 + $0xf0] sm:$0xff] }
 0x22e   :  { %2828 = vmatprep.subr.bf16.mxu0 %v2827_v7 }
 0x22f   :  { %2830 = vmatpush1.bf16.msra.mxu0 %v2829_v19  ;;  %v1223_v31 = vpop.permute.xlu1 %1222 }
 0x230   :  { %v1240_v12 = vsel %vm1224_vm5, %v1191_v10, %v1223_v31  ;;  %v1256_v13 = vsel %vm1224_vm5, %v1223_v31, %v1191_v10  ;;  %v1221_v47 = vpop.permute.xlu0 %1220 }
 0x231   :  { %v1300_v53 = vmul.f32 %v4710_v52, %v1256_v13  ;;  %v1301_v11 = vmul.f32 %v4713_v21, %v1240_v12  ;;  %v1239_v23 = vsel %vm1224_vm5, %v1189_v28, %v1221_v47  ;;  %v1255_v37 = vsel %vm1224_vm5, %v1221_v47, %v1189_v28  ;;  %v2573_v12 = vld [vmem:[%s6416_s0 + $0xf8] sm:$0xff] }
 0x232   :  { %v1298_v16 = vmul.f32 %v4710_v52, %v1255_v37  ;;  %v1299_v33 = vmul.f32 %v4713_v21, %v1239_v23 }
 0x233   :  { %v2070_v55 = vpop.permute.xlu1 %2069 }
 0x234   :  { %v2705_v4 = vpack.c.bf16 %v1300_v53, %v1298_v16  ;;  %v2068_v51 = vpop.permute.xlu0 %2067  ;;  %v2703_v9 = vpack.c.bf16 %v1301_v11, %v1299_v33 }
 0x236   :  { %2704 = vmatprep.subr.bf16.mxu1 %v2703_v9 }
 0x237   :  { %2706 = vmatpush1.bf16.msra.mxu1 %v2705_v4  ;;  %v2102_v56 = vpop.permute.xlu1 %2101 }
 0x238   :  { %v2119_v14 = vsel %vm2103_vm6, %v2070_v55, %v2102_v56  ;;  %v2135_v30 = vsel %vm2103_vm6, %v2102_v56, %v2070_v55  ;;  %v2100_v52 = vpop.permute.xlu0 %2099 }
 0x239   :  { %v2179_v21 = vmul.f32 %v4752_v41, %v2119_v14  ;;  %v2180_v15 = vmul.f32 %v4755_v18, %v2135_v30  ;;  %v2118_v6 = vsel %vm2103_vm6, %v2068_v51, %v2100_v52  ;;  %v2134_v5 = vsel %vm2103_vm6, %v2100_v52, %v2068_v51 }
 0x23a   :  { %v2177_v62 = vmul.f32 %v4752_v41, %v2118_v6  ;;  %v2178_v49 = vmul.f32 %v4755_v18, %v2134_v5  ;;  %1372 = vmatmul.mubr.f32.vlgmr.msra.gmra.mrb[0].mxu1 %v2550_v57  ;;  %v5060_v41 = vrot.slane %v2574_v48, %v3359_v35  ;;  %v5063_v18 = vrot.slane %v2574_v48, %v3357_v34 }
 0x23b   :  { %v2286_v50 = vpop.permute.xlu1 %2285  ;;  %1377 = vmatprep.mubr.f32.mxu1 %v6426_v24 }
 0x23c   :  { %v2833_v44 = vpack.c.bf16 %v2179_v21, %v2177_v62  ;;  %v2284_v36 = vpop.permute.xlu0 %2283  ;;  %v2831_v22 = vpack.c.bf16 %v2180_v15, %v2178_v49 }
 0x23e   :  { %1378 = vmatmul.mubr.f32.gmra.mrb[2].mxu1 %v2551_v54  ;;  %2832 = vmatprep.subr.bf16.mxu0 %v2831_v22 }
 0x23f   :  { %2834 = vmatpush1.bf16.msra.mxu0 %v2833_v44  ;;  %v2318_v60 = vpop.permute.xlu1 %2317  ;;  %1383 = vmatprep.mubr.f32.mxu1 %v6426_v24 }
 0x240   :  { %v2349_v35 = vsel %vm2347_vm7, %v2286_v50, %v2318_v60  ;;  %v2365_v34 = vsel %vm2347_vm7, %v2318_v60, %v2286_v50  ;;  %v2316_v3 = vpop.permute.xlu0 %2315 }
 0x241   :  { %v2395_v46 = vmul.f32 %v5060_v41, %v2349_v35  ;;  %v2396_v59 = vmul.f32 %v5063_v18, %v2365_v34  ;;  %v2348_v8 = vsel %vm2347_vm7, %v2284_v36, %v2316_v3  ;;  %v2364_v43 = vsel %vm2347_vm7, %v2316_v3, %v2284_v36 }
 0x242   :  { %v2393_v63 = vmul.f32 %v5060_v41, %v2348_v8  ;;  %v2394_v17 = vmul.f32 %v5063_v18, %v2364_v43  ;;  %1384 = vmatmul.mubr.f32.gmra.mrb[4].mxu1 %v2552_v25  ;;  %2251 = vmatmul.mubr.f32.vlgmr.msra.gmra.mrb[0].mxu0 %v2570_v2 }
 0x243   :  { %v2290_v58 = vpop.permute.xlu1 %2289  ;;  %1389 = vmatprep.mubr.f32.mxu1 %v6426_v24  ;;  %2256 = vmatprep.mubr.f32.mxu0 %v6426_v24 }
 0x244   :  { %v2837_v39 = vpack.c.bf16 %v2395_v46, %v2393_v63  ;;  %v2288_v20 = vpop.permute.xlu0 %2287  ;;  %v2835_v1 = vpack.c.bf16 %v2396_v59, %v2394_v17 }
 0x246   :  { %1390 = vmatmul.mubr.f32.gmra.mrb[6].mxu1 %v2553_v27  ;;  %2257 = vmatmul.mubr.f32.gmra.mrb[2].mxu0 %v2571_v61 }
 0x247   :  { %2836 = vmatprep.subr.bf16.mxu0 %v2835_v1  ;;  %2867 = vmatprep.subr.bf16.mxu1 %v2835_v1  ;;  %v2322_v40 = vpop.permute.xlu1 %2321 }
 0x248   :  { %2838 = vmatpush1.bf16.msra.mxu0 %v2837_v39  ;;  %2875 = vmatpush1.bf16.msra.mxu1 %v2837_v39  ;;  %v2351_v0 = vsel %vm2347_vm7, %v2290_v58, %v2322_v40  ;;  %v2367_v38 = vsel %vm2347_vm7, %v2322_v40, %v2290_v58  ;;  %v2320_v45 = vpop.permute.xlu0 %2319 }
 0x249   :  { %v2399_v29 = vmul.f32 %v5060_v41, %v2351_v0  ;;  %v2400_v26 = vmul.f32 %v5063_v18, %v2367_v38  ;;  %v2350_v10 = vsel %vm2347_vm7, %v2288_v20, %v2320_v45  ;;  %v2366_v19 = vsel %vm2347_vm7, %v2320_v45, %v2288_v20  ;;  %2262 = vmatprep.mubr.f32.mxu0 %v6426_v24 }
 0x24a   :  { %v2397_v28 = vmul.f32 %v5060_v41, %v2350_v10  ;;  %v2398_v7 = vmul.f32 %v5063_v18, %v2366_v19  ;;  %2263 = vmatmul.mubr.f32.gmra.mrb[4].mxu0 %v2572_v42  ;;  %2506 = vmatprep.mubr.f32.mxu1 %v6426_v24 }
 0x24b   :  { %v2294_v31 = vpop.permute.xlu1 %2293  ;;  %2268 = vmatprep.mubr.f32.mxu0 %v6426_v24 }
 0x24c   :  { %v2841_v13 = vpack.c.bf16 %v2399_v29, %v2397_v28  ;;  %v2292_v47 = vpop.permute.xlu0 %2291  ;;  %v2839_v53 = vpack.c.bf16 %v2400_v26, %v2398_v7 }
 0x24e   :  { %2269 = vmatmul.mubr.f32.gmra.mrb[6].mxu0 %v2573_v12  ;;  %2840 = vmatprep.subr.bf16.mxu0 %v2839_v53 }
 0x24f   :  { %2868 = vmatprep.subr.bf16.mxu1 %v2839_v53  ;;  %2842 = vmatpush1.bf16.msra.mxu0 %v2841_v13  ;;  %v2326_v11 = vpop.permute.xlu1 %2325 }
 0x250   :  { %2876 = vmatpush1.bf16.msra.mxu1 %v2841_v13  ;;  %v2353_v23 = vsel %vm2347_vm7, %v2294_v31, %v2326_v11  ;;  %v2369_v37 = vsel %vm2347_vm7, %v2326_v11, %v2294_v31  ;;  %v2324_v16 = vpop.permute.xlu0 %2323  ;;  %2494 = vmatprep.mubr.f32.mxu0 %v6426_v24 }
 0x251   :  { %v2403_v33 = vmul.f32 %v5060_v41, %v2353_v23  ;;  %v2404_v55 = vmul.f32 %v5063_v18, %v2369_v37  ;;  %v2352_v4 = vsel %vm2347_vm7, %v2292_v47, %v2324_v16  ;;  %v2368_v51 = vsel %vm2347_vm7, %v2324_v16, %v2292_v47 }
 0x252   :  { %v2401_v9 = vmul.f32 %v5060_v41, %v2352_v4  ;;  %v2402_v56 = vmul.f32 %v5063_v18, %v2368_v51 }
 0x253   :  { %v2298_v57 = vpop.permute.xlu1 %2297 }
 0x254   :  { %v2845_v14 = vpack.c.bf16 %v2403_v33, %v2401_v9  ;;  %v2296_v30 = vpop.permute.xlu0 %2295  ;;  %v2843_v52 = vpack.c.bf16 %v2404_v55, %v2402_v56 }
 0x256   :  { %2844 = vmatprep.subr.bf16.mxu0 %v2843_v52  ;;  %2869 = vmatprep.subr.bf16.mxu1 %v2843_v52 }
 0x257   :  { %2846 = vmatpush1.bf16.msra.mxu0 %v2845_v14  ;;  %2877 = vmatpush1.bf16.msra.mxu1 %v2845_v14  ;;  %v2330_v21 = vpop.permute.xlu1 %2329 }
 0x258   :  { %v2355_v15 = vsel %vm2347_vm7, %v2298_v57, %v2330_v21  ;;  %v2371_v6 = vsel %vm2347_vm7, %v2330_v21, %v2298_v57  ;;  %v2328_v5 = vpop.permute.xlu0 %2327 }
 0x259   :  { %v2407_v62 = vmul.f32 %v5060_v41, %v2355_v15  ;;  %v2408_v49 = vmul.f32 %v5063_v18, %v2371_v6  ;;  %v2354_v48 = vsel %vm2347_vm7, %v2296_v30, %v2328_v5  ;;  %v2370_v50 = vsel %vm2347_vm7, %v2328_v5, %v2296_v30 }
 0x25a   :  { %v2405_v54 = vmul.f32 %v5060_v41, %v2354_v48  ;;  %v2406_v44 = vmul.f32 %v5063_v18, %v2370_v50 }
 0x25b   :  { %v2302_v36 = vpop.permute.xlu1 %2301 }
 0x25c   :  { %v2849_v22 = vpack.c.bf16 %v2407_v62, %v2405_v54  ;;  %v2300_v60 = vpop.permute.xlu0 %2299  ;;  %v2847_v25 = vpack.c.bf16 %v2408_v49, %v2406_v44  ;;  %v2575_v54 = vld [vmem:[%s6416_s0 + $0x100] sm:$0xff]  ;;  %v2577_v44 = vld [vmem:[%s6416_s0 + $0x110] sm:$0xff] }
 0x25e   :  { %2848 = vmatprep.subr.bf16.mxu0 %v2847_v25  ;;  %2870 = vmatprep.subr.bf16.mxu1 %v2847_v25  ;;  %v64_v25 = vld [vmem:[%s6375_s3 + $0x28] sm:$0xff] }
 0x25f   :  { %2850 = vmatpush1.bf16.msra.mxu0 %v2849_v22  ;;  %2878 = vmatpush1.bf16.msra.mxu1 %v2849_v22  ;;  %v2334_v2 = vpop.permute.xlu1 %2333  ;;  %v62_v22 = vld [vmem:[%s6375_s3 + $0x18] sm:$0xff]  ;;  %129 = vst.msk [vmem:[%s6376_s18 + $0x28] sm:$0xff] %vm124_vm8, %v64_v25  ;;  %v193_v25 = vld [vmem:[%s6377_s4 + $0x28] sm:$0xff] }
 0x260   :  { %v2357_v35 = vsel %vm2347_vm7, %v2302_v36, %v2334_v2  ;;  %v2373_v34 = vsel %vm2347_vm7, %v2334_v2, %v2302_v36  ;;  %v2332_v3 = vpop.permute.xlu0 %2331  ;;  %v60_v36 = vld [vmem:[%s6375_s3 + $0x8] sm:$0xff]  ;;  %v65_v2 = vld [vmem:[%s6375_s3 + $0x30] sm:$0xff]  ;;  %127 = vst.msk [vmem:[%s6376_s18 + $0x18] sm:$0xff] %vm124_vm8, %v62_v22  ;;  %v191_v22 = vld [vmem:[%s6377_s4 + $0x18] sm:$0xff] }
 0x261   :  { %v2411_v46 = vmul.f32 %v5060_v41, %v2357_v35  ;;  %v2412_v59 = vmul.f32 %v5063_v18, %v2373_v34  ;;  %v2356_v8 = vsel %vm2347_vm7, %v2300_v60, %v2332_v3  ;;  %v2372_v43 = vsel %vm2347_vm7, %v2332_v3, %v2300_v60  ;;  %v63_v60 = vld [vmem:[%s6375_s3 + $0x20] sm:$0xff]  ;;  %125 = vst.msk [vmem:[%s6376_s18 + $0x8] sm:$0xff] %vm124_vm8, %v60_v36  ;;  %v66_v35 = vld [vmem:[%s6375_s3 + $0x38] sm:$0xff]  ;;  %v68_v3 = vld [vmem:[%s6375_s3 + $0x48] sm:$0xff] }
 0x262   :  { %v2409_v63 = vmul.f32 %v5060_v41, %v2356_v8  ;;  %v2410_v17 = vmul.f32 %v5063_v18, %v2372_v43  ;;  %v67_v34 = vld [vmem:[%s6375_s3 + $0x40] sm:$0xff]  ;;  %128 = vst [vmem:[%s6376_s18 + $0x20] sm:$0xff] %v63_v60  ;;  %130 = vst [vmem:[%s6376_s18 + $0x30] sm:$0xff] %v65_v2  ;;  %v72_v43 = vld [vmem:[%s6375_s3 + $0x68] sm:$0xff] }
 0x263   :  { %v2306_v58 = vpop.permute.xlu1 %2305  ;;  %131 = vst.msk [vmem:[%s6376_s18 + $0x38] sm:$0xff] %vm124_vm8, %v66_v35  ;;  %132 = vst [vmem:[%s6376_s18 + $0x40] sm:$0xff] %v67_v34  ;;  %v71_v8 = vld [vmem:[%s6375_s3 + $0x60] sm:$0xff]  ;;  %v189_v36 = vld [vmem:[%s6377_s4 + $0x8] sm:$0xff] }
 0x264   :  { %v2853_v27 = vpack.c.bf16 %v2411_v46, %v2409_v63  ;;  %v2304_v61 = vpop.permute.xlu0 %2303  ;;  %v2851_v39 = vpack.c.bf16 %v2412_v59, %v2410_v17  ;;  %v69_v46 = vld [vmem:[%s6375_s3 + $0x50] sm:$0xff]  ;;  %v70_v59 = vld [vmem:[%s6375_s3 + $0x58] sm:$0xff]  ;;  %133 = vst.msk [vmem:[%s6376_s18 + $0x48] sm:$0xff] %vm124_vm8, %v68_v3  ;;  %136 = vst [vmem:[%s6376_s18 + $0x60] sm:$0xff] %v71_v8 }
 0x265   :  { %v73_v63 = vld [vmem:[%s6375_s3 + $0x70] sm:$0xff]  ;;  %134 = vst [vmem:[%s6376_s18 + $0x50] sm:$0xff] %v69_v46  ;;  %135 = vst.msk [vmem:[%s6376_s18 + $0x58] sm:$0xff] %vm124_vm8, %v70_v59  ;;  %v74_v17 = vld [vmem:[%s6375_s3 + $0x78] sm:$0xff] }
 0x266   :  { %2852 = vmatprep.subr.bf16.mxu0 %v2851_v39  ;;  %2871 = vmatprep.subr.bf16.mxu1 %v2851_v39  ;;  %137 = vst.msk [vmem:[%s6376_s18 + $0x68] sm:$0xff] %vm124_vm8, %v72_v43  ;;  %138 = vst [vmem:[%s6376_s18 + $0x70] sm:$0xff] %v73_v63  ;;  %v78_v39 = vld [vmem:[%s6375_s3 + $0x98] sm:$0xff]  ;;  %v192_v60 = vld [vmem:[%s6377_s4 + $0x20] sm:$0xff] }
 0x267   :  { %2854 = vmatpush1.bf16.msra.mxu0 %v2853_v27  ;;  %2879 = vmatpush1.bf16.msra.mxu1 %v2853_v27  ;;  %v2338_v20 = vpop.permute.xlu1 %2337  ;;  %v76_v27 = vld [vmem:[%s6375_s3 + $0x88] sm:$0xff]  ;;  %139 = vst.msk [vmem:[%s6376_s18 + $0x78] sm:$0xff] %vm124_vm8, %v74_v17  ;;  %143 = vst.msk [vmem:[%s6376_s18 + $0x98] sm:$0xff] %vm124_vm8, %v78_v39  ;;  %v194_v2 = vld [vmem:[%s6377_s4 + $0x30] sm:$0xff] }
 0x268   :  { %v2359_v1 = vsel %vm2347_vm7, %v2306_v58, %v2338_v20  ;;  %v2375_v40 = vsel %vm2347_vm7, %v2338_v20, %v2306_v58  ;;  %v2336_v42 = vpop.permute.xlu0 %2335  ;;  %v75_v58 = vld [vmem:[%s6375_s3 + $0x80] sm:$0xff]  ;;  %141 = vst.msk [vmem:[%s6376_s18 + $0x88] sm:$0xff] %vm124_vm8, %v76_v27  ;;  %197 = vst.msk [vmem:[%s6376_s18 + $0x208] sm:$0xff] %vm124_vm8, %v189_v36  ;;  %v195_v35 = vld [vmem:[%s6377_s4 + $0x38] sm:$0xff] }
 0x269   :  { %v2415_v0 = vmul.f32 %v5060_v41, %v2359_v1  ;;  %v2416_v38 = vmul.f32 %v5063_v18, %v2375_v40  ;;  %v2358_v45 = vsel %vm2347_vm7, %v2304_v61, %v2336_v42  ;;  %v2374_v29 = vsel %vm2347_vm7, %v2336_v42, %v2304_v61  ;;  %v77_v61 = vld [vmem:[%s6375_s3 + $0x90] sm:$0xff]  ;;  %v79_v20 = vld [vmem:[%s6375_s3 + $0xa0] sm:$0xff]  ;;  %140 = vst [vmem:[%s6376_s18 + $0x80] sm:$0xff] %v75_v58  ;;  %v80_v1 = vld [vmem:[%s6375_s3 + $0xa8] sm:$0xff] }
 0x26a   :  { %v2413_v26 = vmul.f32 %v5060_v41, %v2358_v45  ;;  %v2414_v10 = vmul.f32 %v5063_v18, %v2374_v29  ;;  %v81_v40 = vld [vmem:[%s6375_s3 + $0xb0] sm:$0xff]  ;;  %v82_v42 = vld [vmem:[%s6375_s3 + $0xb8] sm:$0xff]  ;;  %142 = vst [vmem:[%s6376_s18 + $0x90] sm:$0xff] %v77_v61  ;;  %144 = vst [vmem:[%s6376_s18 + $0xa0] sm:$0xff] %v79_v20 }
 0x26b   :  { %v2310_v19 = vpop.permute.xlu1 %2309  ;;  %v85_v45 = vld [vmem:[%s6375_s3 + $0xd0] sm:$0xff]  ;;  %145 = vst.msk [vmem:[%s6376_s18 + $0xa8] sm:$0xff] %vm124_vm8, %v80_v1  ;;  %146 = vst [vmem:[%s6376_s18 + $0xb0] sm:$0xff] %v81_v40  ;;  %v86_v29 = vld [vmem:[%s6375_s3 + $0xd8] sm:$0xff] }
 0x26c   :  { %v2857_v28 = vpack.c.bf16 %v2415_v0, %v2413_v26  ;;  %v2308_v7 = vpop.permute.xlu0 %2307  ;;  %v2855_v31 = vpack.c.bf16 %v2416_v38, %v2414_v10  ;;  %v83_v0 = vld [vmem:[%s6375_s3 + $0xc0] sm:$0xff]  ;;  %v84_v38 = vld [vmem:[%s6375_s3 + $0xc8] sm:$0xff]  ;;  %147 = vst.msk [vmem:[%s6376_s18 + $0xb8] sm:$0xff] %vm124_vm8, %v82_v42  ;;  %150 = vst [vmem:[%s6376_s18 + $0xd0] sm:$0xff] %v85_v45 }
 0x26d   :  { %v87_v26 = vld [vmem:[%s6375_s3 + $0xe0] sm:$0xff]  ;;  %v88_v10 = vld [vmem:[%s6375_s3 + $0xe8] sm:$0xff]  ;;  %148 = vst [vmem:[%s6376_s18 + $0xc0] sm:$0xff] %v83_v0  ;;  %149 = vst.msk [vmem:[%s6376_s18 + $0xc8] sm:$0xff] %vm124_vm8, %v84_v38 }
 0x26e   :  { %2856 = vmatprep.subr.bf16.mxu0 %v2855_v31  ;;  %2872 = vmatprep.subr.bf16.mxu1 %v2855_v31  ;;  %151 = vst.msk [vmem:[%s6376_s18 + $0xd8] sm:$0xff] %vm124_vm8, %v86_v29  ;;  %152 = vst [vmem:[%s6376_s18 + $0xe0] sm:$0xff] %v87_v26  ;;  %v92_v31 = vld [vmem:[%s6375_s3 + $0x108] sm:$0xff]  ;;  %v204_v34 = vld [vmem:[%s6378_s5] sm:$0xff] }
 0x26f   :  { %2858 = vmatpush1.bf16.msra.mxu0 %v2857_v28  ;;  %2880 = vmatpush1.bf16.msra.mxu1 %v2857_v28  ;;  %v2342_v12 = vpop.permute.xlu1 %2341  ;;  %v90_v28 = vld [vmem:[%s6375_s3 + $0xf8] sm:$0xff]  ;;  %153 = vst.msk [vmem:[%s6376_s18 + $0xe8] sm:$0xff] %vm124_vm8, %v88_v10  ;;  %157 = vst.msk [vmem:[%s6376_s18 + $0x108] sm:$0xff] %vm124_vm8, %v92_v31  ;;  %v205_v3 = vld [vmem:[%s6378_s5 + $0x8] sm:$0xff] }
 0x270   :  { %v2361_v13 = vsel %vm2347_vm7, %v2310_v19, %v2342_v12  ;;  %v2377_v47 = vsel %vm2347_vm7, %v2342_v12, %v2310_v19  ;;  %v2340_v53 = vpop.permute.xlu0 %2339  ;;  %v89_v19 = vld [vmem:[%s6375_s3 + $0xf0] sm:$0xff]  ;;  %155 = vst.msk [vmem:[%s6376_s18 + $0xf8] sm:$0xff] %vm124_vm8, %v90_v28  ;;  %199 = vst.msk [vmem:[%s6376_s18 + $0x218] sm:$0xff] %vm124_vm8, %v191_v22  ;;  %v207_v59 = vld [vmem:[%s6378_s5 + $0x18] sm:$0xff] }
 0x271   :  { %v2419_v11 = vmul.f32 %v5060_v41, %v2361_v13  ;;  %v2420_v23 = vmul.f32 %v5063_v18, %v2377_v47  ;;  %v2360_v37 = vsel %vm2347_vm7, %v2308_v7, %v2340_v53  ;;  %v2376_v16 = vsel %vm2347_vm7, %v2340_v53, %v2308_v7  ;;  %v91_v7 = vld [vmem:[%s6375_s3 + $0x100] sm:$0xff]  ;;  %v93_v12 = vld [vmem:[%s6375_s3 + $0x110] sm:$0xff]  ;;  %v94_v13 = vld [vmem:[%s6375_s3 + $0x118] sm:$0xff]  ;;  %154 = vst [vmem:[%s6376_s18 + $0xf0] sm:$0xff] %v89_v19 }
 0x272   :  { %v2417_v33 = vmul.f32 %v5060_v41, %v2360_v37  ;;  %v2418_v55 = vmul.f32 %v5063_v18, %v2376_v16  ;;  %156 = vst [vmem:[%s6376_s18 + $0x100] sm:$0xff] %v91_v7  ;;  %v95_v47 = vld [vmem:[%s6375_s3 + $0x120] sm:$0xff]  ;;  %v96_v53 = vld [vmem:[%s6375_s3 + $0x128] sm:$0xff]  ;;  %158 = vst [vmem:[%s6376_s18 + $0x110] sm:$0xff] %v93_v12 }
 0x273   :  { %v2314_v4 = vpop.permute.xlu1 %2313  ;;  %159 = vst.msk [vmem:[%s6376_s18 + $0x118] sm:$0xff] %vm124_vm8, %v94_v13  ;;  %v99_v37 = vld [vmem:[%s6375_s3 + $0x140] sm:$0xff]  ;;  %v100_v16 = vld [vmem:[%s6375_s3 + $0x148] sm:$0xff]  ;;  %160 = vst [vmem:[%s6376_s18 + $0x120] sm:$0xff] %v95_v47 }
 0x274   :  { %v2861_v51 = vpack.c.bf16 %v2419_v11, %v2417_v33  ;;  %v2312_v9 = vpop.permute.xlu0 %2311  ;;  %v2859_v56 = vpack.c.bf16 %v2420_v23, %v2418_v55  ;;  %v97_v11 = vld [vmem:[%s6375_s3 + $0x130] sm:$0xff]  ;;  %v98_v23 = vld [vmem:[%s6375_s3 + $0x138] sm:$0xff]  ;;  %161 = vst.msk [vmem:[%s6376_s18 + $0x128] sm:$0xff] %vm124_vm8, %v96_v53  ;;  %164 = vst [vmem:[%s6376_s18 + $0x140] sm:$0xff] %v99_v37 }
 0x275   :  { %162 = vst [vmem:[%s6376_s18 + $0x130] sm:$0xff] %v97_v11  ;;  %v101_v33 = vld [vmem:[%s6375_s3 + $0x150] sm:$0xff]  ;;  %v102_v55 = vld [vmem:[%s6375_s3 + $0x158] sm:$0xff]  ;;  %163 = vst.msk [vmem:[%s6376_s18 + $0x138] sm:$0xff] %vm124_vm8, %v98_v23 }
 0x276   :  { %2860 = vmatprep.subr.bf16.mxu0 %v2859_v56  ;;  %2873 = vmatprep.subr.bf16.mxu1 %v2859_v56  ;;  %165 = vst.msk [vmem:[%s6376_s18 + $0x148] sm:$0xff] %vm124_vm8, %v100_v16  ;;  %v106_v56 = vld [vmem:[%s6375_s3 + $0x178] sm:$0xff]  ;;  %166 = vst [vmem:[%s6376_s18 + $0x150] sm:$0xff] %v101_v33  ;;  %v206_v46 = vld [vmem:[%s6378_s5 + $0x10] sm:$0xff] }
 0x277   :  { %2862 = vmatpush1.bf16.msra.mxu0 %v2861_v51  ;;  %2881 = vmatpush1.bf16.msra.mxu1 %v2861_v51  ;;  %v2346_v57 = vpop.permute.xlu1 %2345  ;;  %v104_v51 = vld [vmem:[%s6375_s3 + $0x168] sm:$0xff]  ;;  %167 = vst.msk [vmem:[%s6376_s18 + $0x158] sm:$0xff] %vm124_vm8, %v102_v55  ;;  %171 = vst.msk [vmem:[%s6376_s18 + $0x178] sm:$0xff] %vm124_vm8, %v106_v56  ;;  %v208_v8 = vld [vmem:[%s6378_s5 + $0x20] sm:$0xff] }
 0x278   :  { %v2363_v14 = vsel %vm2347_vm7, %v2314_v4, %v2346_v57  ;;  %v2379_v30 = vsel %vm2347_vm7, %v2346_v57, %v2314_v4  ;;  %v2344_v52 = vpop.permute.xlu0 %2343  ;;  %v103_v4 = vld [vmem:[%s6375_s3 + $0x160] sm:$0xff]  ;;  %169 = vst.msk [vmem:[%s6376_s18 + $0x168] sm:$0xff] %vm124_vm8, %v104_v51  ;;  %200 = vst [vmem:[%s6376_s18 + $0x220] sm:$0xff] %v192_v60  ;;  %v209_v43 = vld [vmem:[%s6378_s5 + $0x28] sm:$0xff] }
 0x279   :  { %v2423_v21 = vmul.f32 %v5060_v41, %v2363_v14  ;;  %v2424_v15 = vmul.f32 %v5063_v18, %v2379_v30  ;;  %v2362_v6 = vsel %vm2347_vm7, %v2312_v9, %v2344_v52  ;;  %v2378_v5 = vsel %vm2347_vm7, %v2344_v52, %v2312_v9  ;;  %v105_v9 = vld [vmem:[%s6375_s3 + $0x170] sm:$0xff]  ;;  %168 = vst [vmem:[%s6376_s18 + $0x160] sm:$0xff] %v103_v4  ;;  %v107_v57 = vld [vmem:[%s6375_s3 + $0x180] sm:$0xff]  ;;  %v108_v14 = vld [vmem:[%s6375_s3 + $0x188] sm:$0xff] }
 0x27a   :  { %v2421_v62 = vmul.f32 %v5060_v41, %v2362_v6  ;;  %v2422_v49 = vmul.f32 %v5063_v18, %v2378_v5  ;;  %v2578_v41 = vld [vmem:[%s6416_s0 + $0x118] sm:$0xff]  ;;  %v59_v18 = vld [vmem:[%s6375_s3] sm:$0xff]  ;;  %v109_v30 = vld [vmem:[%s6375_s3 + $0x190] sm:$0xff]  ;;  %170 = vst [vmem:[%s6376_s18 + $0x170] sm:$0xff] %v105_v9 }
 0x27b   :  { %123 = vst [vmem:[%s6376_s18] sm:$0xff] %v59_v18  ;;  %v110_v52 = vld [vmem:[%s6375_s3 + $0x198] sm:$0xff]  ;;  %172 = vst [vmem:[%s6376_s18 + $0x180] sm:$0xff] %v107_v57  ;;  %v113_v6 = vld [vmem:[%s6375_s3 + $0x1b0] sm:$0xff] }
 0x27c   :  { %v2865_v48 = vpack.c.bf16 %v2423_v21, %v2421_v62  ;;  %v2863_v50 = vpack.c.bf16 %v2424_v15, %v2422_v49  ;;  %v111_v21 = vld [vmem:[%s6375_s3 + $0x1a0] sm:$0xff]  ;;  %v112_v15 = vld [vmem:[%s6375_s3 + $0x1a8] sm:$0xff]  ;;  %173 = vst.msk [vmem:[%s6376_s18 + $0x188] sm:$0xff] %vm124_vm8, %v108_v14  ;;  %174 = vst [vmem:[%s6376_s18 + $0x190] sm:$0xff] %v109_v30 }
 0x27d   :  { %v114_v5 = vld [vmem:[%s6375_s3 + $0x1b8] sm:$0xff]  ;;  %v115_v62 = vld [vmem:[%s6375_s3 + $0x1c0] sm:$0xff]  ;;  %175 = vst.msk [vmem:[%s6376_s18 + $0x198] sm:$0xff] %vm124_vm8, %v110_v52  ;;  %176 = vst [vmem:[%s6376_s18 + $0x1a0] sm:$0xff] %v111_v21 }
 0x27e   :  { %2864 = vmatprep.subr.bf16.mxu0 %v2863_v50  ;;  %2874 = vmatprep.subr.bf16.mxu1 %v2863_v50  ;;  %177 = vst.msk [vmem:[%s6376_s18 + $0x1a8] sm:$0xff] %vm124_vm8, %v112_v15  ;;  %v116_v49 = vld [vmem:[%s6375_s3 + $0x1c8] sm:$0xff]  ;;  %v118_v50 = vld [vmem:[%s6375_s3 + $0x1d8] sm:$0xff]  ;;  %178 = vst [vmem:[%s6376_s18 + $0x1b0] sm:$0xff] %v113_v6 }
 0x27f   :  { %2866 = vmatpush1.bf16.msra.mxu0 %v2865_v48  ;;  %2882 = vmatpush1.bf16.msra.mxu1 %v2865_v48  ;;  %v117_v48 = vld [vmem:[%s6375_s3 + $0x1d0] sm:$0xff]  ;;  %179 = vst.msk [vmem:[%s6376_s18 + $0x1b8] sm:$0xff] %vm124_vm8, %v114_v5  ;;  %180 = vst [vmem:[%s6376_s18 + $0x1c0] sm:$0xff] %v115_v62  ;;  %v188_v18 = vld [vmem:[%s6377_s4] sm:$0xff] }
 0x280   :  { %181 = vst.msk [vmem:[%s6376_s18 + $0x1c8] sm:$0xff] %vm124_vm8, %v116_v49  ;;  %182 = vst [vmem:[%s6376_s18 + $0x1d0] sm:$0xff] %v117_v48  ;;  %v210_v63 = vld [vmem:[%s6378_s5 + $0x30] sm:$0xff]  ;;  %v211_v17 = vld [vmem:[%s6378_s5 + $0x38] sm:$0xff] }
 0x281   :  { %183 = vst.msk [vmem:[%s6376_s18 + $0x1d8] sm:$0xff] %vm124_vm8, %v118_v50  ;;  %196 = vst [vmem:[%s6376_s18 + $0x200] sm:$0xff] %v188_v18  ;;  %v220_v58 = vld [vmem:[%s6379_s6] sm:$0xff]  ;;  %v221_v27 = vld [vmem:[%s6379_s6 + $0x8] sm:$0xff] }
 0x282   :  { %2495 = vmatmul.mubr.f32.vlgmr.msra.gmra.mrb[0].mxu0 %v2575_v54  ;;  %2507 = vmatmul.mubr.f32.vlgmr.msra.gmra.mrb[8].mxu1 %v2577_v44  ;;  %v119_v54 = vld [vmem:[%s6375_s3 + $0x1e0] sm:$0xff]  ;;  %v120_v44 = vld [vmem:[%s6375_s3 + $0x1e8] sm:$0xff]  ;;  %201 = vst.msk [vmem:[%s6376_s18 + $0x228] sm:$0xff] %vm124_vm8, %v193_v25  ;;  %202 = vst [vmem:[%s6376_s18 + $0x230] sm:$0xff] %v194_v2 }
 0x283   :  { %2500 = vmatprep.mubr.f32.mxu0 %v6426_v24  ;;  %2512 = vmatprep.mubr.f32.mxu1 %v6426_v24  ;;  %v61_v24 = vld [vmem:[%s6375_s3 + $0x10] sm:$0xff]  ;;  %184 = vst [vmem:[%s6376_s18 + $0x1e0] sm:$0xff] %v119_v54  ;;  %185 = vst.msk [vmem:[%s6376_s18 + $0x1e8] sm:$0xff] %vm124_vm8, %v120_v44  ;;  %v223_v39 = vld [vmem:[%s6379_s6 + $0x18] sm:$0xff] }
 0x284   :  { %126 = vst [vmem:[%s6376_s18 + $0x10] sm:$0xff] %v61_v24  ;;  %v190_v24 = vld [vmem:[%s6377_s4 + $0x10] sm:$0xff]  ;;  %203 = vst.msk [vmem:[%s6376_s18 + $0x238] sm:$0xff] %vm124_vm8, %v195_v35  ;;  %v224_v20 = vld [vmem:[%s6379_s6 + $0x20] sm:$0xff] }
 0x285   :  { %198 = vst [vmem:[%s6376_s18 + $0x210] sm:$0xff] %v190_v24  ;;  %212 = vst [vmem:[%s6376_s18 + $0x240] sm:$0xff] %v204_v34  ;;  %v222_v61 = vld [vmem:[%s6379_s6 + $0x10] sm:$0xff]  ;;  %v225_v1 = vld [vmem:[%s6379_s6 + $0x28] sm:$0xff] }
 0x286   :  { %2501 = vmatmul.mubr.f32.gmra.mrb[2].mxu0 %v2576_v32  ;;  %2513 = vmatmul.mubr.f32.gmra.mrb[10].mxu1 %v2578_v41  ;;  %v121_v32 = vld [vmem:[%s6375_s3 + $0x1f0] sm:$0xff]  ;;  %v122_v41 = vld [vmem:[%s6375_s3 + $0x1f8] sm:$0xff]  ;;  %213 = vst.msk [vmem:[%s6376_s18 + $0x248] sm:$0xff] %vm124_vm8, %v205_v3  ;;  %214 = vst [vmem:[%s6376_s18 + $0x250] sm:$0xff] %v206_v46 }
 0x287   :  { %186 = vst [vmem:[%s6376_s18 + $0x1f0] sm:$0xff] %v121_v32  ;;  %187 = vst.msk [vmem:[%s6376_s18 + $0x1f8] sm:$0xff] %vm124_vm8, %v122_v41  ;;  %v226_v40 = vld [vmem:[%s6379_s6 + $0x30] sm:$0xff]  ;;  %v227_v42 = vld [vmem:[%s6379_s6 + $0x38] sm:$0xff] }
 0x288   :  { %215 = vst.msk [vmem:[%s6376_s18 + $0x258] sm:$0xff] %vm124_vm8, %v207_v59  ;;  %216 = vst [vmem:[%s6376_s18 + $0x260] sm:$0xff] %v208_v8  ;;  %v236_v0 = vld [vmem:[%s6380_s7] sm:$0xff]  ;;  %v237_v38 = vld [vmem:[%s6380_s7 + $0x8] sm:$0xff] }
 0x289   :  { %217 = vst.msk [vmem:[%s6376_s18 + $0x268] sm:$0xff] %vm124_vm8, %v209_v43  ;;  %218 = vst [vmem:[%s6376_s18 + $0x270] sm:$0xff] %v210_v63  ;;  %v238_v45 = vld [vmem:[%s6380_s7 + $0x10] sm:$0xff]  ;;  %v239_v29 = vld [vmem:[%s6380_s7 + $0x18] sm:$0xff] }
 0x28a   :  { %219 = vst.msk [vmem:[%s6376_s18 + $0x278] sm:$0xff] %vm124_vm8, %v211_v17  ;;  %228 = vst [vmem:[%s6376_s18 + $0x280] sm:$0xff] %v220_v58  ;;  %v240_v26 = vld [vmem:[%s6380_s7 + $0x20] sm:$0xff]  ;;  %v241_v10 = vld [vmem:[%s6380_s7 + $0x28] sm:$0xff] }
 0x28b   :  { %229 = vst.msk [vmem:[%s6376_s18 + $0x288] sm:$0xff] %vm124_vm8, %v221_v27  ;;  %230 = vst [vmem:[%s6376_s18 + $0x290] sm:$0xff] %v222_v61  ;;  %v242_v19 = vld [vmem:[%s6380_s7 + $0x30] sm:$0xff]  ;;  %v243_v28 = vld [vmem:[%s6380_s7 + $0x38] sm:$0xff] }
 0x28c   :  { %231 = vst.msk [vmem:[%s6376_s18 + $0x298] sm:$0xff] %vm124_vm8, %v223_v39  ;;  %232 = vst [vmem:[%s6376_s18 + $0x2a0] sm:$0xff] %v224_v20  ;;  %v252_v7 = vld [vmem:[%s6381_s8] sm:$0xff]  ;;  %v253_v31 = vld [vmem:[%s6381_s8 + $0x8] sm:$0xff] }
 0x28d   :  { %233 = vst.msk [vmem:[%s6376_s18 + $0x2a8] sm:$0xff] %vm124_vm8, %v225_v1  ;;  %234 = vst [vmem:[%s6376_s18 + $0x2b0] sm:$0xff] %v226_v40  ;;  %v254_v12 = vld [vmem:[%s6381_s8 + $0x10] sm:$0xff]  ;;  %v255_v13 = vld [vmem:[%s6381_s8 + $0x18] sm:$0xff] }
 0x28e   :  { %235 = vst.msk [vmem:[%s6376_s18 + $0x2b8] sm:$0xff] %vm124_vm8, %v227_v42  ;;  %244 = vst [vmem:[%s6376_s18 + $0x2c0] sm:$0xff] %v236_v0  ;;  %v256_v47 = vld [vmem:[%s6381_s8 + $0x20] sm:$0xff]  ;;  %v257_v53 = vld [vmem:[%s6381_s8 + $0x28] sm:$0xff] }
 0x28f   :  { %245 = vst.msk [vmem:[%s6376_s18 + $0x2c8] sm:$0xff] %vm124_vm8, %v237_v38  ;;  %246 = vst [vmem:[%s6376_s18 + $0x2d0] sm:$0xff] %v238_v45  ;;  %v258_v11 = vld [vmem:[%s6381_s8 + $0x30] sm:$0xff]  ;;  %v259_v23 = vld [vmem:[%s6381_s8 + $0x38] sm:$0xff] }
 0x290   :  { %247 = vst.msk [vmem:[%s6376_s18 + $0x2d8] sm:$0xff] %vm124_vm8, %v239_v29  ;;  %248 = vst [vmem:[%s6376_s18 + $0x2e0] sm:$0xff] %v240_v26  ;;  %v268_v37 = vld [vmem:[%s6382_s9] sm:$0xff]  ;;  %v269_v16 = vld [vmem:[%s6382_s9 + $0x8] sm:$0xff] }
 0x291   :  { %249 = vst.msk [vmem:[%s6376_s18 + $0x2e8] sm:$0xff] %vm124_vm8, %v241_v10  ;;  %250 = vst [vmem:[%s6376_s18 + $0x2f0] sm:$0xff] %v242_v19  ;;  %v270_v33 = vld [vmem:[%s6382_s9 + $0x10] sm:$0xff]  ;;  %v271_v55 = vld [vmem:[%s6382_s9 + $0x18] sm:$0xff] }
 0x292   :  { %251 = vst.msk [vmem:[%s6376_s18 + $0x2f8] sm:$0xff] %vm124_vm8, %v243_v28  ;;  %260 = vst [vmem:[%s6376_s18 + $0x300] sm:$0xff] %v252_v7  ;;  %v272_v4 = vld [vmem:[%s6382_s9 + $0x20] sm:$0xff]  ;;  %v273_v51 = vld [vmem:[%s6382_s9 + $0x28] sm:$0xff] }
 0x293   :  { %261 = vst.msk [vmem:[%s6376_s18 + $0x308] sm:$0xff] %vm124_vm8, %v253_v31  ;;  %262 = vst [vmem:[%s6376_s18 + $0x310] sm:$0xff] %v254_v12  ;;  %v274_v9 = vld [vmem:[%s6382_s9 + $0x30] sm:$0xff]  ;;  %v275_v56 = vld [vmem:[%s6382_s9 + $0x38] sm:$0xff] }
 0x294   :  { %263 = vst.msk [vmem:[%s6376_s18 + $0x318] sm:$0xff] %vm124_vm8, %v255_v13  ;;  %264 = vst [vmem:[%s6376_s18 + $0x320] sm:$0xff] %v256_v47  ;;  %v284_v57 = vld [vmem:[%s6383_s10] sm:$0xff]  ;;  %v285_v14 = vld [vmem:[%s6383_s10 + $0x8] sm:$0xff] }
 0x295   :  { %265 = vst.msk [vmem:[%s6376_s18 + $0x328] sm:$0xff] %vm124_vm8, %v257_v53  ;;  %266 = vst [vmem:[%s6376_s18 + $0x330] sm:$0xff] %v258_v11  ;;  %v286_v30 = vld [vmem:[%s6383_s10 + $0x10] sm:$0xff]  ;;  %v287_v52 = vld [vmem:[%s6383_s10 + $0x18] sm:$0xff] }
 0x296   :  { %267 = vst.msk [vmem:[%s6376_s18 + $0x338] sm:$0xff] %vm124_vm8, %v259_v23  ;;  %276 = vst [vmem:[%s6376_s18 + $0x340] sm:$0xff] %v268_v37  ;;  %v288_v21 = vld [vmem:[%s6383_s10 + $0x20] sm:$0xff]  ;;  %v289_v15 = vld [vmem:[%s6383_s10 + $0x28] sm:$0xff] }
 0x297   :  { %277 = vst.msk [vmem:[%s6376_s18 + $0x348] sm:$0xff] %vm124_vm8, %v269_v16  ;;  %278 = vst [vmem:[%s6376_s18 + $0x350] sm:$0xff] %v270_v33  ;;  %v290_v6 = vld [vmem:[%s6383_s10 + $0x30] sm:$0xff]  ;;  %v291_v5 = vld [vmem:[%s6383_s10 + $0x38] sm:$0xff] }
 0x298   :  { %279 = vst.msk [vmem:[%s6376_s18 + $0x358] sm:$0xff] %vm124_vm8, %v271_v55  ;;  %280 = vst [vmem:[%s6376_s18 + $0x360] sm:$0xff] %v272_v4  ;;  %v300_v62 = vld [vmem:[%s6384_s11] sm:$0xff]  ;;  %v301_v49 = vld [vmem:[%s6384_s11 + $0x8] sm:$0xff] }
 0x299   :  { %281 = vst.msk [vmem:[%s6376_s18 + $0x368] sm:$0xff] %vm124_vm8, %v273_v51  ;;  %282 = vst [vmem:[%s6376_s18 + $0x370] sm:$0xff] %v274_v9  ;;  %v302_v48 = vld [vmem:[%s6384_s11 + $0x10] sm:$0xff]  ;;  %v303_v50 = vld [vmem:[%s6384_s11 + $0x18] sm:$0xff] }
 0x29a   :  { %283 = vst.msk [vmem:[%s6376_s18 + $0x378] sm:$0xff] %vm124_vm8, %v275_v56  ;;  %292 = vst [vmem:[%s6376_s18 + $0x380] sm:$0xff] %v284_v57  ;;  %v304_v54 = vld [vmem:[%s6384_s11 + $0x20] sm:$0xff]  ;;  %v305_v44 = vld [vmem:[%s6384_s11 + $0x28] sm:$0xff] }
 0x29b   :  { %293 = vst.msk [vmem:[%s6376_s18 + $0x388] sm:$0xff] %vm124_vm8, %v285_v14  ;;  %294 = vst [vmem:[%s6376_s18 + $0x390] sm:$0xff] %v286_v30  ;;  %v306_v32 = vld [vmem:[%s6384_s11 + $0x30] sm:$0xff]  ;;  %v307_v41 = vld [vmem:[%s6384_s11 + $0x38] sm:$0xff] }
 0x29c   :  { %295 = vst.msk [vmem:[%s6376_s18 + $0x398] sm:$0xff] %vm124_vm8, %v287_v52  ;;  %296 = vst [vmem:[%s6376_s18 + $0x3a0] sm:$0xff] %v288_v21  ;;  %v316_v18 = vld [vmem:[%s6385_s12] sm:$0xff]  ;;  %v317_v36 = vld [vmem:[%s6385_s12 + $0x8] sm:$0xff] }
 0x29d   :  { %297 = vst.msk [vmem:[%s6376_s18 + $0x3a8] sm:$0xff] %vm124_vm8, %v289_v15  ;;  %298 = vst [vmem:[%s6376_s18 + $0x3b0] sm:$0xff] %v290_v6  ;;  %v318_v24 = vld [vmem:[%s6385_s12 + $0x10] sm:$0xff]  ;;  %v319_v22 = vld [vmem:[%s6385_s12 + $0x18] sm:$0xff] }
 0x29e   :  { %299 = vst.msk [vmem:[%s6376_s18 + $0x3b8] sm:$0xff] %vm124_vm8, %v291_v5  ;;  %308 = vst [vmem:[%s6376_s18 + $0x3c0] sm:$0xff] %v300_v62  ;;  %v320_v60 = vld [vmem:[%s6385_s12 + $0x20] sm:$0xff]  ;;  %v321_v25 = vld [vmem:[%s6385_s12 + $0x28] sm:$0xff] }
 0x29f   :  { %309 = vst.msk [vmem:[%s6376_s18 + $0x3c8] sm:$0xff] %vm124_vm8, %v301_v49  ;;  %310 = vst [vmem:[%s6376_s18 + $0x3d0] sm:$0xff] %v302_v48  ;;  %v322_v2 = vld [vmem:[%s6385_s12 + $0x30] sm:$0xff]  ;;  %v323_v35 = vld [vmem:[%s6385_s12 + $0x38] sm:$0xff] }
 0x2a0   :  { %311 = vst.msk [vmem:[%s6376_s18 + $0x3d8] sm:$0xff] %vm124_vm8, %v303_v50  ;;  %312 = vst [vmem:[%s6376_s18 + $0x3e0] sm:$0xff] %v304_v54  ;;  %v332_v34 = vld [vmem:[%s6386_s13] sm:$0xff]  ;;  %v333_v3 = vld [vmem:[%s6386_s13 + $0x8] sm:$0xff] }
 0x2a1   :  { %313 = vst.msk [vmem:[%s6376_s18 + $0x3e8] sm:$0xff] %vm124_vm8, %v305_v44  ;;  %314 = vst [vmem:[%s6376_s18 + $0x3f0] sm:$0xff] %v306_v32  ;;  %v334_v46 = vld [vmem:[%s6386_s13 + $0x10] sm:$0xff]  ;;  %v335_v59 = vld [vmem:[%s6386_s13 + $0x18] sm:$0xff] }
 0x2a2   :  { %315 = vst.msk [vmem:[%s6376_s18 + $0x3f8] sm:$0xff] %vm124_vm8, %v307_v41  ;;  %324 = vst [vmem:[%s6376_s18 + $0x400] sm:$0xff] %v316_v18  ;;  %v336_v8 = vld [vmem:[%s6386_s13 + $0x20] sm:$0xff]  ;;  %v337_v43 = vld [vmem:[%s6386_s13 + $0x28] sm:$0xff] }
 0x2a3   :  { %325 = vst.msk [vmem:[%s6376_s18 + $0x408] sm:$0xff] %vm124_vm8, %v317_v36  ;;  %326 = vst [vmem:[%s6376_s18 + $0x410] sm:$0xff] %v318_v24  ;;  %v338_v63 = vld [vmem:[%s6386_s13 + $0x30] sm:$0xff]  ;;  %v339_v17 = vld [vmem:[%s6386_s13 + $0x38] sm:$0xff] }
 0x2a4   :  { %327 = vst.msk [vmem:[%s6376_s18 + $0x418] sm:$0xff] %vm124_vm8, %v319_v22  ;;  %328 = vst [vmem:[%s6376_s18 + $0x420] sm:$0xff] %v320_v60  ;;  %v348_v58 = vld [vmem:[%s6387_s14] sm:$0xff]  ;;  %v349_v27 = vld [vmem:[%s6387_s14 + $0x8] sm:$0xff] }
 0x2a5   :  { %329 = vst.msk [vmem:[%s6376_s18 + $0x428] sm:$0xff] %vm124_vm8, %v321_v25  ;;  %330 = vst [vmem:[%s6376_s18 + $0x430] sm:$0xff] %v322_v2  ;;  %v350_v61 = vld [vmem:[%s6387_s14 + $0x10] sm:$0xff]  ;;  %v351_v39 = vld [vmem:[%s6387_s14 + $0x18] sm:$0xff] }
 0x2a6   :  { %331 = vst.msk [vmem:[%s6376_s18 + $0x438] sm:$0xff] %vm124_vm8, %v323_v35  ;;  %340 = vst [vmem:[%s6376_s18 + $0x440] sm:$0xff] %v332_v34  ;;  %v352_v20 = vld [vmem:[%s6387_s14 + $0x20] sm:$0xff]  ;;  %v353_v1 = vld [vmem:[%s6387_s14 + $0x28] sm:$0xff] }
 0x2a7   :  { %341 = vst.msk [vmem:[%s6376_s18 + $0x448] sm:$0xff] %vm124_vm8, %v333_v3  ;;  %342 = vst [vmem:[%s6376_s18 + $0x450] sm:$0xff] %v334_v46  ;;  %v354_v40 = vld [vmem:[%s6387_s14 + $0x30] sm:$0xff]  ;;  %v355_v42 = vld [vmem:[%s6387_s14 + $0x38] sm:$0xff] }
 0x2a8   :  { %343 = vst.msk [vmem:[%s6376_s18 + $0x458] sm:$0xff] %vm124_vm8, %v335_v59  ;;  %344 = vst [vmem:[%s6376_s18 + $0x460] sm:$0xff] %v336_v8  ;;  %v364_v0 = vld [vmem:[%s6388_s15] sm:$0xff]  ;;  %v365_v38 = vld [vmem:[%s6388_s15 + $0x8] sm:$0xff] }
 0x2a9   :  { %345 = vst.msk [vmem:[%s6376_s18 + $0x468] sm:$0xff] %vm124_vm8, %v337_v43  ;;  %346 = vst [vmem:[%s6376_s18 + $0x470] sm:$0xff] %v338_v63  ;;  %v366_v45 = vld [vmem:[%s6388_s15 + $0x10] sm:$0xff]  ;;  %v367_v29 = vld [vmem:[%s6388_s15 + $0x18] sm:$0xff] }
 0x2aa   :  { %347 = vst.msk [vmem:[%s6376_s18 + $0x478] sm:$0xff] %vm124_vm8, %v339_v17  ;;  %356 = vst [vmem:[%s6376_s18 + $0x480] sm:$0xff] %v348_v58  ;;  %v368_v10 = vld [vmem:[%s6388_s15 + $0x20] sm:$0xff]  ;;  %v369_v19 = vld [vmem:[%s6388_s15 + $0x28] sm:$0xff] }
 0x2ab   :  { %357 = vst.msk [vmem:[%s6376_s18 + $0x488] sm:$0xff] %vm124_vm8, %v349_v27  ;;  %358 = vst [vmem:[%s6376_s18 + $0x490] sm:$0xff] %v350_v61  ;;  %v370_v28 = vld [vmem:[%s6388_s15 + $0x30] sm:$0xff]  ;;  %v371_v31 = vld [vmem:[%s6388_s15 + $0x38] sm:$0xff] }
 0x2ac   :  { %359 = vst.msk [vmem:[%s6376_s18 + $0x498] sm:$0xff] %vm124_vm8, %v351_v39  ;;  %360 = vst [vmem:[%s6376_s18 + $0x4a0] sm:$0xff] %v352_v20  ;;  %v380_v12 = vld [vmem:[%s6389_s16] sm:$0xff]  ;;  %v381_v13 = vld [vmem:[%s6389_s16 + $0x8] sm:$0xff] }
 0x2ad   :  { %361 = vst.msk [vmem:[%s6376_s18 + $0x4a8] sm:$0xff] %vm124_vm8, %v353_v1  ;;  %362 = vst [vmem:[%s6376_s18 + $0x4b0] sm:$0xff] %v354_v40  ;;  %v382_v47 = vld [vmem:[%s6389_s16 + $0x10] sm:$0xff]  ;;  %v383_v53 = vld [vmem:[%s6389_s16 + $0x18] sm:$0xff] }
 0x2ae   :  { %363 = vst.msk [vmem:[%s6376_s18 + $0x4b8] sm:$0xff] %vm124_vm8, %v355_v42  ;;  %372 = vst [vmem:[%s6376_s18 + $0x4c0] sm:$0xff] %v364_v0  ;;  %v384_v11 = vld [vmem:[%s6389_s16 + $0x20] sm:$0xff]  ;;  %v385_v23 = vld [vmem:[%s6389_s16 + $0x28] sm:$0xff] }
 0x2af   :  { %373 = vst.msk [vmem:[%s6376_s18 + $0x4c8] sm:$0xff] %vm124_vm8, %v365_v38  ;;  %374 = vst [vmem:[%s6376_s18 + $0x4d0] sm:$0xff] %v366_v45  ;;  %v386_v37 = vld [vmem:[%s6389_s16 + $0x30] sm:$0xff]  ;;  %v387_v16 = vld [vmem:[%s6389_s16 + $0x38] sm:$0xff] }
 0x2b0   :  { %375 = vst.msk [vmem:[%s6376_s18 + $0x4d8] sm:$0xff] %vm124_vm8, %v367_v29  ;;  %376 = vst [vmem:[%s6376_s18 + $0x4e0] sm:$0xff] %v368_v10  ;;  %v396_v55 = vld [vmem:[%s6390_s17] sm:$0xff]  ;;  %v397_v4 = vld [vmem:[%s6390_s17 + $0x8] sm:$0xff] }
 0x2b1   :  { %377 = vst.msk [vmem:[%s6376_s18 + $0x4e8] sm:$0xff] %vm124_vm8, %v369_v19  ;;  %378 = vst [vmem:[%s6376_s18 + $0x4f0] sm:$0xff] %v370_v28  ;;  %v398_v51 = vld [vmem:[%s6390_s17 + $0x10] sm:$0xff]  ;;  %v399_v56 = vld [vmem:[%s6390_s17 + $0x18] sm:$0xff] }
 0x2b2   :  { %379 = vst.msk [vmem:[%s6376_s18 + $0x4f8] sm:$0xff] %vm124_vm8, %v371_v31  ;;  %388 = vst [vmem:[%s6376_s18 + $0x500] sm:$0xff] %v380_v12  ;;  %v400_v57 = vld [vmem:[%s6390_s17 + $0x20] sm:$0xff]  ;;  %v401_v14 = vld [vmem:[%s6390_s17 + $0x28] sm:$0xff] }
 0x2b3   :  { %389 = vst.msk [vmem:[%s6376_s18 + $0x508] sm:$0xff] %vm124_vm8, %v381_v13  ;;  %390 = vst [vmem:[%s6376_s18 + $0x510] sm:$0xff] %v382_v47  ;;  %v402_v30 = vld [vmem:[%s6390_s17 + $0x30] sm:$0xff]  ;;  %v403_v52 = vld [vmem:[%s6390_s17 + $0x38] sm:$0xff] }
 0x2b4   :  { %391 = vst.msk [vmem:[%s6376_s18 + $0x518] sm:$0xff] %vm124_vm8, %v383_v53  ;;  %392 = vst [vmem:[%s6376_s18 + $0x520] sm:$0xff] %v384_v11 }
 0x2b5   :  { %393 = vst.msk [vmem:[%s6376_s18 + $0x528] sm:$0xff] %vm124_vm8, %v385_v23  ;;  %394 = vst [vmem:[%s6376_s18 + $0x530] sm:$0xff] %v386_v37 }
 0x2b6   :  { %395 = vst.msk [vmem:[%s6376_s18 + $0x538] sm:$0xff] %vm124_vm8, %v387_v16  ;;  %404 = vst [vmem:[%s6376_s18 + $0x580] sm:$0xff] %v396_v55 }
 0x2b7   :  { %405 = vst.msk [vmem:[%s6376_s18 + $0x588] sm:$0xff] %vm124_vm8, %v397_v4  ;;  %406 = vst [vmem:[%s6376_s18 + $0x590] sm:$0xff] %v398_v51 }
 0x2b8   :  { %407 = vst.msk [vmem:[%s6376_s18 + $0x598] sm:$0xff] %vm124_vm8, %v399_v56  ;;  %408 = vst [vmem:[%s6376_s18 + $0x5a0] sm:$0xff] %v400_v57 }
 0x2b9   :  { %409 = vst.msk [vmem:[%s6376_s18 + $0x5a8] sm:$0xff] %vm124_vm8, %v401_v14  ;;  %410 = vst [vmem:[%s6376_s18 + $0x5b0] sm:$0xff] %v402_v30 }
 0x2ba   :  { %411 = vst.msk [vmem:[%s6376_s18 + $0x5b8] sm:$0xff] %vm124_vm8, %v403_v52 }
 0x30d   :  { %v1373_v26 = vpop.f32.mrb[0].mxu1 }
 0x30e   :  { %v1375_v7 = vpop.f32.mrb[1].mxu1 }
 0x311   :  { %v1379_v33 = vpop.f32.mrb[2].mxu1 }
 0x312   :  { %v1381_v9 = vpop.f32.mrb[3].mxu1 }
 0x315   :  { %v1385_v21 = vpop.f32.mrb[4].mxu1 }
 0x316   :  { %v1387_v15 = vpop.f32.mrb[5].mxu1 }
 0x319   :  { %v1391_v6 = vpop.f32.mrb[6].mxu1 }
 0x31a   :  { %v1393_v5 = vpop.f32.mrb[7].mxu1 }
 0x31d   :  { %v2264_v62 = vpop.f32.mrb[4].mxu0 }
 0x31e   :  { %v2887_v49 = vadd.f32 %v2264_v62, %v1385_v21  ;;  %v2266_v48 = vpop.f32.mrb[5].mxu0 }
 0x31f   :  { %v2889_v50 = vadd.f32 %v2266_v48, %v1387_v15 }
 0x321   :  { %v2270_v54 = vpop.f32.mrb[6].mxu0 }
 0x322   :  { %v2891_v44 = vadd.f32 %v2270_v54, %v1391_v6  ;;  %v2272_v32 = vpop.f32.mrb[7].mxu0 }
 0x323   :  { %v2893_v41 = vadd.f32 %v2272_v32, %v1393_v5 }
 0x355   :  { %v2496_v18 = vpop.f32.mrb[0].mxu0  ;;  %v2508_v36 = vpop.f32.mrb[8].mxu1 }
 0x356   :  { %v2883_v24 = vadd.f32 %v2496_v18, %v1373_v26  ;;  %v2888_v22 = vadd.f32 %v2887_v49, %v2508_v36  ;;  %v2498_v60 = vpop.f32.mrb[1].mxu0  ;;  %v2510_v25 = vpop.f32.mrb[9].mxu1 }
 0x357   :  { %v2884_v2 = vadd.f32 %v2498_v60, %v1375_v7  ;;  %v2890_v35 = vadd.f32 %v2889_v50, %v2510_v25 }
 0x358   :  { %2527 = vst [vmem:[%s6376_s18 + $0x540] sm:$0xff] %v2883_v24  ;;  %2531 = vst [vmem:[%s6376_s18 + $0x560] sm:$0xff] %v2888_v22 }
 0x359   :  { %2528 = vst.msk [vmem:[%s6376_s18 + $0x548] sm:$0xff] %vm124_vm8, %v2884_v2  ;;  %2532 = vst.msk [vmem:[%s6376_s18 + $0x568] sm:$0xff] %vm124_vm8, %v2890_v35  ;;  %v2502_v34 = vpop.f32.mrb[2].mxu0  ;;  %v2514_v3 = vpop.f32.mrb[10].mxu1 }
 0x35a   :  { %v2885_v46 = vadd.f32 %v2502_v34, %v1379_v33  ;;  %v2892_v59 = vadd.f32 %v2891_v44, %v2514_v3  ;;  %v2504_v8 = vpop.f32.mrb[3].mxu0  ;;  %v2516_v43 = vpop.f32.mrb[11].mxu1 }
 0x35b   :  { %v2886_v63 = vadd.f32 %v2504_v8, %v1381_v9  ;;  %v2894_v17 = vadd.f32 %v2893_v41, %v2516_v43 }
 0x35c   :  { %2529 = vst [vmem:[%s6376_s18 + $0x550] sm:$0xff] %v2885_v46  ;;  %2533 = vst [vmem:[%s6376_s18 + $0x570] sm:$0xff] %v2892_v59 }
 0x35d   :  { %2530 = vst.msk [vmem:[%s6376_s18 + $0x558] sm:$0xff] %vm124_vm8, %v2886_v63  ;;  %2534 = vst.msk [vmem:[%s6376_s18 + $0x578] sm:$0xff] %vm124_vm8, %v2894_v17 }

</bundles_post_ra>
